<compile_context>
chip_gen: v5e
topology: v5e:2x2
jax: 0.10.0
libtpu: 0.0.40
codegen_flags: <defaults>
</compile_context>

<pallas_src>
import jax
import jax.numpy as jnp
import numpy as np
from jax.experimental import pallas as pl
from jax.experimental.pallas import tpu as pltpu

HIDDEN = 128          # input_proj / TCN channel width
FUSION_OUT = 256      # fusion Conv1d(384 -> 256, k=1)
NUM_LAYERS = 3        # layers per TCN branch
EPS = 1e-5            # BatchNorm eps
DILATION_GROWTHS = (1, 2, 4)

IMAGENET_MEAN = jnp.array([0.485, 0.456, 0.406], jnp.float32)
IMAGENET_STD = jnp.array([0.229, 0.224, 0.225], jnp.float32)


def _branch_dilations():
    # PyTorch: dilation starts at 1 and multiplies by dilation_growth per layer.
    return tuple(tuple(int(g) ** i for i in range(NUM_LAYERS)) for g in DILATION_GROWTHS)


# --------------------------- fused Pallas kernel -----------------------------

def _make_fused_kernel(Bblk, T, branch_dilations):
    """One grid step = Bblk batch rows: proj -> 3 TCN branches -> fusion -> head."""
    C = HIDDEN
    L = len(branch_dilations[0])
    DMAX = max(max(d) for d in branch_dilations)
    DPAD = ((max(DMAX, 8) + 7) // 8) * 8        # 8-sublane-aligned interior store
    M = Bblk * T

    def kernel(feats_ref, pw_ref, pb_ref, w_ref, b_ref, sc_ref, sh_ref,
               fw_ref, fb_ref, hw_ref, hb_ref, out_ref, pad_ref):
        # ---- input projection over all Bblk*T rows at once (fat MXU M dim) ----
        feats = feats_ref[...].reshape(M, feats_ref.shape[-1])          # bf16
        fp = (jnp.dot(feats, pw_ref[...], preferred_element_type=jnp.float32)
              + pb_ref[0][None, :])                                     # (M, C) f32

        # Zero only the halo rows (interior is overwritten every layer); the zero
        # halo provides the Conv1d "same" padding and isolates batch rows.
        halo = jnp.zeros((Bblk, DPAD, C), jnp.float32)
        pad_ref[:, :DPAD, :] = halo
        pad_ref[:, DPAD + T:, :] = halo

        fused = fb_ref[0][None, :]                                      # (1, 256)
        for br, dils in enumerate(branch_dilations):
            h = fp
            for l, d in enumerate(dils):
                idx = br * L + l
                pad_ref[:, DPAD:DPAD + T, :] = h.reshape(Bblk, T, C)
                # taps t-d / t / t+d via static slices of the per-row halo buffer
                left = pad_ref[:, DPAD - d:DPAD - d + T, :].reshape(M, C)
                right = pad_ref[:, DPAD + d:DPAD + d + T, :].reshape(M, C)
                taps = jnp.concatenate([left, h, right], axis=-1)       # (M, 3C)
                acc = jnp.dot(taps.astype(jnp.bfloat16), w_ref[idx],
                              preferred_element_type=jnp.float32)       # K = 384
                acc = jnp.maximum(acc + b_ref[idx][None, :], 0.0)       # bias + ReLU
                h = acc * sc_ref[idx][None, :] + sh_ref[idx][None, :]   # folded BN
            t_br = h + fp                                               # residual
            # fusion Conv1d(384 -> 256, k=1), split per branch: sum of (128,256) mms
            fused = fused + jnp.dot(t_br.astype(jnp.bfloat16), fw_ref[br],
                                    preferred_element_type=jnp.float32)

        # classification head (256 -> padded 128 lanes), lane-dense store
        out = (jnp.dot(fused.astype(jnp.bfloat16), hw_ref[...],
                       preferred_element_type=jnp.float32)
               + hb_ref[0][None, :])
        out_ref[...] = out.reshape(Bblk, T, out_ref.shape[-1]).astype(out_ref.dtype)

    return kernel, DPAD


def _choose_block_batch(B, T):
    """Rows per grid step: target ~256 MXU rows, but keep >= 2 grid steps (v7x)."""
    bblk = max(1, min(B, 256 // max(T, 1)))
    if B >= 2:
        bblk = min(bblk, max(1, B // 2))
    while B % bblk:
        bblk -= 1
    return bblk


def tcn_multiscale_head(feats, params):
    """feats: (B, T, feat_dim) f32 -> logits (B, T, num_classes + 1) f32."""
    B, T, D = feats.shape
    C, L = HIDDEN, NUM_LAYERS
    branch_dils = _branch_dilations()

    # ---- host-side parameter repacking (exact eval-mode folds, bf16 matmul wts) ----
    w_all, b_all, sc_all, sh_all = [], [], [], []
    for name in ("tcn1", "tcn2", "tcn3"):
        w, b, g, beta, mu, var = params[name]
        w_all.append(w.reshape(L, 3 * C, C))       # per-tap (Cin, Cout) stacked on rows
        b_all.append(b)
        scale = g * jax.lax.rsqrt(var + EPS)
        sc_all.append(scale)
        sh_all.append(beta - mu * scale)
    w_all = jnp.concatenate(w_all, axis=0).astype(jnp.bfloat16)     # (3L, 3C, C)
    b_all = jnp.concatenate(b_all, axis=0)                          # (3L, C) f32
    sc_all = jnp.concatenate(sc_all, axis=0)                        # (3L, C) f32
    sh_all = jnp.concatenate(sh_all, axis=0)                        # (3L, C) f32

    # feat_dim -> multiple of 128 lanes (zero cols in feats / zero rows in proj_w)
    Dpad = ((D + 127) // 128) * 128
    feats_p = jnp.pad(feats, ((0, 0), (0, 0), (0, Dpad - D))).astype(jnp.bfloat16)
    pw = jnp.pad(params["proj_w"], ((0, Dpad - D), (0, 0))).astype(jnp.bfloat16)
    pb = params["proj_b"]
    fw = params["fusion_w"].astype(jnp.bfloat16)
    fb = params["fusion_b"]

    K1 = params["head_w"].shape[1]
    KPAD = ((K1 + 127) // 128) * 128                                # lane-dense output
    hw = jnp.pad(params["head_w"], ((0, 0), (0, KPAD - K1))).astype(jnp.bfloat16)
    hb = jnp.pad(params["head_b"], ((0, 0), (0, KPAD - K1)))

    Bblk = _choose_block_batch(B, T)
    kernel, DPAD = _make_fused_kernel(Bblk, T, branch_dils)

    def full(shape):
        n = len(shape)
        return pl.BlockSpec(shape, lambda i, n=n: (0,) * n)

    # VMEM budget: double-buffered weights + io blocks + halo scratch + slack,
    # clamped to a range that is safe on v5e/v6e (128 MiB) and v7x (64 MiB).
    weight_bytes = sum(int(np.prod(a.shape)) * a.dtype.itemsize
                       for a in (pw, pb, w_all, b_all, sc_all, sh_all, fw, fb, hw, hb))
    io_bytes = Bblk * T * (Dpad * 2 + KPAD * 4)
    scratch_bytes = Bblk * (T + 2 * DPAD) * C * 4
    vmem_limit = 4 * (weight_bytes + io_bytes) + 2 * scratch_bytes + (4 << 20)
    vmem_limit = int(min(max(vmem_limit, 16 << 20), 40 << 20))

    out = pl.pallas_call(
        kernel,
        out_shape=jax.ShapeDtypeStruct((B, T, KPAD), jnp.float32),
        grid=(B // Bblk,),
        in_specs=[pl.BlockSpec((Bblk, T, Dpad), lambda i: (i, 0, 0)),
                  full(pw.shape), full(pb.shape),
                  full(w_all.shape), full(b_all.shape),
                  full(sc_all.shape), full(sh_all.shape),
                  full(fw.shape), full(fb.shape),
                  full(hw.shape), full(hb.shape)],
        out_specs=pl.BlockSpec((Bblk, T, KPAD), lambda i: (i, 0, 0)),
        scratch_shapes=[pltpu.VMEM((Bblk, T + 2 * DPAD, C), jnp.float32)],
        compiler_params=pltpu.CompilerParams(
            dimension_semantics=("parallel",),
            vmem_limit_bytes=vmem_limit),
    )(feats_p, pw, pb, w_all, b_all, sc_all, sh_all, fw, fb, hw, hb)
    return out[..., :K1]


# --------------------------- parameters --------------------------------------

def init_params(key, feat_dim, num_classes):
    keys = jax.random.split(key, 16)

    def dense(k, shape, fan_in):
        return (jax.random.normal(k, shape, jnp.float32) / np.sqrt(fan_in)).astype(jnp.float32)

    def tcn_params(k):
        ks = jax.random.split(k, 6)
        # torch Conv1d weight is (Cout, Cin, 3); stored here per-tap (Cin, Cout).
        w = dense(ks[0], (NUM_LAYERS, 3, HIDDEN, HIDDEN), 3 * HIDDEN)
        b = dense(ks[1], (NUM_LAYERS, HIDDEN), 3 * HIDDEN)
        g = 1.0 + 0.1 * jax.random.normal(ks[2], (NUM_LAYERS, HIDDEN), jnp.float32)
        beta = 0.1 * jax.random.normal(ks[3], (NUM_LAYERS, HIDDEN), jnp.float32)
        mu = 0.1 * jax.random.normal(ks[4], (NUM_LAYERS, HIDDEN), jnp.float32)
        var = 0.5 + 0.5 * jnp.abs(jax.random.normal(ks[5], (NUM_LAYERS, HIDDEN), jnp.float32))
        return (w, b, g, beta, mu, var)

    p = {
        "proj_w": dense(keys[0], (feat_dim, HIDDEN), feat_dim),
        "proj_b": dense(keys[1], (1, HIDDEN), feat_dim),
        "tcn1": tcn_params(keys[2]),
        "tcn2": tcn_params(keys[3]),
        "tcn3": tcn_params(keys[4]),
        # fusion Conv1d(384->256, k=1): stored transposed + split per branch
        "fusion_w": dense(keys[5], (3, HIDDEN, FUSION_OUT), 3 * HIDDEN),
        "fusion_b": dense(keys[6], (1, FUSION_OUT), 3 * HIDDEN),
        "head_w": dense(keys[7], (FUSION_OUT, num_classes + 1), FUSION_OUT),
        "head_b": dense(keys[8], (1, num_classes + 1), FUSION_OUT),
        # stand-in backbone (see TODO below)
        "backbone_w": dense(keys[9], (3, feat_dim), 3),
        "backbone_b": dense(keys[10], (1, feat_dim), 3),
    }
    return p


# --------------------------- forward pass -------------------------------------

def forward(params, x):
    """x: (B, T, C, H, W) raw pixel values in [0, 255] (eval-mode forward)."""
    x = x / 255.0                                                    # self.normalize
    x = (x - IMAGENET_MEAN[None, None, :, None, None]) / IMAGENET_STD[None, None, :, None, None]
    # TODO(synk): pretrained timm RegNetY backbone (self._features) has no in-script
    # equivalent; replaced by a deterministic stand-in: global average pool + linear.
    pooled = x.mean(axis=(3, 4))                                     # (B, T, 3)
    feats = pooled @ params["backbone_w"] + params["backbone_b"]     # (B, T, feat_dim)
    return tcn_multiscale_head(feats, params)                        # (B, T, K+1)


# Pure-JAX reference (f32, HIGHEST precision) for numerical verification.
def reference_forward(params, x):
    HI = jax.lax.Precision.HIGHEST
    x = x / 255.0
    x = (x - IMAGENET_MEAN[None, None, :, None, None]) / IMAGENET_STD[None, None, :, None, None]
    pooled = x.mean(axis=(3, 4))
    feats = pooled @ params["backbone_w"] + params["backbone_b"]
    fp = jnp.einsum("btd,dh->bth", feats, params["proj_w"], precision=HI) + params["proj_b"][0]

    def tcn_ref(h0, p, dg):
        w, b, g, beta, mu, var = p
        h = h0
        T = h.shape[1]
        for l in range(w.shape[0]):
            d = dg ** l
            hp = jnp.pad(h, ((0, 0), (d, d), (0, 0)))
            acc = jnp.zeros_like(h)
            for k in range(3):
                acc = acc + jnp.einsum("btc,cd->btd", hp[:, k * d:k * d + T, :],
                                       w[l, k], precision=HI)
            acc = jnp.maximum(acc + b[l], 0.0)
            h = (acc - mu[l]) * (g[l] * jax.lax.rsqrt(var[l] + EPS)) + beta[l]
        return h + h0

    t1 = tcn_ref(fp, params["tcn1"], 1)
    t2 = tcn_ref(fp, params["tcn2"], 2)
    t3 = tcn_ref(fp, params["tcn3"], 4)
    f = (jnp.einsum("btc,cd->btd", t1, params["fusion_w"][0], precision=HI)
         + jnp.einsum("btc,cd->btd", t2, params["fusion_w"][1], precision=HI)
         + jnp.einsum("btc,cd->btd", t3, params["fusion_w"][2], precision=HI)
         + params["fusion_b"][0])
    return jnp.einsum("btc,ck->btk", f, params["head_w"], precision=HI) + params["head_b"][0]


# --------------------------- main ---------------------------------------------

if __name__ == "__main__":
    B, T, C, H, W = 4, 32, 3, 16, 16       # small video clip: 4 clips of 32 frames
    FEAT_DIM = 64                          # synthetic feat_dim (rny002 would be 368)
    NUM_CLASSES = 7

    key = jax.random.PRNGKey(0)
    kx, kp = jax.random.split(key)
    x = jax.random.uniform(kx, (B, T, C, H, W), jnp.float32, 0.0, 255.0)
    params = init_params(kp, FEAT_DIM, NUM_CLASSES)

    out = jax.block_until_ready(forward(params, x))
    assert out.shape == (B, T, NUM_CLASSES + 1), out.shape

    ref = jax.block_until_ready(reference_forward(params, x))
    # Kernel uses bf16 MXU operands with f32 accumulation; compare against the
    # f32 HIGHEST-precision reference with a bf16-appropriate tolerance.
    np.testing.assert_allclose(np.asarray(out), np.asarray(ref), rtol=2e-2, atol=2e-2)

    print("KERNEL_OK")
</pallas_src>

<mosaic_0001>
module attributes {stable_mosaic.version = 11 : i64} {
  func.func @kernel(%arg0: i32, %arg1: memref<2x32x128xbf16, #tpu.memory_space<vmem>>, %arg2: memref<128x128xbf16, #tpu.memory_space<vmem>>, %arg3: memref<1x128xf32, #tpu.memory_space<vmem>>, %arg4: memref<9x384x128xbf16, #tpu.memory_space<vmem>>, %arg5: memref<9x128xf32, #tpu.memory_space<vmem>>, %arg6: memref<9x128xf32, #tpu.memory_space<vmem>>, %arg7: memref<9x128xf32, #tpu.memory_space<vmem>>, %arg8: memref<3x128x256xbf16, #tpu.memory_space<vmem>>, %arg9: memref<1x256xf32, #tpu.memory_space<vmem>>, %arg10: memref<256x128xbf16, #tpu.memory_space<vmem>>, %arg11: memref<1x128xf32, #tpu.memory_space<vmem>>, %arg12: memref<2x32x128xf32, #tpu.memory_space<vmem>>, %arg13: memref<2x64x128xf32, #tpu.memory_space<vmem>>) attributes {dimension_semantics = [#tpu.dimension_semantics<parallel>], iteration_bounds = array<i64: 2>, scalar_prefetch = 0 : i64, scratch_operands = 1 : i64, tpu.core_type = #tpu.core_type<tc>, window_params = [{transform_indices = @transform_0, window_bounds = array<i64: 2, 32, 128>}, {pipeline_mode = #tpu.pipeline_mode<synchronous>, transform_indices = @transform_1, window_bounds = array<i64: 128, 128>}, {pipeline_mode = #tpu.pipeline_mode<synchronous>, transform_indices = @transform_2, window_bounds = array<i64: 1, 128>}, {pipeline_mode = #tpu.pipeline_mode<synchronous>, transform_indices = @transform_3, window_bounds = array<i64: 9, 384, 128>}, {pipeline_mode = #tpu.pipeline_mode<synchronous>, transform_indices = @transform_4, window_bounds = array<i64: 9, 128>}, {pipeline_mode = #tpu.pipeline_mode<synchronous>, transform_indices = @transform_5, window_bounds = array<i64: 9, 128>}, {pipeline_mode = #tpu.pipeline_mode<synchronous>, transform_indices = @transform_6, window_bounds = array<i64: 9, 128>}, {pipeline_mode = #tpu.pipeline_mode<synchronous>, transform_indices = @transform_7, window_bounds = array<i64: 3, 128, 256>}, {pipeline_mode = #tpu.pipeline_mode<synchronous>, transform_indices = @transform_8, window_bounds = array<i64: 1, 256>}, {pipeline_mode = #tpu.pipeline_mode<synchronous>, transform_indices = @transform_9, window_bounds = array<i64: 256, 128>}, {pipeline_mode = #tpu.pipeline_mode<synchronous>, transform_indices = @transform_10, window_bounds = array<i64: 1, 128>}, {transform_indices = @transform_11, window_bounds = array<i64: 2, 32, 128>}]} {
    %c0 = arith.constant 0 : index
    %c0_0 = arith.constant 0 : index
    %c0_1 = arith.constant 0 : index
    %0 = vector.load %arg1[%c0, %c0_0, %c0_1] : memref<2x32x128xbf16, #tpu.memory_space<vmem>>, vector<2x32x128xbf16>
    %1 = vector.shape_cast %0 : vector<2x32x128xbf16> to vector<64x128xbf16>
    %c0_2 = arith.constant 0 : index
    %c0_3 = arith.constant 0 : index
    %2 = vector.load %arg2[%c0_2, %c0_3] : memref<128x128xbf16, #tpu.memory_space<vmem>>, vector<128x128xbf16>
    %cst = arith.constant dense<0.000000e+00> : vector<64x128xf32>
    %3 = tpu.matmul %1, %2, %cst {dimension_numbers = #tpu.dot_dimension_numbers<[1], [0], [0], [1], [0, 0, 1, 1], [], []>} : vector<64x128xbf16>, vector<128x128xbf16>, vector<64x128xf32> -> vector<64x128xf32>
    %c0_4 = arith.constant 0 : index
    %c0_5 = arith.constant 0 : index
    %4 = vector.load %arg3[%c0_4, %c0_5] : memref<1x128xf32, #tpu.memory_space<vmem>>, vector<1x128xf32>
    %5 = vector.shape_cast %4 : vector<1x128xf32> to vector<128xf32>
    %6 = vector.shape_cast %5 : vector<128xf32> to vector<1x128xf32>
    %7 = vector.broadcast %6 : vector<1x128xf32> to vector<64x128xf32>
    %8 = arith.addf %3, %7 : vector<64x128xf32>
    %cst_6 = arith.constant 0.000000e+00 : f32
    %9 = vector.broadcast %cst_6 : f32 to vector<2x16x128xf32>
    %c0_7 = arith.constant 0 : index
    %c0_8 = arith.constant 0 : index
    %c0_9 = arith.constant 0 : index
    %10 = vector.load %arg13[%c0_7, %c0_8, %c0_9] : memref<2x64x128xf32, #tpu.memory_space<vmem>>, vector<2x16x128xf32>
    tpu.vector_store %arg13[%c0_7, %c0_8, %c0_9], %9 {strides = array<i32>} : memref<2x64x128xf32, #tpu.memory_space<vmem>>, vector<2x16x128xf32>,
    %c0_10 = arith.constant 0 : index
    %c48 = arith.constant 48 : index
    %c0_11 = arith.constant 0 : index
    %11 = vector.load %arg13[%c0_10, %c48, %c0_11] : memref<2x64x128xf32, #tpu.memory_space<vmem>>, vector<2x16x128xf32>
    tpu.vector_store %arg13[%c0_10, %c48, %c0_11], %9 {strides = array<i32>} : memref<2x64x128xf32, #tpu.memory_space<vmem>>, vector<2x16x128xf32>,
    %c0_12 = arith.constant 0 : index
    %c0_13 = arith.constant 0 : index
    %12 = vector.load %arg9[%c0_12, %c0_13] : memref<1x256xf32, #tpu.memory_space<vmem>>, vector<1x256xf32>
    %13 = vector.shape_cast %12 : vector<1x256xf32> to vector<256xf32>
    %14 = vector.shape_cast %13 : vector<256xf32> to vector<1x256xf32>
    %15 = vector.shape_cast %8 : vector<64x128xf32> to vector<2x32x128xf32>
    %c0_14 = arith.constant 0 : index
    %c16 = arith.constant 16 : index
    %c0_15 = arith.constant 0 : index
    %16 = vector.load %arg13[%c0_14, %c16, %c0_15] : memref<2x64x128xf32, #tpu.memory_space<vmem>>, vector<2x32x128xf32>
    tpu.vector_store %arg13[%c0_14, %c16, %c0_15], %15 {strides = array<i32>} : memref<2x64x128xf32, #tpu.memory_space<vmem>>, vector<2x32x128xf32>,
    %c0_16 = arith.constant 0 : index
    %c15 = arith.constant 15 : index
    %c0_17 = arith.constant 0 : index
    %17 = vector.load %arg13[%c0_16, %c15, %c0_17] : memref<2x64x128xf32, #tpu.memory_space<vmem>>, vector<2x32x128xf32>
    %18 = vector.shape_cast %17 : vector<2x32x128xf32> to vector<64x128xf32>
    %c0_18 = arith.constant 0 : index
    %c17 = arith.constant 17 : index
    %c0_19 = arith.constant 0 : index
    %19 = vector.load %arg13[%c0_18, %c17, %c0_19] : memref<2x64x128xf32, #tpu.memory_space<vmem>>, vector<2x32x128xf32>
    %20 = vector.shape_cast %19 : vector<2x32x128xf32> to vector<64x128xf32>
    %21 = tpu.concatenate %18, %8, %20 in 1 : vector<64x128xf32>, vector<64x128xf32>, vector<64x128xf32> -> vector<64x384xf32>
    %22 = arith.truncf %21 : vector<64x384xf32> to vector<64x384xbf16>
    %c0_20 = arith.constant 0 : index
    %c0_21 = arith.constant 0 : index
    %c0_22 = arith.constant 0 : index
    %23 = vector.load %arg4[%c0_20, %c0_21, %c0_22] : memref<9x384x128xbf16, #tpu.memory_space<vmem>>, vector<1x384x128xbf16>
    %24 = vector.shape_cast %23 : vector<1x384x128xbf16> to vector<384x128xbf16>
    %cst_23 = arith.constant dense<0.000000e+00> : vector<64x128xf32>
    %25 = tpu.matmul %22, %24, %cst_23 {dimension_numbers = #tpu.dot_dimension_numbers<[1], [0], [0], [1], [0, 0, 1, 1], [], []>} : vector<64x384xbf16>, vector<384x128xbf16>, vector<64x128xf32> -> vector<64x128xf32>
    %c0_24 = arith.constant 0 : index
    %c0_25 = arith.constant 0 : index
    %26 = vector.load %arg5[%c0_24, %c0_25] : memref<9x128xf32, #tpu.memory_space<vmem>>, vector<1x128xf32>
    %27 = vector.shape_cast %26 : vector<1x128xf32> to vector<128xf32>
    %28 = vector.shape_cast %27 : vector<128xf32> to vector<1x128xf32>
    %29 = vector.broadcast %28 : vector<1x128xf32> to vector<64x128xf32>
    %30 = arith.addf %25, %29 : vector<64x128xf32>
    %cst_26 = arith.constant 0.000000e+00 : f32
    %31 = vector.broadcast %cst_26 : f32 to vector<64x128xf32>
    %32 = arith.maximumf %30, %31 : vector<64x128xf32>
    %c0_27 = arith.constant 0 : index
    %c0_28 = arith.constant 0 : index
    %33 = vector.load %arg6[%c0_27, %c0_28] : memref<9x128xf32, #tpu.memory_space<vmem>>, vector<1x128xf32>
    %34 = vector.shape_cast %33 : vector<1x128xf32> to vector<128xf32>
    %35 = vector.shape_cast %34 : vector<128xf32> to vector<1x128xf32>
    %36 = vector.broadcast %35 : vector<1x128xf32> to vector<64x128xf32>
    %37 = arith.mulf %32, %36 : vector<64x128xf32>
    %c0_29 = arith.constant 0 : index
    %c0_30 = arith.constant 0 : index
    %38 = vector.load %arg7[%c0_29, %c0_30] : memref<9x128xf32, #tpu.memory_space<vmem>>, vector<1x128xf32>
    %39 = vector.shape_cast %38 : vector<1x128xf32> to vector<128xf32>
    %40 = vector.shape_cast %39 : vector<128xf32> to vector<1x128xf32>
    %41 = vector.broadcast %40 : vector<1x128xf32> to vector<64x128xf32>
    %42 = arith.addf %37, %41 : vector<64x128xf32>
    %43 = vector.shape_cast %42 : vector<64x128xf32> to vector<2x32x128xf32>
    %c0_31 = arith.constant 0 : index
    %c16_32 = arith.constant 16 : index
    %c0_33 = arith.constant 0 : index
    %44 = vector.load %arg13[%c0_31, %c16_32, %c0_33] : memref<2x64x128xf32, #tpu.memory_space<vmem>>, vector<2x32x128xf32>
    tpu.vector_store %arg13[%c0_31, %c16_32, %c0_33], %43 {strides = array<i32>} : memref<2x64x128xf32, #tpu.memory_space<vmem>>, vector<2x32x128xf32>,
    %c0_34 = arith.constant 0 : index
    %c15_35 = arith.constant 15 : index
    %c0_36 = arith.constant 0 : index
    %45 = vector.load %arg13[%c0_34, %c15_35, %c0_36] : memref<2x64x128xf32, #tpu.memory_space<vmem>>, vector<2x32x128xf32>
    %46 = vector.shape_cast %45 : vector<2x32x128xf32> to vector<64x128xf32>
    %c0_37 = arith.constant 0 : index
    %c17_38 = arith.constant 17 : index
    %c0_39 = arith.constant 0 : index
    %47 = vector.load %arg13[%c0_37, %c17_38, %c0_39] : memref<2x64x128xf32, #tpu.memory_space<vmem>>, vector<2x32x128xf32>
    %48 = vector.shape_cast %47 : vector<2x32x128xf32> to vector<64x128xf32>
    %49 = tpu.concatenate %46, %42, %48 in 1 : vector<64x128xf32>, vector<64x128xf32>, vector<64x128xf32> -> vector<64x384xf32>
    %50 = arith.truncf %49 : vector<64x384xf32> to vector<64x384xbf16>
    %c1 = arith.constant 1 : index
    %c0_40 = arith.constant 0 : index
    %c0_41 = arith.constant 0 : index
    %51 = vector.load %arg4[%c1, %c0_40, %c0_41] : memref<9x384x128xbf16, #tpu.memory_space<vmem>>, vector<1x384x128xbf16>
    %52 = vector.shape_cast %51 : vector<1x384x128xbf16> to vector<384x128xbf16>
    %cst_42 = arith.constant dense<0.000000e+00> : vector<64x128xf32>
    %53 = tpu.matmul %50, %52, %cst_42 {dimension_numbers = #tpu.dot_dimension_numbers<[1], [0], [0], [1], [0, 0, 1, 1], [], []>} : vector<64x384xbf16>, vector<384x128xbf16>, vector<64x128xf32> -> vector<64x128xf32>
    %c1_43 = arith.constant 1 : index
    %c0_44 = arith.constant 0 : index
    %54 = vector.load %arg5[%c1_43, %c0_44] : memref<9x128xf32, #tpu.memory_space<vmem>>, vector<1x128xf32>
    %55 = vector.shape_cast %54 : vector<1x128xf32> to vector<128xf32>
    %56 = vector.shape_cast %55 : vector<128xf32> to vector<1x128xf32>
    %57 = vector.broadcast %56 : vector<1x128xf32> to vector<64x128xf32>
    %58 = arith.addf %53, %57 : vector<64x128xf32>
    %cst_45 = arith.constant 0.000000e+00 : f32
    %59 = vector.broadcast %cst_45 : f32 to vector<64x128xf32>
    %60 = arith.maximumf %58, %59 : vector<64x128xf32>
    %c1_46 = arith.constant 1 : index
    %c0_47 = arith.constant 0 : index
    %61 = vector.load %arg6[%c1_46, %c0_47] : memref<9x128xf32, #tpu.memory_space<vmem>>, vector<1x128xf32>
    %62 = vector.shape_cast %61 : vector<1x128xf32> to vector<128xf32>
    %63 = vector.shape_cast %62 : vector<128xf32> to vector<1x128xf32>
    %64 = vector.broadcast %63 : vector<1x128xf32> to vector<64x128xf32>
    %65 = arith.mulf %60, %64 : vector<64x128xf32>
    %c1_48 = arith.constant 1 : index
    %c0_49 = arith.constant 0 : index
    %66 = vector.load %arg7[%c1_48, %c0_49] : memref<9x128xf32, #tpu.memory_space<vmem>>, vector<1x128xf32>
    %67 = vector.shape_cast %66 : vector<1x128xf32> to vector<128xf32>
    %68 = vector.shape_cast %67 : vector<128xf32> to vector<1x128xf32>
    %69 = vector.broadcast %68 : vector<1x128xf32> to vector<64x128xf32>
    %70 = arith.addf %65, %69 : vector<64x128xf32>
    %71 = vector.shape_cast %70 : vector<64x128xf32> to vector<2x32x128xf32>
    %c0_50 = arith.constant 0 : index
    %c16_51 = arith.constant 16 : index
    %c0_52 = arith.constant 0 : index
    %72 = vector.load %arg13[%c0_50, %c16_51, %c0_52] : memref<2x64x128xf32, #tpu.memory_space<vmem>>, vector<2x32x128xf32>
    tpu.vector_store %arg13[%c0_50, %c16_51, %c0_52], %71 {strides = array<i32>} : memref<2x64x128xf32, #tpu.memory_space<vmem>>, vector<2x32x128xf32>,
    %c0_53 = arith.constant 0 : index
    %c15_54 = arith.constant 15 : index
    %c0_55 = arith.constant 0 : index
    %73 = vector.load %arg13[%c0_53, %c15_54, %c0_55] : memref<2x64x128xf32, #tpu.memory_space<vmem>>, vector<2x32x128xf32>
    %74 = vector.shape_cast %73 : vector<2x32x128xf32> to vector<64x128xf32>
    %c0_56 = arith.constant 0 : index
    %c17_57 = arith.constant 17 : index
    %c0_58 = arith.constant 0 : index
    %75 = vector.load %arg13[%c0_56, %c17_57, %c0_58] : memref<2x64x128xf32, #tpu.memory_space<vmem>>, vector<2x32x128xf32>
    %76 = vector.shape_cast %75 : vector<2x32x128xf32> to vector<64x128xf32>
    %77 = tpu.concatenate %74, %70, %76 in 1 : vector<64x128xf32>, vector<64x128xf32>, vector<64x128xf32> -> vector<64x384xf32>
    %78 = arith.truncf %77 : vector<64x384xf32> to vector<64x384xbf16>
    %c2 = arith.constant 2 : index
    %c0_59 = arith.constant 0 : index
    %c0_60 = arith.constant 0 : index
    %79 = vector.load %arg4[%c2, %c0_59, %c0_60] : memref<9x384x128xbf16, #tpu.memory_space<vmem>>, vector<1x384x128xbf16>
    %80 = vector.shape_cast %79 : vector<1x384x128xbf16> to vector<384x128xbf16>
    %cst_61 = arith.constant dense<0.000000e+00> : vector<64x128xf32>
    %81 = tpu.matmul %78, %80, %cst_61 {dimension_numbers = #tpu.dot_dimension_numbers<[1], [0], [0], [1], [0, 0, 1, 1], [], []>} : vector<64x384xbf16>, vector<384x128xbf16>, vector<64x128xf32> -> vector<64x128xf32>
    %c2_62 = arith.constant 2 : index
    %c0_63 = arith.constant 0 : index
    %82 = vector.load %arg5[%c2_62, %c0_63] : memref<9x128xf32, #tpu.memory_space<vmem>>, vector<1x128xf32>
    %83 = vector.shape_cast %82 : vector<1x128xf32> to vector<128xf32>
    %84 = vector.shape_cast %83 : vector<128xf32> to vector<1x128xf32>
    %85 = vector.broadcast %84 : vector<1x128xf32> to vector<64x128xf32>
    %86 = arith.addf %81, %85 : vector<64x128xf32>
    %cst_64 = arith.constant 0.000000e+00 : f32
    %87 = vector.broadcast %cst_64 : f32 to vector<64x128xf32>
    %88 = arith.maximumf %86, %87 : vector<64x128xf32>
    %c2_65 = arith.constant 2 : index
    %c0_66 = arith.constant 0 : index
    %89 = vector.load %arg6[%c2_65, %c0_66] : memref<9x128xf32, #tpu.memory_space<vmem>>, vector<1x128xf32>
    %90 = vector.shape_cast %89 : vector<1x128xf32> to vector<128xf32>
    %91 = vector.shape_cast %90 : vector<128xf32> to vector<1x128xf32>
    %92 = vector.broadcast %91 : vector<1x128xf32> to vector<64x128xf32>
    %93 = arith.mulf %88, %92 : vector<64x128xf32>
    %c2_67 = arith.constant 2 : index
    %c0_68 = arith.constant 0 : index
    %94 = vector.load %arg7[%c2_67, %c0_68] : memref<9x128xf32, #tpu.memory_space<vmem>>, vector<1x128xf32>
    %95 = vector.shape_cast %94 : vector<1x128xf32> to vector<128xf32>
    %96 = vector.shape_cast %95 : vector<128xf32> to vector<1x128xf32>
    %97 = vector.broadcast %96 : vector<1x128xf32> to vector<64x128xf32>
    %98 = arith.addf %93, %97 : vector<64x128xf32>
    %99 = arith.addf %98, %8 : vector<64x128xf32>
    %100 = arith.truncf %99 : vector<64x128xf32> to vector<64x128xbf16>
    %c0_69 = arith.constant 0 : index
    %c0_70 = arith.constant 0 : index
    %c0_71 = arith.constant 0 : index
    %101 = vector.load %arg8[%c0_69, %c0_70, %c0_71] : memref<3x128x256xbf16, #tpu.memory_space<vmem>>, vector<1x128x256xbf16>
    %102 = vector.shape_cast %101 : vector<1x128x256xbf16> to vector<128x256xbf16>
    %cst_72 = arith.constant dense<0.000000e+00> : vector<64x256xf32>
    %103 = tpu.matmul %100, %102, %cst_72 {dimension_numbers = #tpu.dot_dimension_numbers<[1], [0], [0], [1], [0, 0, 1, 1], [], []>} : vector<64x128xbf16>, vector<128x256xbf16>, vector<64x256xf32> -> vector<64x256xf32>
    %104 = vector.broadcast %14 : vector<1x256xf32> to vector<64x256xf32>
    %105 = arith.addf %104, %103 : vector<64x256xf32>
    %106 = vector.shape_cast %8 : vector<64x128xf32> to vector<2x32x128xf32>
    %c0_73 = arith.constant 0 : index
    %c16_74 = arith.constant 16 : index
    %c0_75 = arith.constant 0 : index
    %107 = vector.load %arg13[%c0_73, %c16_74, %c0_75] : memref<2x64x128xf32, #tpu.memory_space<vmem>>, vector<2x32x128xf32>
    tpu.vector_store %arg13[%c0_73, %c16_74, %c0_75], %106 {strides = array<i32>} : memref<2x64x128xf32, #tpu.memory_space<vmem>>, vector<2x32x128xf32>,
    %c0_76 = arith.constant 0 : index
    %c15_77 = arith.constant 15 : index
    %c0_78 = arith.constant 0 : index
    %108 = vector.load %arg13[%c0_76, %c15_77, %c0_78] : memref<2x64x128xf32, #tpu.memory_space<vmem>>, vector<2x32x128xf32>
    %109 = vector.shape_cast %108 : vector<2x32x128xf32> to vector<64x128xf32>
    %c0_79 = arith.constant 0 : index
    %c17_80 = arith.constant 17 : index
    %c0_81 = arith.constant 0 : index
    %110 = vector.load %arg13[%c0_79, %c17_80, %c0_81] : memref<2x64x128xf32, #tpu.memory_space<vmem>>, vector<2x32x128xf32>
    %111 = vector.shape_cast %110 : vector<2x32x128xf32> to vector<64x128xf32>
    %112 = tpu.concatenate %109, %8, %111 in 1 : vector<64x128xf32>, vector<64x128xf32>, vector<64x128xf32> -> vector<64x384xf32>
    %113 = arith.truncf %112 : vector<64x384xf32> to vector<64x384xbf16>
    %c3 = arith.constant 3 : index
    %c0_82 = arith.constant 0 : index
    %c0_83 = arith.constant 0 : index
    %114 = vector.load %arg4[%c3, %c0_82, %c0_83] : memref<9x384x128xbf16, #tpu.memory_space<vmem>>, vector<1x384x128xbf16>
    %115 = vector.shape_cast %114 : vector<1x384x128xbf16> to vector<384x128xbf16>
    %cst_84 = arith.constant dense<0.000000e+00> : vector<64x128xf32>
    %116 = tpu.matmul %113, %115, %cst_84 {dimension_numbers = #tpu.dot_dimension_numbers<[1], [0], [0], [1], [0, 0, 1, 1], [], []>} : vector<64x384xbf16>, vector<384x128xbf16>, vector<64x128xf32> -> vector<64x128xf32>
    %c3_85 = arith.constant 3 : index
    %c0_86 = arith.constant 0 : index
    %117 = vector.load %arg5[%c3_85, %c0_86] : memref<9x128xf32, #tpu.memory_space<vmem>>, vector<1x128xf32>
    %118 = vector.shape_cast %117 : vector<1x128xf32> to vector<128xf32>
    %119 = vector.shape_cast %118 : vector<128xf32> to vector<1x128xf32>
    %120 = vector.broadcast %119 : vector<1x128xf32> to vector<64x128xf32>
    %121 = arith.addf %116, %120 : vector<64x128xf32>
    %cst_87 = arith.constant 0.000000e+00 : f32
    %122 = vector.broadcast %cst_87 : f32 to vector<64x128xf32>
    %123 = arith.maximumf %121, %122 : vector<64x128xf32>
    %c3_88 = arith.constant 3 : index
    %c0_89 = arith.constant 0 : index
    %124 = vector.load %arg6[%c3_88, %c0_89] : memref<9x128xf32, #tpu.memory_space<vmem>>, vector<1x128xf32>
    %125 = vector.shape_cast %124 : vector<1x128xf32> to vector<128xf32>
    %126 = vector.shape_cast %125 : vector<128xf32> to vector<1x128xf32>
    %127 = vector.broadcast %126 : vector<1x128xf32> to vector<64x128xf32>
    %128 = arith.mulf %123, %127 : vector<64x128xf32>
    %c3_90 = arith.constant 3 : index
    %c0_91 = arith.constant 0 : index
    %129 = vector.load %arg7[%c3_90, %c0_91] : memref<9x128xf32, #tpu.memory_space<vmem>>, vector<1x128xf32>
    %130 = vector.shape_cast %129 : vector<1x128xf32> to vector<128xf32>
    %131 = vector.shape_cast %130 : vector<128xf32> to vector<1x128xf32>
    %132 = vector.broadcast %131 : vector<1x128xf32> to vector<64x128xf32>
    %133 = arith.addf %128, %132 : vector<64x128xf32>
    %134 = vector.shape_cast %133 : vector<64x128xf32> to vector<2x32x128xf32>
    %c0_92 = arith.constant 0 : index
    %c16_93 = arith.constant 16 : index
    %c0_94 = arith.constant 0 : index
    %135 = vector.load %arg13[%c0_92, %c16_93, %c0_94] : memref<2x64x128xf32, #tpu.memory_space<vmem>>, vector<2x32x128xf32>
    tpu.vector_store %arg13[%c0_92, %c16_93, %c0_94], %134 {strides = array<i32>} : memref<2x64x128xf32, #tpu.memory_space<vmem>>, vector<2x32x128xf32>,
    %c0_95 = arith.constant 0 : index
    %c14 = arith.constant 14 : index
    %c0_96 = arith.constant 0 : index
    %136 = vector.load %arg13[%c0_95, %c14, %c0_96] : memref<2x64x128xf32, #tpu.memory_space<vmem>>, vector<2x32x128xf32>
    %137 = vector.shape_cast %136 : vector<2x32x128xf32> to vector<64x128xf32>
    %c0_97 = arith.constant 0 : index
    %c18 = arith.constant 18 : index
    %c0_98 = arith.constant 0 : index
    %138 = vector.load %arg13[%c0_97, %c18, %c0_98] : memref<2x64x128xf32, #tpu.memory_space<vmem>>, vector<2x32x128xf32>
    %139 = vector.shape_cast %138 : vector<2x32x128xf32> to vector<64x128xf32>
    %140 = tpu.concatenate %137, %133, %139 in 1 : vector<64x128xf32>, vector<64x128xf32>, vector<64x128xf32> -> vector<64x384xf32>
    %141 = arith.truncf %140 : vector<64x384xf32> to vector<64x384xbf16>
    %c4 = arith.constant 4 : index
    %c0_99 = arith.constant 0 : index
    %c0_100 = arith.constant 0 : index
    %142 = vector.load %arg4[%c4, %c0_99, %c0_100] : memref<9x384x128xbf16, #tpu.memory_space<vmem>>, vector<1x384x128xbf16>
    %143 = vector.shape_cast %142 : vector<1x384x128xbf16> to vector<384x128xbf16>
    %cst_101 = arith.constant dense<0.000000e+00> : vector<64x128xf32>
    %144 = tpu.matmul %141, %143, %cst_101 {dimension_numbers = #tpu.dot_dimension_numbers<[1], [0], [0], [1], [0, 0, 1, 1], [], []>} : vector<64x384xbf16>, vector<384x128xbf16>, vector<64x128xf32> -> vector<64x128xf32>
    %c4_102 = arith.constant 4 : index
    %c0_103 = arith.constant 0 : index
    %145 = vector.load %arg5[%c4_102, %c0_103] : memref<9x128xf32, #tpu.memory_space<vmem>>, vector<1x128xf32>
    %146 = vector.shape_cast %145 : vector<1x128xf32> to vector<128xf32>
    %147 = vector.shape_cast %146 : vector<128xf32> to vector<1x128xf32>
    %148 = vector.broadcast %147 : vector<1x128xf32> to vector<64x128xf32>
    %149 = arith.addf %144, %148 : vector<64x128xf32>
    %cst_104 = arith.constant 0.000000e+00 : f32
    %150 = vector.broadcast %cst_104 : f32 to vector<64x128xf32>
    %151 = arith.maximumf %149, %150 : vector<64x128xf32>
    %c4_105 = arith.constant 4 : index
    %c0_106 = arith.constant 0 : index
    %152 = vector.load %arg6[%c4_105, %c0_106] : memref<9x128xf32, #tpu.memory_space<vmem>>, vector<1x128xf32>
    %153 = vector.shape_cast %152 : vector<1x128xf32> to vector<128xf32>
    %154 = vector.shape_cast %153 : vector<128xf32> to vector<1x128xf32>
    %155 = vector.broadcast %154 : vector<1x128xf32> to vector<64x128xf32>
    %156 = arith.mulf %151, %155 : vector<64x128xf32>
    %c4_107 = arith.constant 4 : index
    %c0_108 = arith.constant 0 : index
    %157 = vector.load %arg7[%c4_107, %c0_108] : memref<9x128xf32, #tpu.memory_space<vmem>>, vector<1x128xf32>
    %158 = vector.shape_cast %157 : vector<1x128xf32> to vector<128xf32>
    %159 = vector.shape_cast %158 : vector<128xf32> to vector<1x128xf32>
    %160 = vector.broadcast %159 : vector<1x128xf32> to vector<64x128xf32>
    %161 = arith.addf %156, %160 : vector<64x128xf32>
    %162 = vector.shape_cast %161 : vector<64x128xf32> to vector<2x32x128xf32>
    %c0_109 = arith.constant 0 : index
    %c16_110 = arith.constant 16 : index
    %c0_111 = arith.constant 0 : index
    %163 = vector.load %arg13[%c0_109, %c16_110, %c0_111] : memref<2x64x128xf32, #tpu.memory_space<vmem>>, vector<2x32x128xf32>
    tpu.vector_store %arg13[%c0_109, %c16_110, %c0_111], %162 {strides = array<i32>} : memref<2x64x128xf32, #tpu.memory_space<vmem>>, vector<2x32x128xf32>,
    %c0_112 = arith.constant 0 : index
    %c12 = arith.constant 12 : index
    %c0_113 = arith.constant 0 : index
    %164 = vector.load %arg13[%c0_112, %c12, %c0_113] : memref<2x64x128xf32, #tpu.memory_space<vmem>>, vector<2x32x128xf32>
    %165 = vector.shape_cast %164 : vector<2x32x128xf32> to vector<64x128xf32>
    %c0_114 = arith.constant 0 : index
    %c20 = arith.constant 20 : index
    %c0_115 = arith.constant 0 : index
    %166 = vector.load %arg13[%c0_114, %c20, %c0_115] : memref<2x64x128xf32, #tpu.memory_space<vmem>>, vector<2x32x128xf32>
    %167 = vector.shape_cast %166 : vector<2x32x128xf32> to vector<64x128xf32>
    %168 = tpu.concatenate %165, %161, %167 in 1 : vector<64x128xf32>, vector<64x128xf32>, vector<64x128xf32> -> vector<64x384xf32>
    %169 = arith.truncf %168 : vector<64x384xf32> to vector<64x384xbf16>
    %c5 = arith.constant 5 : index
    %c0_116 = arith.constant 0 : index
    %c0_117 = arith.constant 0 : index
    %170 = vector.load %arg4[%c5, %c0_116, %c0_117] : memref<9x384x128xbf16, #tpu.memory_space<vmem>>, vector<1x384x128xbf16>
    %171 = vector.shape_cast %170 : vector<1x384x128xbf16> to vector<384x128xbf16>
    %cst_118 = arith.constant dense<0.000000e+00> : vector<64x128xf32>
    %172 = tpu.matmul %169, %171, %cst_118 {dimension_numbers = #tpu.dot_dimension_numbers<[1], [0], [0], [1], [0, 0, 1, 1], [], []>} : vector<64x384xbf16>, vector<384x128xbf16>, vector<64x128xf32> -> vector<64x128xf32>
    %c5_119 = arith.constant 5 : index
    %c0_120 = arith.constant 0 : index
    %173 = vector.load %arg5[%c5_119, %c0_120] : memref<9x128xf32, #tpu.memory_space<vmem>>, vector<1x128xf32>
    %174 = vector.shape_cast %173 : vector<1x128xf32> to vector<128xf32>
    %175 = vector.shape_cast %174 : vector<128xf32> to vector<1x128xf32>
    %176 = vector.broadcast %175 : vector<1x128xf32> to vector<64x128xf32>
    %177 = arith.addf %172, %176 : vector<64x128xf32>
    %cst_121 = arith.constant 0.000000e+00 : f32
    %178 = vector.broadcast %cst_121 : f32 to vector<64x128xf32>
    %179 = arith.maximumf %177, %178 : vector<64x128xf32>
    %c5_122 = arith.constant 5 : index
    %c0_123 = arith.constant 0 : index
    %180 = vector.load %arg6[%c5_122, %c0_123] : memref<9x128xf32, #tpu.memory_space<vmem>>, vector<1x128xf32>
    %181 = vector.shape_cast %180 : vector<1x128xf32> to vector<128xf32>
    %182 = vector.shape_cast %181 : vector<128xf32> to vector<1x128xf32>
    %183 = vector.broadcast %182 : vector<1x128xf32> to vector<64x128xf32>
    %184 = arith.mulf %179, %183 : vector<64x128xf32>
    %c5_124 = arith.constant 5 : index
    %c0_125 = arith.constant 0 : index
    %185 = vector.load %arg7[%c5_124, %c0_125] : memref<9x128xf32, #tpu.memory_space<vmem>>, vector<1x128xf32>
    %186 = vector.shape_cast %185 : vector<1x128xf32> to vector<128xf32>
    %187 = vector.shape_cast %186 : vector<128xf32> to vector<1x128xf32>
    %188 = vector.broadcast %187 : vector<1x128xf32> to vector<64x128xf32>
    %189 = arith.addf %184, %188 : vector<64x128xf32>
    %190 = arith.addf %189, %8 : vector<64x128xf32>
    %191 = arith.truncf %190 : vector<64x128xf32> to vector<64x128xbf16>
    %c1_126 = arith.constant 1 : index
    %c0_127 = arith.constant 0 : index
    %c0_128 = arith.constant 0 : index
    %192 = vector.load %arg8[%c1_126, %c0_127, %c0_128] : memref<3x128x256xbf16, #tpu.memory_space<vmem>>, vector<1x128x256xbf16>
    %193 = vector.shape_cast %192 : vector<1x128x256xbf16> to vector<128x256xbf16>
    %cst_129 = arith.constant dense<0.000000e+00> : vector<64x256xf32>
    %194 = tpu.matmul %191, %193, %cst_129 {dimension_numbers = #tpu.dot_dimension_numbers<[1], [0], [0], [1], [0, 0, 1, 1], [], []>} : vector<64x128xbf16>, vector<128x256xbf16>, vector<64x256xf32> -> vector<64x256xf32>
    %195 = arith.addf %105, %194 : vector<64x256xf32>
    %196 = vector.shape_cast %8 : vector<64x128xf32> to vector<2x32x128xf32>
    %c0_130 = arith.constant 0 : index
    %c16_131 = arith.constant 16 : index
    %c0_132 = arith.constant 0 : index
    %197 = vector.load %arg13[%c0_130, %c16_131, %c0_132] : memref<2x64x128xf32, #tpu.memory_space<vmem>>, vector<2x32x128xf32>
    tpu.vector_store %arg13[%c0_130, %c16_131, %c0_132], %196 {strides = array<i32>} : memref<2x64x128xf32, #tpu.memory_space<vmem>>, vector<2x32x128xf32>,
    %c0_133 = arith.constant 0 : index
    %c15_134 = arith.constant 15 : index
    %c0_135 = arith.constant 0 : index
    %198 = vector.load %arg13[%c0_133, %c15_134, %c0_135] : memref<2x64x128xf32, #tpu.memory_space<vmem>>, vector<2x32x128xf32>
    %199 = vector.shape_cast %198 : vector<2x32x128xf32> to vector<64x128xf32>
    %c0_136 = arith.constant 0 : index
    %c17_137 = arith.constant 17 : index
    %c0_138 = arith.constant 0 : index
    %200 = vector.load %arg13[%c0_136, %c17_137, %c0_138] : memref<2x64x128xf32, #tpu.memory_space<vmem>>, vector<2x32x128xf32>
    %201 = vector.shape_cast %200 : vector<2x32x128xf32> to vector<64x128xf32>
    %202 = tpu.concatenate %199, %8, %201 in 1 : vector<64x128xf32>, vector<64x128xf32>, vector<64x128xf32> -> vector<64x384xf32>
    %203 = arith.truncf %202 : vector<64x384xf32> to vector<64x384xbf16>
    %c6 = arith.constant 6 : index
    %c0_139 = arith.constant 0 : index
    %c0_140 = arith.constant 0 : index
    %204 = vector.load %arg4[%c6, %c0_139, %c0_140] : memref<9x384x128xbf16, #tpu.memory_space<vmem>>, vector<1x384x128xbf16>
    %205 = vector.shape_cast %204 : vector<1x384x128xbf16> to vector<384x128xbf16>
    %cst_141 = arith.constant dense<0.000000e+00> : vector<64x128xf32>
    %206 = tpu.matmul %203, %205, %cst_141 {dimension_numbers = #tpu.dot_dimension_numbers<[1], [0], [0], [1], [0, 0, 1, 1], [], []>} : vector<64x384xbf16>, vector<384x128xbf16>, vector<64x128xf32> -> vector<64x128xf32>
    %c6_142 = arith.constant 6 : index
    %c0_143 = arith.constant 0 : index
    %207 = vector.load %arg5[%c6_142, %c0_143] : memref<9x128xf32, #tpu.memory_space<vmem>>, vector<1x128xf32>
    %208 = vector.shape_cast %207 : vector<1x128xf32> to vector<128xf32>
    %209 = vector.shape_cast %208 : vector<128xf32> to vector<1x128xf32>
    %210 = vector.broadcast %209 : vector<1x128xf32> to vector<64x128xf32>
    %211 = arith.addf %206, %210 : vector<64x128xf32>
    %cst_144 = arith.constant 0.000000e+00 : f32
    %212 = vector.broadcast %cst_144 : f32 to vector<64x128xf32>
    %213 = arith.maximumf %211, %212 : vector<64x128xf32>
    %c6_145 = arith.constant 6 : index
    %c0_146 = arith.constant 0 : index
    %214 = vector.load %arg6[%c6_145, %c0_146] : memref<9x128xf32, #tpu.memory_space<vmem>>, vector<1x128xf32>
    %215 = vector.shape_cast %214 : vector<1x128xf32> to vector<128xf32>
    %216 = vector.shape_cast %215 : vector<128xf32> to vector<1x128xf32>
    %217 = vector.broadcast %216 : vector<1x128xf32> to vector<64x128xf32>
    %218 = arith.mulf %213, %217 : vector<64x128xf32>
    %c6_147 = arith.constant 6 : index
    %c0_148 = arith.constant 0 : index
    %219 = vector.load %arg7[%c6_147, %c0_148] : memref<9x128xf32, #tpu.memory_space<vmem>>, vector<1x128xf32>
    %220 = vector.shape_cast %219 : vector<1x128xf32> to vector<128xf32>
    %221 = vector.shape_cast %220 : vector<128xf32> to vector<1x128xf32>
    %222 = vector.broadcast %221 : vector<1x128xf32> to vector<64x128xf32>
    %223 = arith.addf %218, %222 : vector<64x128xf32>
    %224 = vector.shape_cast %223 : vector<64x128xf32> to vector<2x32x128xf32>
    %c0_149 = arith.constant 0 : index
    %c16_150 = arith.constant 16 : index
    %c0_151 = arith.constant 0 : index
    %225 = vector.load %arg13[%c0_149, %c16_150, %c0_151] : memref<2x64x128xf32, #tpu.memory_space<vmem>>, vector<2x32x128xf32>
    tpu.vector_store %arg13[%c0_149, %c16_150, %c0_151], %224 {strides = array<i32>} : memref<2x64x128xf32, #tpu.memory_space<vmem>>, vector<2x32x128xf32>,
    %c0_152 = arith.constant 0 : index
    %c12_153 = arith.constant 12 : index
    %c0_154 = arith.constant 0 : index
    %226 = vector.load %arg13[%c0_152, %c12_153, %c0_154] : memref<2x64x128xf32, #tpu.memory_space<vmem>>, vector<2x32x128xf32>
    %227 = vector.shape_cast %226 : vector<2x32x128xf32> to vector<64x128xf32>
    %c0_155 = arith.constant 0 : index
    %c20_156 = arith.constant 20 : index
    %c0_157 = arith.constant 0 : index
    %228 = vector.load %arg13[%c0_155, %c20_156, %c0_157] : memref<2x64x128xf32, #tpu.memory_space<vmem>>, vector<2x32x128xf32>
    %229 = vector.shape_cast %228 : vector<2x32x128xf32> to vector<64x128xf32>
    %230 = tpu.concatenate %227, %223, %229 in 1 : vector<64x128xf32>, vector<64x128xf32>, vector<64x128xf32> -> vector<64x384xf32>
    %231 = arith.truncf %230 : vector<64x384xf32> to vector<64x384xbf16>
    %c7 = arith.constant 7 : index
    %c0_158 = arith.constant 0 : index
    %c0_159 = arith.constant 0 : index
    %232 = vector.load %arg4[%c7, %c0_158, %c0_159] : memref<9x384x128xbf16, #tpu.memory_space<vmem>>, vector<1x384x128xbf16>
    %233 = vector.shape_cast %232 : vector<1x384x128xbf16> to vector<384x128xbf16>
    %cst_160 = arith.constant dense<0.000000e+00> : vector<64x128xf32>
    %234 = tpu.matmul %231, %233, %cst_160 {dimension_numbers = #tpu.dot_dimension_numbers<[1], [0], [0], [1], [0, 0, 1, 1], [], []>} : vector<64x384xbf16>, vector<384x128xbf16>, vector<64x128xf32> -> vector<64x128xf32>
    %c7_161 = arith.constant 7 : index
    %c0_162 = arith.constant 0 : index
    %235 = vector.load %arg5[%c7_161, %c0_162] : memref<9x128xf32, #tpu.memory_space<vmem>>, vector<1x128xf32>
    %236 = vector.shape_cast %235 : vector<1x128xf32> to vector<128xf32>
    %237 = vector.shape_cast %236 : vector<128xf32> to vector<1x128xf32>
    %238 = vector.broadcast %237 : vector<1x128xf32> to vector<64x128xf32>
    %239 = arith.addf %234, %238 : vector<64x128xf32>
    %cst_163 = arith.constant 0.000000e+00 : f32
    %240 = vector.broadcast %cst_163 : f32 to vector<64x128xf32>
    %241 = arith.maximumf %239, %240 : vector<64x128xf32>
    %c7_164 = arith.constant 7 : index
    %c0_165 = arith.constant 0 : index
    %242 = vector.load %arg6[%c7_164, %c0_165] : memref<9x128xf32, #tpu.memory_space<vmem>>, vector<1x128xf32>
    %243 = vector.shape_cast %242 : vector<1x128xf32> to vector<128xf32>
    %244 = vector.shape_cast %243 : vector<128xf32> to vector<1x128xf32>
    %245 = vector.broadcast %244 : vector<1x128xf32> to vector<64x128xf32>
    %246 = arith.mulf %241, %245 : vector<64x128xf32>
    %c7_166 = arith.constant 7 : index
    %c0_167 = arith.constant 0 : index
    %247 = vector.load %arg7[%c7_166, %c0_167] : memref<9x128xf32, #tpu.memory_space<vmem>>, vector<1x128xf32>
    %248 = vector.shape_cast %247 : vector<1x128xf32> to vector<128xf32>
    %249 = vector.shape_cast %248 : vector<128xf32> to vector<1x128xf32>
    %250 = vector.broadcast %249 : vector<1x128xf32> to vector<64x128xf32>
    %251 = arith.addf %246, %250 : vector<64x128xf32>
    %252 = vector.shape_cast %251 : vector<64x128xf32> to vector<2x32x128xf32>
    %c0_168 = arith.constant 0 : index
    %c16_169 = arith.constant 16 : index
    %c0_170 = arith.constant 0 : index
    %253 = vector.load %arg13[%c0_168, %c16_169, %c0_170] : memref<2x64x128xf32, #tpu.memory_space<vmem>>, vector<2x32x128xf32>
    tpu.vector_store %arg13[%c0_168, %c16_169, %c0_170], %252 {strides = array<i32>} : memref<2x64x128xf32, #tpu.memory_space<vmem>>, vector<2x32x128xf32>,
    %c0_171 = arith.constant 0 : index
    %c0_172 = arith.constant 0 : index
    %c0_173 = arith.constant 0 : index
    %254 = vector.load %arg13[%c0_171, %c0_172, %c0_173] : memref<2x64x128xf32, #tpu.memory_space<vmem>>, vector<2x32x128xf32>
    %255 = vector.shape_cast %254 : vector<2x32x128xf32> to vector<64x128xf32>
    %c0_174 = arith.constant 0 : index
    %c32 = arith.constant 32 : index
    %c0_175 = arith.constant 0 : index
    %256 = vector.load %arg13[%c0_174, %c32, %c0_175] : memref<2x64x128xf32, #tpu.memory_space<vmem>>, vector<2x32x128xf32>
    %257 = vector.shape_cast %256 : vector<2x32x128xf32> to vector<64x128xf32>
    %258 = tpu.concatenate %255, %251, %257 in 1 : vector<64x128xf32>, vector<64x128xf32>, vector<64x128xf32> -> vector<64x384xf32>
    %259 = arith.truncf %258 : vector<64x384xf32> to vector<64x384xbf16>
    %c8 = arith.constant 8 : index
    %c0_176 = arith.constant 0 : index
    %c0_177 = arith.constant 0 : index
    %260 = vector.load %arg4[%c8, %c0_176, %c0_177] : memref<9x384x128xbf16, #tpu.memory_space<vmem>>, vector<1x384x128xbf16>
    %261 = vector.shape_cast %260 : vector<1x384x128xbf16> to vector<384x128xbf16>
    %cst_178 = arith.constant dense<0.000000e+00> : vector<64x128xf32>
    %262 = tpu.matmul %259, %261, %cst_178 {dimension_numbers = #tpu.dot_dimension_numbers<[1], [0], [0], [1], [0, 0, 1, 1], [], []>} : vector<64x384xbf16>, vector<384x128xbf16>, vector<64x128xf32> -> vector<64x128xf32>
    %c8_179 = arith.constant 8 : index
    %c0_180 = arith.constant 0 : index
    %263 = vector.load %arg5[%c8_179, %c0_180] : memref<9x128xf32, #tpu.memory_space<vmem>>, vector<1x128xf32>
    %264 = vector.shape_cast %263 : vector<1x128xf32> to vector<128xf32>
    %265 = vector.shape_cast %264 : vector<128xf32> to vector<1x128xf32>
    %266 = vector.broadcast %265 : vector<1x128xf32> to vector<64x128xf32>
    %267 = arith.addf %262, %266 : vector<64x128xf32>
    %cst_181 = arith.constant 0.000000e+00 : f32
    %268 = vector.broadcast %cst_181 : f32 to vector<64x128xf32>
    %269 = arith.maximumf %267, %268 : vector<64x128xf32>
    %c8_182 = arith.constant 8 : index
    %c0_183 = arith.constant 0 : index
    %270 = vector.load %arg6[%c8_182, %c0_183] : memref<9x128xf32, #tpu.memory_space<vmem>>, vector<1x128xf32>
    %271 = vector.shape_cast %270 : vector<1x128xf32> to vector<128xf32>
    %272 = vector.shape_cast %271 : vector<128xf32> to vector<1x128xf32>
    %273 = vector.broadcast %272 : vector<1x128xf32> to vector<64x128xf32>
    %274 = arith.mulf %269, %273 : vector<64x128xf32>
    %c8_184 = arith.constant 8 : index
    %c0_185 = arith.constant 0 : index
    %275 = vector.load %arg7[%c8_184, %c0_185] : memref<9x128xf32, #tpu.memory_space<vmem>>, vector<1x128xf32>
    %276 = vector.shape_cast %275 : vector<1x128xf32> to vector<128xf32>
    %277 = vector.shape_cast %276 : vector<128xf32> to vector<1x128xf32>
    %278 = vector.broadcast %277 : vector<1x128xf32> to vector<64x128xf32>
    %279 = arith.addf %274, %278 : vector<64x128xf32>
    %280 = arith.addf %279, %8 : vector<64x128xf32>
    %281 = arith.truncf %280 : vector<64x128xf32> to vector<64x128xbf16>
    %c2_186 = arith.constant 2 : index
    %c0_187 = arith.constant 0 : index
    %c0_188 = arith.constant 0 : index
    %282 = vector.load %arg8[%c2_186, %c0_187, %c0_188] : memref<3x128x256xbf16, #tpu.memory_space<vmem>>, vector<1x128x256xbf16>
    %283 = vector.shape_cast %282 : vector<1x128x256xbf16> to vector<128x256xbf16>
    %cst_189 = arith.constant dense<0.000000e+00> : vector<64x256xf32>
    %284 = tpu.matmul %281, %283, %cst_189 {dimension_numbers = #tpu.dot_dimension_numbers<[1], [0], [0], [1], [0, 0, 1, 1], [], []>} : vector<64x128xbf16>, vector<128x256xbf16>, vector<64x256xf32> -> vector<64x256xf32>
    %285 = arith.addf %195, %284 : vector<64x256xf32>
    %286 = arith.truncf %285 : vector<64x256xf32> to vector<64x256xbf16>
    %c0_190 = arith.constant 0 : index
    %c0_191 = arith.constant 0 : index
    %287 = vector.load %arg10[%c0_190, %c0_191] : memref<256x128xbf16, #tpu.memory_space<vmem>>, vector<256x128xbf16>
    %cst_192 = arith.constant dense<0.000000e+00> : vector<64x128xf32>
    %288 = tpu.matmul %286, %287, %cst_192 {dimension_numbers = #tpu.dot_dimension_numbers<[1], [0], [0], [1], [0, 0, 1, 1], [], []>} : vector<64x256xbf16>, vector<256x128xbf16>, vector<64x128xf32> -> vector<64x128xf32>
    %c0_193 = arith.constant 0 : index
    %c0_194 = arith.constant 0 : index
    %289 = vector.load %arg11[%c0_193, %c0_194] : memref<1x128xf32, #tpu.memory_space<vmem>>, vector<1x128xf32>
    %290 = vector.shape_cast %289 : vector<1x128xf32> to vector<128xf32>
    %291 = vector.shape_cast %290 : vector<128xf32> to vector<1x128xf32>
    %292 = vector.broadcast %291 : vector<1x128xf32> to vector<64x128xf32>
    %293 = arith.addf %288, %292 : vector<64x128xf32>
    %294 = vector.shape_cast %293 : vector<64x128xf32> to vector<2x32x128xf32>
    %c0_195 = arith.constant 0 : index
    %c0_196 = arith.constant 0 : index
    %c0_197 = arith.constant 0 : index
    %295 = vector.load %arg12[%c0_195, %c0_196, %c0_197] : memref<2x32x128xf32, #tpu.memory_space<vmem>>, vector<2x32x128xf32>
    tpu.vector_store %arg12[%c0_195, %c0_196, %c0_197], %294 {strides = array<i32>} : memref<2x32x128xf32, #tpu.memory_space<vmem>>, vector<2x32x128xf32>,
    return
  }
  func.func @transform_0(%arg0: i32) -> (i32, i32, i32) {
    %c0_i32 = arith.constant 0 : i32
    %c0_i32_0 = arith.constant 0 : i32
    %c0_i32_1 = arith.constant 0 : i32
    return %arg0, %c0_i32, %c0_i32_0 : i32, i32, i32
  }
  func.func @transform_1(%arg0: i32) -> (i32, i32) {
    %c0_i32 = arith.constant 0 : i32
    %c0_i32_0 = arith.constant 0 : i32
    %c0_i32_1 = arith.constant 0 : i32
    return %c0_i32, %c0_i32_0 : i32, i32
  }
  func.func @transform_2(%arg0: i32) -> (i32, i32) {
    %c0_i32 = arith.constant 0 : i32
    %c0_i32_0 = arith.constant 0 : i32
    %c0_i32_1 = arith.constant 0 : i32
    return %c0_i32, %c0_i32_0 : i32, i32
  }
  func.func @transform_3(%arg0: i32) -> (i32, i32, i32) {
    %c0_i32 = arith.constant 0 : i32
    %c0_i32_0 = arith.constant 0 : i32
    %c0_i32_1 = arith.constant 0 : i32
    %c0_i32_2 = arith.constant 0 : i32
    return %c0_i32, %c0_i32_0, %c0_i32_1 : i32, i32, i32
  }
  func.func @transform_4(%arg0: i32) -> (i32, i32) {
    %c0_i32 = arith.constant 0 : i32
    %c0_i32_0 = arith.constant 0 : i32
    %c0_i32_1 = arith.constant 0 : i32
    return %c0_i32, %c0_i32_0 : i32, i32
  }
  func.func @transform_5(%arg0: i32) -> (i32, i32) {
    %c0_i32 = arith.constant 0 : i32
    %c0_i32_0 = arith.constant 0 : i32
    %c0_i32_1 = arith.constant 0 : i32
    return %c0_i32, %c0_i32_0 : i32, i32
  }
  func.func @transform_6(%arg0: i32) -> (i32, i32) {
    %c0_i32 = arith.constant 0 : i32
    %c0_i32_0 = arith.constant 0 : i32
    %c0_i32_1 = arith.constant 0 : i32
    return %c0_i32, %c0_i32_0 : i32, i32
  }
  func.func @transform_7(%arg0: i32) -> (i32, i32, i32) {
    %c0_i32 = arith.constant 0 : i32
    %c0_i32_0 = arith.constant 0 : i32
    %c0_i32_1 = arith.constant 0 : i32
    %c0_i32_2 = arith.constant 0 : i32
    return %c0_i32, %c0_i32_0, %c0_i32_1 : i32, i32, i32
  }
  func.func @transform_8(%arg0: i32) -> (i32, i32) {
    %c0_i32 = arith.constant 0 : i32
    %c0_i32_0 = arith.constant 0 : i32
    %c0_i32_1 = arith.constant 0 : i32
    return %c0_i32, %c0_i32_0 : i32, i32
  }
  func.func @transform_9(%arg0: i32) -> (i32, i32) {
    %c0_i32 = arith.constant 0 : i32
    %c0_i32_0 = arith.constant 0 : i32
    %c0_i32_1 = arith.constant 0 : i32
    return %c0_i32, %c0_i32_0 : i32, i32
  }
  func.func @transform_10(%arg0: i32) -> (i32, i32) {
    %c0_i32 = arith.constant 0 : i32
    %c0_i32_0 = arith.constant 0 : i32
    %c0_i32_1 = arith.constant 0 : i32
    return %c0_i32, %c0_i32_0 : i32, i32
  }
  func.func @transform_11(%arg0: i32) -> (i32, i32, i32) {
    %c0_i32 = arith.constant 0 : i32
    %c0_i32_0 = arith.constant 0 : i32
    %c0_i32_1 = arith.constant 0 : i32
    return %arg0, %c0_i32, %c0_i32_0 : i32, i32, i32
  }
}

</mosaic_0001>

<bundles_post_ra>
// kernel: tpu_custom_call.1
= control target key start
LH: loop header
LB: loop body
LE: loop exit
PB: predicated region body
PF: predicated region fallthrough
CT: control target
= control target key end

     0   :  { %s7438_s0 = inlined_call_operand.hbm [shape: bf16[4,32,128], index: 0, kind: input, shape index: {}]   ;;  %s7439_s1 = inlined_call_operand.hbm [shape: bf16[128,128], index: 1, kind: input, shape index: {}]   ;;  %s7440_s2 = inlined_call_operand.vmem [shape: f32[1,128], index: 2, kind: input, shape index: {}]   ;;  %s7441_s3 = inlined_call_operand.hbm [shape: bf16[9,384,128], index: 3, kind: input, shape index: {}]   ;;  %s7442_s4 = inlined_call_operand.hbm [shape: f32[9,128], index: 4, kind: input, shape index: {}]   ;;  %s7443_s5 = inlined_call_operand.hbm [shape: f32[9,128], index: 5, kind: input, shape index: {}]   ;;  %s7444_s6 = inlined_call_operand.hbm [shape: f32[9,128], index: 6, kind: input, shape index: {}]   ;;  %s7445_s7 = inlined_call_operand.hbm [shape: bf16[3,128,256], index: 7, kind: input, shape index: {}]   ;;  %s7446_s8 = inlined_call_operand.vmem [shape: f32[1,256], index: 8, kind: input, shape index: {}]   ;;  %s7447_s9 = inlined_call_operand.hbm [shape: bf16[256,128], index: 9, kind: input, shape index: {}]   ;;  %s7448_s10 = inlined_call_operand.vmem [shape: f32[1,128], index: 10, kind: input, shape index: {}]   ;;  %s7449_s11 = inlined_call_operand.hbm [shape: f32[4,32,128], index: 11, kind: output, shape index: {}]  }
   0x1   :  { %7453 = sst [smem:[#allocation24_spill]] %s7439_s1 }
   0x2   :  { %7454 = sst [smem:[#allocation25_spill]] %s7441_s3 }
   0x3   :  { %7455 = sst [smem:[#allocation26_spill]] %s7442_s4 }
   0x4   :  { %7456 = sst [smem:[#allocation27_spill]] %s7443_s5 }
   0x5   :  { %7457 = sst [smem:[#allocation28_spill]] %s7444_s6 }
   0x6   :  { %7458 = sst [smem:[#allocation29_spill]] %s7445_s7 }
   0x7   :  { %16 = vsyncpa [#allocation4], 0 }
   0x8   :  { %18 = vsyncpa [#allocation4 + $0x1], 0 }
   0x9   :  { %19 = vsyncpa [#allocation7], 0 }
   0xa   :  { %20 = vsyncpa [#allocation10], 0 }
   0xb   :  { %21 = vsyncpa [#allocation13], 0 }
   0xc   :  { %22 = vsyncpa [#allocation16], 0 }
   0xd   :  { %23 = vsyncpa [#allocation5], 0 }
   0xe   :  { %25 = vsyncpa [#allocation5 + $0x1], 0  ;;  %s6719_s17 = smov 0   ;;  %s6721_s18 = smov 0  }
   0xf   :  { %s6723_s19 = smov 0   ;;  %s6725_s20 = smov 0  }
  0x10 LB: > { %s7459_s1 = sld [smem:[#allocation24_spill]]  ;;  %s6743_s24 = sadd.s32 4294967295, %s6643_s20   ;;  %s6643_s20 = sphi %s6725_s20, %s7477_s20   ;;  %s6639_s19 = sphi %s6723_s19, %s7476_s19   ;;  %s6635_s18 = sphi %s6721_s18, %s7475_s18   ;;  %s6631_s17 = sphi %s6719_s17, %s7474_s17  }
  0x11   : > { %p4674_p0 = scmp.ge.s32.totalorder %s6643_s20, 1  ;;  %p52_p1 = scmp.eq.s32.totalorder %s6743_s24, 0 }
  0x12   : > { %p298_p2 = scmp.lt.s32.totalorder %s6643_s20, 3  ;;  %s6645_s26 = smov [#allocation6]  }
  0x13   : > { %s311_s27 = sshll.u32 %s6645_s26, 4  ;;  %s7461_s4 = sld [smem:[#allocation26_spill]]  ;;  %s312_s27 = int_to_ptr.vmem [resolvable:$true] %s311_s27 }
  0x14   : > { %p6748_p3 = pnand %p4674_p0, %p298_p2  ;;  %s6646_s13 = smov [#allocation9]  }
  0x15   : > { %s342_s14 = sshll.u32 %s6646_s13, 4  ;;  %s7450_s15 = smov 64   ;;  %s343_s14 = int_to_ptr.vmem [resolvable:$true] %s342_s14 }
  0x16   : > { %s309_s23 = sshll.u32 %s7459_s1, 4  ;;  %p6199_p4 = pneg %p6748_p3  ;;  %s310_s23 = int_to_ptr.hbm [resolvable:$true] %s309_s23 }
  0x17   : > { %s7452_s16 = smov 4   ;;  %s6649_s21 = smov 128  }
  0x18   : > { %p6760_p6 = pnand %p6199_p4, %p52_p1  ;;  %s6650_s22 = smov 8  }
  0x19   : > { %s340_s30 = sshll.u32 %s7461_s4, 4  ;;  %s7463_s6 = sld [smem:[#allocation28_spill]]  ;;  %s341_s30 = int_to_ptr.hbm [resolvable:$true] %s340_s30 }
  0x1a   : > { %6202 = dma.hbm_to_vmem [thread:$0]  (!%p6760_p6), %s310_s23, 1024, %s312_s27, [#allocation7], %s7450_s15, %s7450_s15, %s7452_s16  }
  0x1b   : > { %6208 = dma.hbm_to_vmem [thread:$0]  (!%p6760_p6), %s341_s30, 256, %s343_s14, [#allocation10], %s6649_s21, %s6649_s21, %s6650_s22  }
  0x1c   : > { %s6651_s13 = smov [#allocation12]   ;;  %s7464_s3 = sld [smem:[#allocation25_spill]] }
  0x1d   : > { %s370_s1 = sshll.u32 %s6651_s13, 4  ;;  %s6652_s30 = smov [#allocation8]   ;;  %s371_s1 = int_to_ptr.vmem [resolvable:$true] %s370_s1 }
  0x1e   : > { %s328_s14 = sshll.u32 %s6652_s30, 4  ;;  %s7465_s5 = sld [smem:[#allocation27_spill]]  ;;  %s329_s14 = int_to_ptr.vmem [resolvable:$true] %s328_s14 }
  0x1f   : > { %s368_s29 = sshll.u32 %s7463_s6, 4  ;;  %s7466_s13 = smov 64   ;;  %s369_s29 = int_to_ptr.hbm [resolvable:$true] %s368_s29 }
  0x20   : > { %6214 = dma.hbm_to_vmem [thread:$0]  (!%p6760_p6), %s369_s29, 256, %s371_s1, [#allocation13], %s6649_s21, %s6649_s21, %s6650_s22  }
  0x21   : > { %s7467_s7 = sld [smem:[#allocation29_spill]]  ;;  %s6653_s29 = smov [#allocation11]  }
  0x22   : > { %s326_s27 = sshll.u32 %s7464_s3, 4  ;;  %s356_s30 = sshll.u32 %s6653_s29, 4  ;;  %s327_s27 = int_to_ptr.hbm [resolvable:$true] %s326_s27  ;;  %s357_s30 = int_to_ptr.vmem [resolvable:$true] %s356_s30 }
  0x23   : > { %6205 = dma.hbm_to_vmem [thread:$0]  (!%p6760_p6), %s327_s27, 27648, %s329_s14, [#allocation7], %s7466_s13, %s7466_s13, %s7452_s16  }
  0x24   : > { %s354_s28 = sshll.u32 %s7465_s5, 4  ;;  %s6654_s15 = smov [#allocation14]   ;;  %s355_s28 = int_to_ptr.hbm [resolvable:$true] %s354_s28 }
  0x25   : > { %6211 = dma.hbm_to_vmem [thread:$0]  (!%p6760_p6), %s355_s28, 256, %s357_s30, [#allocation10], %s6649_s21, %s6649_s21, %s6650_s22  }
  0x26   : > { %s384_s27 = sshll.u32 %s6654_s15, 4  ;;  %s399_s4 = sshll.u32 %s7447_s9, 4  ;;  %s385_s27 = int_to_ptr.vmem [resolvable:$true] %s384_s27  ;;  %s400_s4 = int_to_ptr.hbm [resolvable:$true] %s399_s4 }
  0x27   : > { %s382_s1 = sshll.u32 %s7467_s7, 4  ;;  %s6655_s28 = smov [#allocation15]   ;;  %s383_s1 = int_to_ptr.hbm [resolvable:$true] %s382_s1 }
  0x28   : > { %6217 = dma.hbm_to_vmem [thread:$0]  (!%p6760_p6), %s383_s1, 6144, %s385_s27, [#allocation13], %s6649_s21, %s6649_s21, %s6650_s22  }
  0x29   : > { %s401_s23 = sshll.u32 %s6655_s28, 4  ;;  %s4673_s29 = sadd.s32 4294967294, %s6643_s20   ;;  %s402_s23 = int_to_ptr.vmem [resolvable:$true] %s401_s23 }
  0x2a   : > { %6220 = dma.hbm_to_vmem [thread:$0]  (!%p6760_p6), %s400_s4, 2048, %s402_s23, [#allocation16], %s7466_s13, %s7466_s13, %s7452_s16  }
  0x2b   : > { %s6816_s30 = sadd.s32 1, %s6643_s20   ;;  %s38_s15 = sadd.s32 1, %s6639_s19 }
  0x2c   : > { %s35_s14 = ssub.s32 %s6643_s20, %s6816_s30  ;;  %p45_p7 = scmp.ne.s32.totalorder %s6639_s19, %s6635_s18 }
  0x2d   : > { %p36_p8 = scmp.eq.s32.totalorder %s35_s14, 0  ;;  %p46_p9 = scmp.eq.s32.totalorder %s6643_s20, 0 }
  0x2e   : > { %p51_p10 = scmp.ne.s32.totalorder %s6635_s18, %s6631_s17  ;;  %p285_p11 = scmp.eq.s32.totalorder %s6743_s24, 1 }
  0x2f   : > { %s6828_s21 = scalar_select %p36_p8, %s6639_s19, %s38_s15  }
  0x30   : > { %p6832_p12 = por %p52_p1, %p51_p10  ;;  %p6836_p13 = por %p285_p11, %p45_p7 }
  0x31   : > { %p291_p0 = scmp.eq.s32.totalorder %s4673_s29, 1  ;;  %p47_p2 = por %p46_p9, %p45_p7 }
  0x32   : > { %s418_s1 = sand.u32 1, %s6639_s19   ;;  %p6236_p6 = scmp.lt.s32.totalorder %s6643_s20, 2 }
  0x33   : > { %p6841_p4 = por %p291_p0, %p51_p10  ;;  %s4683_s26 = sshll.u32 %s418_s1, 5 }
  0x34   : > { %s5872_s4 = sshll.u32 %s6643_s20, 5  ;;  %s422_s16 = scalar_lea.vmem [#allocation3], %s4683_s26 }
  0x35   : > { %s428_s15 = scalar_lea.hbm %s7438_s0, %s5872_s4  ;;  %s431_s3 = sshll.u32 %s422_s16, 4  ;;  %s432_s3 = int_to_ptr.vmem [resolvable:$true] %s431_s3 }
  0x36   : > { %s429_s14 = sshll.u32 %s428_s15, 4  ;;  %p6850_p8 = pnand %p6236_p6, %p47_p2  ;;  %s430_s14 = int_to_ptr.hbm [resolvable:$true] %s429_s14 }
  0x37   : > { %s419_s5 = scalar_lea.sflag [#allocation4], %s418_s1  ;;  %s6531_s6 = sshra.s32 %s430_s14, 4  ;;  %s6532_s6 = int_to_ptr.hbm [resolvable:$true] %s6531_s6 }
  0x38   : > { %s6533_s7 = scalar_lea.hbm %s6532_s6, 32  ;;  %p6535_p9 = pneg %p6850_p8 }
  0x39   : > { %p6534_p7 = scmp.ne.s32.totalorder %s6532_s6, %s6533_s7  ;;  %s6538_s16 = scalar_lea.hbm %s7438_s0, 64 }
  0x3a   : > { %p6539_p0 = scmp.lt.s32.totalorder %s6532_s6, %s7438_s0  ;;  %p6540_p2 = scmp.lt.s32.totalorder %s6538_s16, %s6533_s7 }
  0x3b   : > { %p6536_p10 = pnand %p6535_p9, %p6534_p7 }
  0x3c   : > { %p6541_p6 = por %p6540_p2, %p6539_p0 }
  0x3d   : > { %p6537_p11 = pneg %p6536_p10 }
  0x3f   : > { %p6542_p5 = pnand %p6541_p6, %p6537_p11 }
  0x41   : > { %6545 = shalt.err (!%p6542_p5)
}
  0x42   : > { %s7472_s1 = smov 4   ;;  %443 = sbr.rel (%p6748_p3) target bundleno = 2159 (0x86f), region = 64 }
  0x43   : > { %6224 = dma.hbm_to_vmem [thread:$0]  (!%p6850_p8), %s430_s14, 512, %s432_s3, %s419_s5, %s7466_s13, %s7466_s13, %s7472_s1  }
  0x44   : > { %s6870_s15 = sand.u32 (!%p6748_p3), 1, %s6635_s18  }
  0x45   : > { %s4688_s6 = sshll.u32 (!%p6748_p3), %s6870_s15, 5  ;;  %s446_s7 = scalar_lea.sflag (!%p6748_p3), [#allocation4], %s6870_s15 }
  0x46   : > { %s6874_s4 = scalar_lea.vmem (!%p6748_p3), [#allocation3], %s4688_s6 }
  0x47   : > { %6606 = dma.done.wait (%p6832_p12), %s446_s7, 512  }
  0x48   : > { %6608 = vsyncadd (%p6832_p12), %s446_s7, 4294966784 }
  0x49   : > { %6610 = dma.done.wait (%p52_p1), [#allocation7], 28672  }
  0x4a   : > { %6612 = vsyncadd (%p52_p1), [#allocation7], 4294938624 }
  0x4b   : > { %6614 = dma.done.wait (%p52_p1), [#allocation10], 512  }
  0x4c   : > { %6616 = vsyncadd (%p52_p1), [#allocation10], 4294966784 }
  0x4d   : > { %6618 = dma.done.wait (%p52_p1), [#allocation13], 6400  }
  0x4e   : > { %6620 = vsyncadd (%p52_p1), [#allocation13], 4294960896 }
  0x4f   : > { %6622 = dma.done.wait (%p52_p1), [#allocation16], 2048  }
  0x50   : > { %6624 = vsyncadd (%p52_p1), [#allocation16], 4294965248  ;;  %v5884_v0 = vld [vmem:[#allocation6 + $0x38] sm:$0xff]  ;;  %v5883_v1 = vld [vmem:[#allocation6 + $0x30] sm:$0xff]  ;;  %v6656_v27 = vmov 0.0   ;;  %s4696_s29 = sshll.u32 %s6870_s15, 6 }
  0x51   : > { %626 = vmatpush.bf16.msra.mxu0 %v5884_v0  ;;  %v5882_v2 = vld [vmem:[#allocation6 + $0x28] sm:$0xff]  ;;  %v5881_v3 = vld [vmem:[#allocation6 + $0x20] sm:$0xff]  ;;  %v5880_v4 = vld [vmem:[#allocation6 + $0x18] sm:$0xff]  ;;  %656 = vst [vmem:[#allocation2 + $0x8] sm:$0xff] %v6656_v27  ;;  %s7394_s28 = scalar_lea.vmem [#allocation17], %s4696_s29  ;;  %s6166_s16 = sshll.u32 %s6743_s24, 6 }
  0x52   : > { %v5879_v5 = vld [vmem:[#allocation6 + $0x10] sm:$0xff]  ;;  %v5878_v6 = vld [vmem:[#allocation6 + $0x8] sm:$0xff]  ;;  %v5877_v7 = vld [vmem:[#allocation6] sm:$0xff]  ;;  %658 = vst [vmem:[#allocation2 + $0x48] sm:$0xff] %v6656_v27  ;;  %s4529_s1 = scalar_lea.hbm %s7449_s11, %s6166_s16  ;;  %s4530_s6 = sshll.u32 %s7394_s28, 4  ;;  %s4531_s6 = int_to_ptr.vmem [resolvable:$true] %s4530_s6 }
  0x53   : > { %v5873_v8 = vld [vmem:[%s6874_s4] sm:$0xff]  ;;  %v5874_v9 = vld [vmem:[%s6874_s4 + $0x8] sm:$0xff]  ;;  %v5900_v10 = vld [vmem:[#allocation8 + $0x78] sm:$0xff]  ;;  %659 = vst [vmem:[#allocation2 + $0x30] sm:$0xff] %v6656_v27  ;;  %s4532_s7 = sshll.u32 %s4529_s1, 4  ;;  %s6581_s13 = scalar_lea.hbm %s7449_s11, 128  ;;  %s4533_s7 = int_to_ptr.hbm [resolvable:$true] %s4532_s7 }
  0x54   : > { %v5892_v11 = vld [vmem:[#allocation8 + $0x38] sm:$0xff]  ;;  %923 = vmatpush.bf16.msra.mxu2 %v5900_v10  ;;  %v5899_v12 = vld [vmem:[#allocation8 + $0x70] sm:$0xff]  ;;  %v5898_v15 = vld [vmem:[#allocation8 + $0x68] sm:$0xff]  ;;  %661 = vst [vmem:[#allocation2 + $0x70] sm:$0xff] %v6656_v27  ;;  %s6575_s3 = sshra.s32 %s4533_s7, 4  ;;  %s6576_s3 = int_to_ptr.hbm [resolvable:$true] %s6575_s3 }
  0x55   : > { %627 = vmatpush.bf16.msra.mxu0 %v5883_v1  ;;  %894 = vmatpush.bf16.msra.mxu1 %v5892_v11  ;;  %v5891_v13 = vld [vmem:[#allocation8 + $0x30] sm:$0xff]  ;;  %v5908_v14 = vld [vmem:[#allocation8 + $0xb8] sm:$0xff]  ;;  %v5890_v16 = vld [vmem:[#allocation8 + $0x28] sm:$0xff]  ;;  %s6577_s24 = scalar_lea.hbm %s6576_s3, 64  ;;  %p6582_p12 = scmp.lt.s32.totalorder %s6576_s3, %s7449_s11 }
  0x56   : > { %952 = vmatpush.bf16.msra.mxu3 %v5908_v14  ;;  %v5897_v17 = vld [vmem:[#allocation8 + $0x60] sm:$0xff]  ;;  %v5875_v18 = vld [vmem:[%s6874_s4 + $0x10] sm:$0xff]  ;;  %v5896_v19 = vld [vmem:[#allocation8 + $0x58] sm:$0xff]  ;;  %p6578_p1 = scmp.ne.s32.totalorder %s6576_s3, %s6577_s24  ;;  %p6583_p8 = scmp.lt.s32.totalorder %s6581_s13, %s6577_s24 }
  0x57   : > { %v5876_v20 = vld [vmem:[%s6874_s4 + $0x18] sm:$0xff]  ;;  %v5889_v21 = vld [vmem:[#allocation8 + $0x20] sm:$0xff]  ;;  %v5895_v22 = vld [vmem:[#allocation8 + $0x50] sm:$0xff]  ;;  %s4517_s4 = scalar_lea.sflag [#allocation5], %s6870_s15 }
  0x58   : > { %924 = vmatpush.bf16.msra.mxu2 %v5899_v12  ;;  %v5907_v23 = vld [vmem:[#allocation8 + $0xb0] sm:$0xff]  ;;  %v5888_v24 = vld [vmem:[#allocation8 + $0x18] sm:$0xff]  ;;  %v5894_v25 = vld [vmem:[#allocation8 + $0x48] sm:$0xff]  ;;  %p6579_p3 = pnand %p6578_p1, %p6836_p13  ;;  %p6584_p7 = por %p6583_p8, %p6582_p12 }
  0x59   : > { %628 = vmatpush.bf16.msra.mxu0 %v5882_v2  ;;  %895 = vmatpush.bf16.msra.mxu1 %v5891_v13  ;;  %v5906_v26 = vld [vmem:[#allocation8 + $0xa8] sm:$0xff]  ;;  %v5887_v28 = vld [vmem:[#allocation8 + $0x10] sm:$0xff]  ;;  %v5893_v29 = vld [vmem:[#allocation8 + $0x40] sm:$0xff] }
  0x5a   : > { %953 = vmatpush.bf16.msra.mxu3 %v5907_v23  ;;  %v5905_v30 = vld [vmem:[#allocation8 + $0xa0] sm:$0xff]  ;;  %v5886_v31 = vld [vmem:[#allocation8 + $0x8] sm:$0xff]  ;;  %v5904_v32 = vld [vmem:[#allocation8 + $0x98] sm:$0xff]  ;;  %p6580_p5 = pneg %p6579_p3 }
  0x5b   : > { %v5885_v33 = vld [vmem:[#allocation8] sm:$0xff]  ;;  %v5903_v34 = vld [vmem:[#allocation8 + $0x90] sm:$0xff]  ;;  %v5902_v35 = vld [vmem:[#allocation8 + $0x88] sm:$0xff] }
  0x5c   : > { %925 = vmatpush.bf16.msra.mxu2 %v5898_v15  ;;  %v5901_v36 = vld [vmem:[#allocation8 + $0x80] sm:$0xff]  ;;  %v5932_v1 = vld [vmem:[#allocation8 + $0x178] sm:$0xff]  ;;  %p6585_p9 = pnand %p6584_p7, %p6580_p5 }
  0x5d   : > { %629 = vmatpush.bf16.msra.mxu0 %v5881_v3  ;;  %896 = vmatpush.bf16.msra.mxu1 %v5890_v16  ;;  %v6291_v37 = vld [vmem:[%s7440_s2] ss:$0 sm:$0xff]  ;;  %v5916_v2 = vld [vmem:[#allocation8 + $0xf8] sm:$0xff] }
  0x5e   : > { %954 = vmatpush.bf16.msra.mxu3 %v5906_v26  ;;  %v5924_v3 = vld [vmem:[#allocation8 + $0x138] sm:$0xff]  ;;  %v5922_v26 = vld [vmem:[#allocation8 + $0x128] sm:$0xff]  ;;  %v5929_v27 = vld [vmem:[#allocation8 + $0x160] sm:$0xff] }
  0x60   : > { %926 = vmatpush.bf16.msra.mxu2 %v5897_v17 }
  0x61   : > { %630 = vmatpush.bf16.msra.mxu0 %v5880_v4  ;;  %897 = vmatpush.bf16.msra.mxu1 %v5889_v21  ;;  %v5931_v4 = vld [vmem:[#allocation8 + $0x170] sm:$0xff] }
  0x62   : > { %955 = vmatpush.bf16.msra.mxu3 %v5905_v30  ;;  %v5920_v30 = vld [vmem:[#allocation8 + $0x118] sm:$0xff] }
  0x64   : > { %927 = vmatpush.bf16.msra.mxu2 %v5896_v19 }
  0x65   : > { %631 = vmatpush.bf16.msra.mxu0 %v5879_v5  ;;  %898 = vmatpush.bf16.msra.mxu1 %v5888_v24  ;;  %v5915_v5 = vld [vmem:[#allocation8 + $0xf0] sm:$0xff]  ;;  %v5930_v24 = vld [vmem:[#allocation8 + $0x168] sm:$0xff] }
  0x66   : > { %956 = vmatpush.bf16.msra.mxu3 %v5904_v32  ;;  %v5928_v32 = vld [vmem:[#allocation8 + $0x158] sm:$0xff] }
  0x68   : > { %928 = vmatpush.bf16.msra.mxu2 %v5895_v22 }
  0x69   : > { %632 = vmatpush.bf16.msra.mxu0 %v5878_v6  ;;  %899 = vmatpush.bf16.msra.mxu1 %v5887_v28  ;;  %v5913_v28 = vld [vmem:[#allocation8 + $0xe0] sm:$0xff] }
  0x6a   : > { %957 = vmatpush.bf16.msra.mxu3 %v5903_v34  ;;  %v5918_v34 = vld [vmem:[#allocation8 + $0x108] sm:$0xff] }
  0x6c   : > { %929 = vmatpush.bf16.msra.mxu2 %v5894_v25  ;;  %v5914_v25 = vld [vmem:[#allocation8 + $0xe8] sm:$0xff] }
  0x6d   : > { %633 = vmatpush.bf16.msra.mxu0 %v5877_v7  ;;  %900 = vmatpush.bf16.msra.mxu1 %v5886_v31  ;;  %v5923_v7 = vld [vmem:[#allocation8 + $0x130] sm:$0xff] }
  0x6e   : > { %958 = vmatpush.bf16.msra.mxu3 %v5902_v35  ;;  %v5919_v31 = vld [vmem:[#allocation8 + $0x110] sm:$0xff] }
  0x6f   : > { %v5927_v35 = vld [vmem:[#allocation8 + $0x150] sm:$0xff] }
  0x70   : > { %634 = vmatmul.bf16.vlgmr.msra.gmra.mxu0 %v5873_v8  ;;  %930 = vmatpush.bf16.msra.mxu2 %v5893_v29  ;;  %v5921_v29 = vld [vmem:[#allocation8 + $0x120] sm:$0xff] }
  0x71   : > { %901 = vmatpush.bf16.msra.mxu1 %v5885_v33  ;;  %1240 = vmatpush.bf16.msrb.mxu0 %v5916_v2  ;;  %v5912_v33 = vld [vmem:[#allocation8 + $0xd8] sm:$0xff] }
  0x72   : > { %959 = vmatpush.bf16.msra.mxu3 %v5901_v36  ;;  %v5911_v36 = vld [vmem:[#allocation8 + $0xd0] sm:$0xff] }
  0x74   : > { %1298 = vmatpush.bf16.msrb.mxu2 %v5932_v1 }
  0x75   : > { %1269 = vmatpush.bf16.msrb.mxu1 %v5924_v3  ;;  %1241 = vmatpush.bf16.msrb.mxu0 %v5915_v5 }
  0x78   : > { %1299 = vmatpush.bf16.msrb.mxu2 %v5931_v4 }
  0x79   : > { %1270 = vmatpush.bf16.msrb.mxu1 %v5923_v7  ;;  %1242 = vmatpush.bf16.msrb.mxu0 %v5914_v25 }
  0x7c   : > { %1300 = vmatpush.bf16.msrb.mxu2 %v5930_v24 }
  0x7d   : > { %1271 = vmatpush.bf16.msrb.mxu1 %v5922_v26  ;;  %1243 = vmatpush.bf16.msrb.mxu0 %v5913_v28 }
  0x80   : > { %639 = vmatmul.bf16.gmra.mxu0 %v5874_v9  ;;  %1301 = vmatpush.bf16.msrb.mxu2 %v5929_v27 }
  0x81   : > { %1272 = vmatpush.bf16.msrb.mxu1 %v5921_v29  ;;  %1244 = vmatpush.bf16.msrb.mxu0 %v5912_v33 }
  0x84   : > { %1302 = vmatpush.bf16.msrb.mxu2 %v5928_v32 }
  0x85   : > { %1273 = vmatpush.bf16.msrb.mxu1 %v5920_v30  ;;  %1245 = vmatpush.bf16.msrb.mxu0 %v5911_v36 }
  0x88   : > { %1303 = vmatpush.bf16.msrb.mxu2 %v5927_v35 }
  0x89   : > { %1274 = vmatpush.bf16.msrb.mxu1 %v5919_v31 }
  0x8d   : > { %1275 = vmatpush.bf16.msrb.mxu1 %v5918_v34 }
  0x90   : > { %644 = vmatmul.bf16.gmra.mxu0 %v5875_v18 }
  0xa0   : > { %649 = vmatmul.bf16.gmra.mxu0 %v5876_v20 }
  0xed   : > { %v635_v38 = vpop.f32.mrf.mxu0 }
  0xee   : > { %v6903_v39 = vadd.f32 %v6291_v37, %v635_v38 }
  0xf0   : > { %664 = vst [vmem:[#allocation2 + $0x10] sm:$0xff] %v6903_v39 }
  0xf5   : > { %v637_v40 = vpop.f32.mrf.mxu0 }
  0xf6   : > { %v6906_v41 = vadd.f32 %v6291_v37, %v637_v40 }
  0xf7   : > { %v672_v46 = vld [vmem:[#allocation2 + $0xf] sm:$0xff] }
  0xf8   : > { %665 = vst [vmem:[#allocation2 + $0x18] sm:$0xff] %v6906_v41  ;;  %v6911_v42 = vpack.c.bf16 %v6906_v41, %v6903_v39 }
  0xfa   : > { %931 = vmatmul.bf16.vlgmr.msra.gmra.mxu2 %v6911_v42 }
  0xfd   : > { %v640_v43 = vpop.f32.mrf.mxu0 }
  0xfe   : > { %v6914_v44 = vadd.f32 %v6291_v37, %v640_v43  ;;  %v5910_v43 = vld [vmem:[#allocation8 + $0xc8] sm:$0xff] }
  0xff   : > { %v673_v45 = vld [vmem:[#allocation2 + $0x17] sm:$0xff]  ;;  %1246 = vmatpush.bf16.msrb.mxu0 %v5910_v43 }
 0x100   : > { %666 = vst [vmem:[#allocation2 + $0x20] sm:$0xff] %v6914_v44  ;;  %v688_v47 = vpack.c.bf16 %v673_v45, %v672_v46  ;;  %v680_v50 = vld [vmem:[#allocation2 + $0x11] sm:$0xff]  ;;  %v5926_v45 = vld [vmem:[#allocation8 + $0x148] sm:$0xff]  ;;  %v5909_v46 = vld [vmem:[#allocation8 + $0xc0] sm:$0xff] }
 0x101   : > { %1304 = vmatpush.bf16.msrb.mxu2 %v5926_v45 }
 0x102   : > { %902 = vmatmul.bf16.vlgmr.msra.gmra.mxu1 %v688_v47  ;;  %v6947_v47 = vld [vmem:[#allocation9] ss:$0 sm:$0xff] }
 0x103   : > { %1247 = vmatpush.bf16.msrb.mxu0 %v5909_v46 }
 0x105   : > { %v642_v48 = vpop.f32.mrf.mxu0 }
 0x106   : > { %v6917_v49 = vadd.f32 %v6291_v37, %v642_v48 }
 0x107   : > { %v681_v51 = vld [vmem:[#allocation2 + $0x19] sm:$0xff] }
 0x108   : > { %667 = vst [vmem:[#allocation2 + $0x28] sm:$0xff] %v6917_v49  ;;  %v6922_v52 = vpack.c.bf16 %v6917_v49, %v6914_v44  ;;  %v690_v53 = vpack.c.bf16 %v681_v51, %v680_v50  ;;  %v674_v56 = vld [vmem:[#allocation2 + $0x1f] sm:$0xff] }
 0x10a   : > { %936 = vmatmul.bf16.gmra.mxu2 %v6922_v52  ;;  %960 = vmatmul.bf16.vlgmr.msra.gmra.mxu3 %v690_v53  ;;  %v5925_v53 = vld [vmem:[#allocation8 + $0x140] sm:$0xff] }
 0x10b   : > { %1305 = vmatpush.bf16.msrb.mxu2 %v5925_v53 }
 0x10d   : > { %v645_v54 = vpop.f32.mrf.mxu0 }
 0x10e   : > { %v6925_v55 = vadd.f32 %v6291_v37, %v645_v54 }
 0x10f   : > { %v675_v57 = vld [vmem:[#allocation2 + $0x27] sm:$0xff] }
 0x110   : > { %668 = vst [vmem:[#allocation2 + $0x50] sm:$0xff] %v6925_v55  ;;  %v691_v58 = vpack.c.bf16 %v675_v57, %v674_v56  ;;  %v682_v59 = vld [vmem:[#allocation2 + $0x21] sm:$0xff]  ;;  %v683_v61 = vld [vmem:[#allocation2 + $0x29] sm:$0xff] }
 0x111   : > { %v693_v0 = vpack.c.bf16 %v683_v61, %v682_v59 }
 0x112   : > { %907 = vmatmul.bf16.gmra.mxu1 %v691_v58  ;;  %v6950_v58 = vld [vmem:[#allocation11] ss:$0 sm:$0xff] }
 0x115   : > { %v647_v60 = vpop.f32.mrf.mxu0 }
 0x116   : > { %v6928_v62 = vadd.f32 %v6291_v37, %v647_v60 }
 0x117   : > { %v676_v10 = vld [vmem:[#allocation2 + $0x4f] sm:$0xff] }
 0x118   : > { %669 = vst [vmem:[#allocation2 + $0x58] sm:$0xff] %v6928_v62  ;;  %v6933_v63 = vpack.c.bf16 %v6928_v62, %v6925_v55 }
 0x11a   : > { %941 = vmatmul.bf16.gmra.mxu2 %v6933_v63  ;;  %965 = vmatmul.bf16.gmra.mxu3 %v693_v0  ;;  %v6953_v0 = vld [vmem:[#allocation12] ss:$0 sm:$0xff] }
 0x11d   : > { %v650_v6 = vpop.f32.mrf.mxu0 }
 0x11e   : > { %v6936_v8 = vadd.f32 %v6291_v37, %v650_v6 }
 0x11f   : > { %v677_v9 = vld [vmem:[#allocation2 + $0x57] sm:$0xff] }
 0x120   : > { %670 = vst [vmem:[#allocation2 + $0x60] sm:$0xff] %v6936_v8  ;;  %v694_v11 = vpack.c.bf16 %v677_v9, %v676_v10  ;;  %v684_v14 = vld [vmem:[#allocation2 + $0x51] sm:$0xff] }
 0x122   : > { %912 = vmatmul.bf16.gmra.mxu1 %v694_v11 }
 0x125   : > { %v652_v12 = vpop.f32.mrf.mxu0 }
 0x126   : > { %v6939_v13 = vadd.f32 %v6291_v37, %v652_v12  ;;  %v5917_v37 = vld [vmem:[#allocation8 + $0x100] sm:$0xff] }
 0x127   : > { %v685_v15 = vld [vmem:[#allocation2 + $0x59] sm:$0xff]  ;;  %1276 = vmatpush.bf16.msrb.mxu1 %v5917_v37 }
 0x128   : > { %671 = vst [vmem:[#allocation2 + $0x68] sm:$0xff] %v6939_v13  ;;  %v6944_v16 = vpack.c.bf16 %v6939_v13, %v6936_v8  ;;  %v696_v17 = vpack.c.bf16 %v685_v15, %v684_v14  ;;  %v678_v18 = vld [vmem:[#allocation2 + $0x5f] sm:$0xff] }
 0x12a   : > { %946 = vmatmul.bf16.gmra.mxu2 %v6944_v16  ;;  %970 = vmatmul.bf16.gmra.mxu3 %v696_v17 }
 0x12f   : > { %v679_v19 = vld [vmem:[#allocation2 + $0x67] sm:$0xff] }
 0x130   : > { %v697_v20 = vpack.c.bf16 %v679_v19, %v678_v18  ;;  %v686_v21 = vld [vmem:[#allocation2 + $0x61] sm:$0xff]  ;;  %v687_v22 = vld [vmem:[#allocation2 + $0x69] sm:$0xff] }
 0x131   : > { %v699_v23 = vpack.c.bf16 %v687_v22, %v686_v21 }
 0x132   : > { %917 = vmatmul.bf16.gmra.mxu1 %v697_v20 }
 0x13a   : > { %975 = vmatmul.bf16.gmra.mxu3 %v699_v23 }
 0x17d   : > { %v932_v38 = vpop.f32.mrf.mxu2 }
 0x17f   : > { %v903_v40 = vpop.f32.mrf.mxu1 }
 0x180   : > { %v904_v51 = vadd.f32 %v6947_v47, %v903_v40 }
 0x182   : > { %v933_v54 = vadd.f32 %v932_v38, %v904_v51 }
 0x185   : > { %v934_v48 = vpop.f32.mrf.mxu2 }
 0x187   : > { %v905_v50 = vpop.f32.mrf.mxu1 }
 0x188   : > { %v906_v60 = vadd.f32 %v6947_v47, %v905_v50 }
 0x18a   : > { %v935_v4 = vadd.f32 %v934_v48, %v906_v60 }
 0x18d   : > { %v961_v56 = vpop.f32.mrf.mxu3  ;;  %v937_v1 = vpop.f32.mrf.mxu2 }
 0x18e   : > { %v962_v57 = vadd.f32 %v961_v56, %v933_v54 }
 0x18f   : > { %v908_v59 = vpop.f32.mrf.mxu1 }
 0x190   : > { %v981_v61 = vmax.f32 %v962_v57, 0.0  ;;  %v909_v9 = vadd.f32 %v6947_v47, %v908_v59 }
 0x192   : > { %v991_v2 = vmul.f32 %v6950_v58, %v981_v61  ;;  %v938_v14 = vadd.f32 %v937_v1, %v909_v9 }
 0x194   : > { %v1001_v3 = vadd.f32 %v6953_v0, %v991_v2 }
 0x195   : > { %v963_v5 = vpop.f32.mrf.mxu3  ;;  %v939_v12 = vpop.f32.mrf.mxu2 }
 0x196   : > { %1009 = vst [vmem:[#allocation2 + $0x10] sm:$0xff] %v1001_v3  ;;  %v964_v6 = vadd.f32 %v963_v5, %v935_v4 }
 0x197   : > { %v910_v7 = vpop.f32.mrf.mxu1 }
 0x198   : > { %v982_v10 = vmax.f32 %v964_v6, 0.0  ;;  %v911_v21 = vadd.f32 %v6947_v47, %v910_v7 }
 0x19a   : > { %v992_v11 = vmul.f32 %v6950_v58, %v982_v10  ;;  %v940_v24 = vadd.f32 %v939_v12, %v911_v21 }
 0x19c   : > { %v1002_v15 = vadd.f32 %v6953_v0, %v992_v11 }
 0x19d   : > { %v966_v17 = vpop.f32.mrf.mxu3  ;;  %v942_v26 = vpop.f32.mrf.mxu2  ;;  %v1017_v28 = vld [vmem:[#allocation2 + $0xf] sm:$0xff] }
 0x19e   : > { %v967_v18 = vadd.f32 %v966_v17, %v938_v14  ;;  %1010 = vst [vmem:[#allocation2 + $0x18] sm:$0xff] %v1002_v15  ;;  %v1034_v19 = vpack.c.bf16 %v1002_v15, %v1001_v3 }
 0x19f   : > { %v913_v20 = vpop.f32.mrf.mxu1 }
 0x1a0   : > { %v983_v22 = vmax.f32 %v967_v18, 0.0  ;;  %1277 = vmatmul.bf16.vlgmr.msrb.gmra.mxu1 %v1034_v19  ;;  %v914_v32 = vadd.f32 %v6947_v47, %v913_v20 }
 0x1a2   : > { %v993_v23 = vmul.f32 %v6950_v58, %v983_v22  ;;  %v943_v36 = vadd.f32 %v942_v26, %v914_v32  ;;  %v5940_v22 = vld [vmem:[#allocation8 + $0x1b8] sm:$0xff]  ;;  %v5939_v26 = vld [vmem:[#allocation8 + $0x1b0] sm:$0xff] }
 0x1a3   : > { %1586 = vmatpush.bf16.msrb.mxu3 %v5940_v22 }
 0x1a4   : > { %v1003_v25 = vadd.f32 %v6953_v0, %v993_v23  ;;  %v5948_v23 = vld [vmem:[#allocation8 + $0x1f8] sm:$0xff] }
 0x1a5   : > { %v968_v27 = vpop.f32.mrf.mxu3  ;;  %v1018_v29 = vld [vmem:[#allocation2 + $0x17] sm:$0xff]  ;;  %v944_v50 = vpop.f32.mrf.mxu2  ;;  %1615 = vmatpush.bf16.msra.mxu0 %v5948_v23 }
 0x1a6   : > { %v969_v30 = vadd.f32 %v968_v27, %v940_v24  ;;  %v1033_v31 = vpack.c.bf16 %v1018_v29, %v1017_v28  ;;  %1011 = vst [vmem:[#allocation2 + $0x20] sm:$0xff] %v1003_v25  ;;  %v1025_v43 = vld [vmem:[#allocation2 + $0x11] sm:$0xff] }
 0x1a7   : > { %v915_v34 = vpop.f32.mrf.mxu1  ;;  %v5956_v24 = vld [vmem:[#allocation8 + $0x238] sm:$0xff]  ;;  %1587 = vmatpush.bf16.msrb.mxu3 %v5939_v26 }
 0x1a8   : > { %v984_v33 = vmax.f32 %v969_v30, 0.0  ;;  %1248 = vmatmul.bf16.vlgmr.msrb.gmra.mxu0 %v1033_v31  ;;  %v916_v51 = vadd.f32 %v6947_v47, %v915_v34  ;;  %1644 = vmatpush.bf16.msra.mxu1 %v5956_v24 }
 0x1aa   : > { %v994_v35 = vmul.f32 %v6950_v58, %v984_v33  ;;  %v945_v57 = vadd.f32 %v944_v50, %v916_v51 }
 0x1ac   : > { %v1004_v37 = vadd.f32 %v6953_v0, %v994_v35 }
 0x1ad   : > { %v971_v38 = vpop.f32.mrf.mxu3  ;;  %v1026_v40 = vld [vmem:[#allocation2 + $0x19] sm:$0xff]  ;;  %v947_v6 = vpop.f32.mrf.mxu2 }
 0x1ae   : > { %v972_v45 = vadd.f32 %v971_v38, %v943_v36  ;;  %1012 = vst [vmem:[#allocation2 + $0x28] sm:$0xff] %v1004_v37  ;;  %v1037_v46 = vpack.c.bf16 %v1004_v37, %v1003_v25  ;;  %v1035_v48 = vpack.c.bf16 %v1026_v40, %v1025_v43  ;;  %v1019_v1 = vld [vmem:[#allocation2 + $0x1f] sm:$0xff] }
 0x1af   : > { %v918_v56 = vpop.f32.mrf.mxu1 }
 0x1b0   : > { %v985_v53 = vmax.f32 %v972_v45, 0.0  ;;  %1282 = vmatmul.bf16.gmra.mxu1 %v1037_v46  ;;  %1306 = vmatmul.bf16.vlgmr.msrb.gmra.mxu2 %v1035_v48  ;;  %v919_v4 = vadd.f32 %v6947_v47, %v918_v56  ;;  %v5947_v56 = vld [vmem:[#allocation8 + $0x1f0] sm:$0xff] }
 0x1b1   : > { %1616 = vmatpush.bf16.msra.mxu0 %v5947_v56  ;;  %v5980_v56 = vld [vmem:[#allocation8 + $0x278] sm:$0xff] }
 0x1b2   : > { %v995_v54 = vmul.f32 %v6950_v58, %v985_v53  ;;  %v948_v11 = vadd.f32 %v947_v6, %v919_v4  ;;  %v5935_v4 = vld [vmem:[#allocation8 + $0x190] sm:$0xff]  ;;  %v5942_v6 = vld [vmem:[#allocation8 + $0x1c8] sm:$0xff] }
 0x1b4   : > { %v1005_v59 = vadd.f32 %v6953_v0, %v995_v54  ;;  %v5938_v54 = vld [vmem:[#allocation8 + $0x1a8] sm:$0xff] }
 0x1b5   : > { %v1020_v60 = vld [vmem:[#allocation2 + $0x27] sm:$0xff]  ;;  %v973_v61 = vpop.f32.mrf.mxu3  ;;  %v949_v27 = vpop.f32.mrf.mxu2  ;;  %1588 = vmatpush.bf16.msrb.mxu3 %v5938_v54 }
 0x1b6   : > { %v974_v2 = vadd.f32 %v973_v61, %v945_v57  ;;  %v1036_v3 = vpack.c.bf16 %v1020_v60, %v1019_v1  ;;  %1013 = vst [vmem:[#allocation2 + $0x50] sm:$0xff] %v1005_v59  ;;  %v1027_v9 = vld [vmem:[#allocation2 + $0x21] sm:$0xff]  ;;  %v1028_v10 = vld [vmem:[#allocation2 + $0x29] sm:$0xff]  ;;  %v5936_v60 = vld [vmem:[#allocation8 + $0x198] sm:$0xff] }
 0x1b7   : > { %v920_v14 = vpop.f32.mrf.mxu1  ;;  %v1038_v19 = vpack.c.bf16 %v1028_v10, %v1027_v9  ;;  %v5946_v57 = vld [vmem:[#allocation8 + $0x1e8] sm:$0xff]  ;;  %v5945_v61 = vld [vmem:[#allocation8 + $0x1e0] sm:$0xff] }
 0x1b8   : > { %v986_v5 = vmax.f32 %v974_v2, 0.0  ;;  %1253 = vmatmul.bf16.gmra.mxu0 %v1036_v3  ;;  %v921_v20 = vadd.f32 %v6947_v47, %v920_v14  ;;  %v5953_v1 = vld [vmem:[#allocation8 + $0x220] sm:$0xff]  ;;  %v5944_v2 = vld [vmem:[#allocation8 + $0x1d8] sm:$0xff]  ;;  %v5943_v3 = vld [vmem:[#allocation8 + $0x1d0] sm:$0xff] }
 0x1b9   : > { %1617 = vmatpush.bf16.msra.mxu0 %v5946_v57  ;;  %v5934_v10 = vld [vmem:[#allocation8 + $0x188] sm:$0xff]  ;;  %v5933_v14 = vld [vmem:[#allocation8 + $0x180] sm:$0xff] }
 0x1ba   : > { %v996_v7 = vmul.f32 %v6950_v58, %v986_v5  ;;  %v950_v28 = vadd.f32 %v949_v27, %v921_v20  ;;  %v5952_v5 = vld [vmem:[#allocation8 + $0x218] sm:$0xff] }
 0x1bc   : > { %v1006_v12 = vadd.f32 %v6953_v0, %v996_v7  ;;  %v5941_v7 = vld [vmem:[#allocation8 + $0x1c0] sm:$0xff] }
 0x1bd   : > { %v976_v15 = vpop.f32.mrf.mxu3  ;;  %v1021_v32 = vld [vmem:[#allocation2 + $0x4f] sm:$0xff]  ;;  %1618 = vmatpush.bf16.msra.mxu0 %v5945_v61 }
 0x1be   : > { %v977_v17 = vadd.f32 %v976_v15, %v948_v11  ;;  %1014 = vst [vmem:[#allocation2 + $0x58] sm:$0xff] %v1006_v12  ;;  %v1040_v18 = vpack.c.bf16 %v1006_v12, %v1005_v59  ;;  %v5954_v59 = vld [vmem:[#allocation8 + $0x228] sm:$0xff]  ;;  %v5951_v11 = vld [vmem:[#allocation8 + $0x210] sm:$0xff] }
 0x1bf   : > { %v5950_v15 = vld [vmem:[#allocation8 + $0x208] sm:$0xff] }
 0x1c0   : > { %v987_v21 = vmax.f32 %v977_v17, 0.0  ;;  %1287 = vmatmul.bf16.gmra.mxu1 %v1040_v18  ;;  %1311 = vmatmul.bf16.gmra.mxu2 %v1038_v19  ;;  %v6977_v17 = vld [vmem:[#allocation9 + $0x1] ss:$0 sm:$0xff] }
 0x1c1   : > { %1619 = vmatpush.bf16.msra.mxu0 %v5944_v2 }
 0x1c2   : > { %v997_v25 = vmul.f32 %v6950_v58, %v987_v21  ;;  %v5949_v21 = vld [vmem:[#allocation8 + $0x200] sm:$0xff] }
 0x1c4   : > { %v1007_v29 = vadd.f32 %v6953_v0, %v997_v25  ;;  %v6980_v25 = vld [vmem:[#allocation11 + $0x1] ss:$0 sm:$0xff] }
 0x1c5   : > { %v1022_v30 = vld [vmem:[#allocation2 + $0x57] sm:$0xff]  ;;  %v978_v31 = vpop.f32.mrf.mxu3  ;;  %1620 = vmatpush.bf16.msra.mxu0 %v5943_v3 }
 0x1c6   : > { %v979_v47 = vadd.f32 %v978_v31, %v950_v28  ;;  %v1039_v33 = vpack.c.bf16 %v1022_v30, %v1021_v32  ;;  %1015 = vst [vmem:[#allocation2 + $0x60] sm:$0xff] %v1007_v29  ;;  %v1029_v37 = vld [vmem:[#allocation2 + $0x51] sm:$0xff] }
 0x1c7   : > { %v5979_v3 = vld [vmem:[#allocation8 + $0x270] sm:$0xff] }
 0x1c8   : > { %v988_v34 = vmax.f32 %v979_v47, 0.0  ;;  %1258 = vmatmul.bf16.gmra.mxu0 %v1039_v33 }
 0x1c9   : > { %1621 = vmatpush.bf16.msra.mxu0 %v5942_v6 }
 0x1ca   : > { %v998_v35 = vmul.f32 %v6950_v58, %v988_v34  ;;  %v5955_v58 = vld [vmem:[#allocation8 + $0x230] sm:$0xff] }
 0x1cb   : > { %1645 = vmatpush.bf16.msra.mxu1 %v5955_v58 }
 0x1cc   : > { %v1008_v36 = vadd.f32 %v6953_v0, %v998_v35  ;;  %v5937_v0 = vld [vmem:[#allocation8 + $0x1a0] sm:$0xff] }
 0x1cd   : > { %v1030_v38 = vld [vmem:[#allocation2 + $0x59] sm:$0xff]  ;;  %1589 = vmatpush.bf16.msrb.mxu3 %v5937_v0  ;;  %1622 = vmatpush.bf16.msra.mxu0 %v5941_v7 }
 0x1ce   : > { %1016 = vst [vmem:[#allocation2 + $0x68] sm:$0xff] %v1008_v36  ;;  %v1043_v40 = vpack.c.bf16 %v1008_v36, %v1007_v29  ;;  %v1041_v43 = vpack.c.bf16 %v1030_v38, %v1029_v37  ;;  %v1023_v46 = vld [vmem:[#allocation2 + $0x5f] sm:$0xff] }
 0x1cf   : > { %1646 = vmatpush.bf16.msra.mxu1 %v5954_v59  ;;  %v6983_v29 = vld [vmem:[#allocation12 + $0x1] ss:$0 sm:$0xff] }
 0x1d0   : > { %1292 = vmatmul.bf16.gmra.mxu1 %v1043_v40  ;;  %1316 = vmatmul.bf16.gmra.mxu2 %v1041_v43 }
 0x1d1   : > { %1590 = vmatpush.bf16.msrb.mxu3 %v5936_v60  ;;  %2115 = vmatpush.bf16.msrb.mxu0 %v5980_v56  ;;  %v5985_v56 = vld [vmem:[#allocation8 + $0x2a0] sm:$0xff] }
 0x1d3   : > { %1647 = vmatpush.bf16.msra.mxu1 %v5953_v1 }
 0x1d5   : > { %v1024_v45 = vld [vmem:[#allocation2 + $0x67] sm:$0xff]  ;;  %1591 = vmatpush.bf16.msrb.mxu3 %v5935_v4  ;;  %2116 = vmatpush.bf16.msrb.mxu0 %v5979_v3 }
 0x1d6   : > { %v1042_v48 = vpack.c.bf16 %v1024_v45, %v1023_v46  ;;  %v1031_v50 = vld [vmem:[#allocation2 + $0x61] sm:$0xff]  ;;  %v1032_v51 = vld [vmem:[#allocation2 + $0x69] sm:$0xff] }
 0x1d7   : > { %v1044_v53 = vpack.c.bf16 %v1032_v51, %v1031_v50  ;;  %1648 = vmatpush.bf16.msra.mxu1 %v5952_v5 }
 0x1d8   : > { %1263 = vmatmul.bf16.gmra.mxu0 %v1042_v48 }
 0x1d9   : > { %1592 = vmatpush.bf16.msrb.mxu3 %v5934_v10  ;;  %v5978_v10 = vld [vmem:[#allocation8 + $0x268] sm:$0xff] }
 0x1da   : > { %2117 = vmatpush.bf16.msrb.mxu0 %v5978_v10 }
 0x1db   : > { %1649 = vmatpush.bf16.msra.mxu1 %v5951_v11 }
 0x1dd   : > { %1593 = vmatpush.bf16.msrb.mxu3 %v5933_v14 }
 0x1df   : > { %1650 = vmatpush.bf16.msra.mxu1 %v5950_v15 }
 0x1e0   : > { %1321 = vmatmul.bf16.gmra.mxu2 %v1044_v53 }
 0x1e3   : > { %1651 = vmatpush.bf16.msra.mxu1 %v5949_v21 }
 0x21d   : > { %v1278_v9 = vpop.f32.mrf.mxu1 }
 0x225   : > { %v1249_v12 = vpop.f32.mrf.mxu0  ;;  %v1280_v18 = vpop.f32.mrf.mxu1 }
 0x226   : > { %v1250_v20 = vadd.f32 %v6977_v17, %v1249_v12  ;;  %v5977_v12 = vld [vmem:[#allocation8 + $0x260] sm:$0xff] }
 0x227   : > { %2118 = vmatpush.bf16.msrb.mxu0 %v5977_v12 }
 0x228   : > { %v1279_v22 = vadd.f32 %v1278_v9, %v1250_v20 }
 0x22d   : > { %v1251_v19 = vpop.f32.mrf.mxu0  ;;  %v1283_v30 = vpop.f32.mrf.mxu1 }
 0x22e   : > { %v1252_v27 = vadd.f32 %v6977_v17, %v1251_v19 }
 0x230   : > { %v1281_v47 = vadd.f32 %v1280_v18, %v1252_v27 }
 0x233   : > { %v1307_v23 = vpop.f32.mrf.mxu2 }
 0x234   : > { %v1308_v24 = vadd.f32 %v1307_v23, %v1279_v22 }
 0x235   : > { %v1254_v26 = vpop.f32.mrf.mxu0  ;;  %v1285_v40 = vpop.f32.mrf.mxu1 }
 0x236   : > { %v1327_v28 = vmax.f32 %v1308_v24, 0.0  ;;  %v1255_v36 = vadd.f32 %v6977_v17, %v1254_v26 }
 0x238   : > { %v1337_v31 = vmul.f32 %v6980_v25, %v1327_v28  ;;  %v1284_v45 = vadd.f32 %v1283_v30, %v1255_v36  ;;  %v5976_v28 = vld [vmem:[#allocation8 + $0x258] sm:$0xff] }
 0x239   : > { %v5988_v30 = vld [vmem:[#allocation8 + $0x2b8] sm:$0xff]  ;;  %2119 = vmatpush.bf16.msrb.mxu0 %v5976_v28 }
 0x23a   : > { %v1347_v32 = vadd.f32 %v6983_v29, %v1337_v31  ;;  %2144 = vmatpush.bf16.msrb.mxu1 %v5988_v30 }
 0x23b   : > { %v1309_v33 = vpop.f32.mrf.mxu2 }
 0x23c   : > { %1355 = vst [vmem:[#allocation2 + $0x10] sm:$0xff] %v1347_v32  ;;  %v1310_v34 = vadd.f32 %v1309_v33, %v1281_v47  ;;  %v5975_v33 = vld [vmem:[#allocation8 + $0x250] sm:$0xff] }
 0x23d   : > { %v1256_v35 = vpop.f32.mrf.mxu0  ;;  %v1288_v60 = vpop.f32.mrf.mxu1  ;;  %2120 = vmatpush.bf16.msrb.mxu0 %v5975_v33 }
 0x23e   : > { %v1328_v37 = vmax.f32 %v1310_v34, 0.0  ;;  %v1257_v53 = vadd.f32 %v6977_v17, %v1256_v35 }
 0x240   : > { %v1338_v38 = vmul.f32 %v6980_v25, %v1328_v37  ;;  %v1286_v0 = vadd.f32 %v1285_v40, %v1257_v53 }
 0x242   : > { %v1348_v43 = vadd.f32 %v6983_v29, %v1338_v38 }
 0x243   : > { %v1312_v46 = vpop.f32.mrf.mxu2  ;;  %v1363_v57 = vld [vmem:[#allocation2 + $0xf] sm:$0xff] }
 0x244   : > { %1356 = vst [vmem:[#allocation2 + $0x18] sm:$0xff] %v1348_v43  ;;  %v1313_v48 = vadd.f32 %v1312_v46, %v1284_v45  ;;  %v1380_v50 = vpack.c.bf16 %v1348_v43, %v1347_v32  ;;  %v5987_v32 = vld [vmem:[#allocation8 + $0x2b0] sm:$0xff] }
 0x245   : > { %v1259_v51 = vpop.f32.mrf.mxu0  ;;  %v1290_v24 = vpop.f32.mrf.mxu1  ;;  %2145 = vmatpush.bf16.msrb.mxu1 %v5987_v32 }
 0x246   : > { %v1329_v54 = vmax.f32 %v1313_v48, 0.0  ;;  %1623 = vmatmul.bf16.vlgmr.msra.gmra.mxu0 %v1380_v50  ;;  %v1260_v6 = vadd.f32 %v6977_v17, %v1259_v51  ;;  %v5974_v50 = vld [vmem:[#allocation8 + $0x248] sm:$0xff] }
 0x247   : > { %v5986_v51 = vld [vmem:[#allocation8 + $0x2a8] sm:$0xff]  ;;  %2121 = vmatpush.bf16.msrb.mxu0 %v5974_v50 }
 0x248   : > { %v1339_v58 = vmul.f32 %v6980_v25, %v1329_v54  ;;  %v1289_v14 = vadd.f32 %v1288_v60, %v1260_v6 }
 0x249   : > { %2146 = vmatpush.bf16.msrb.mxu1 %v5986_v51  ;;  %v5075_v51 = vld [vmem:[#allocation14 + $0x50] sm:$0xf] }
 0x24a   : > { %v1349_v59 = vadd.f32 %v6983_v29, %v1339_v58  ;;  %v5973_v58 = vld [vmem:[#allocation8 + $0x240] sm:$0xff] }
 0x24b   : > { %v1314_v61 = vpop.f32.mrf.mxu2  ;;  %v1364_v1 = vld [vmem:[#allocation2 + $0x17] sm:$0xff]  ;;  %2122 = vmatpush.bf16.msrb.mxu0 %v5973_v58 }
 0x24c   : > { %v1371_v2 = vld [vmem:[#allocation2 + $0x11] sm:$0xff]  ;;  %v1315_v4 = vadd.f32 %v1314_v61, %v1286_v0  ;;  %v1379_v5 = vpack.c.bf16 %v1364_v1, %v1363_v57  ;;  %1357 = vst [vmem:[#allocation2 + $0x20] sm:$0xff] %v1349_v59 }
 0x24d   : > { %1888 = vst [vmem:[#allocation2 + $0x10] sm:$0xff] %v6903_v39  ;;  %v1261_v9 = vpop.f32.mrf.mxu0  ;;  %v1293_v53 = vpop.f32.mrf.mxu1  ;;  %2147 = vmatpush.bf16.msrb.mxu1 %v5985_v56  ;;  %v5966_v58 = vld [vmem:[#allocation14 + $0x44] sm:$0xf0] }
 0x24e   : > { %v1330_v7 = vmax.f32 %v1315_v4, 0.0  ;;  %1594 = vmatmul.bf16.vlgmr.msrb.gmra.mxu3 %v1379_v5  ;;  %v1262_v26 = vadd.f32 %v6977_v17, %v1261_v9  ;;  %v5984_v5 = vld [vmem:[#allocation8 + $0x298] sm:$0xff] }
 0x250   : > { %v1340_v11 = vmul.f32 %v6980_v25, %v1330_v7  ;;  %v1291_v34 = vadd.f32 %v1290_v24, %v1262_v26  ;;  %v5983_v7 = vld [vmem:[#allocation8 + $0x290] sm:$0xff] }
 0x251   : > { %2148 = vmatpush.bf16.msrb.mxu1 %v5984_v5 }
 0x252   : > { %v1350_v15 = vadd.f32 %v6983_v29, %v1340_v11 }
 0x253   : > { %v1317_v18 = vpop.f32.mrf.mxu2  ;;  %v1372_v19 = vld [vmem:[#allocation2 + $0x19] sm:$0xff] }
 0x254   : > { %v1365_v20 = vld [vmem:[#allocation2 + $0x1f] sm:$0xff]  ;;  %v1318_v21 = vadd.f32 %v1317_v18, %v1289_v14  ;;  %1358 = vst [vmem:[#allocation2 + $0x28] sm:$0xff] %v1350_v15  ;;  %v1383_v22 = vpack.c.bf16 %v1350_v15, %v1349_v59  ;;  %v1381_v23 = vpack.c.bf16 %v1372_v19, %v1371_v2 }
 0x255   : > { %1889 = vst [vmem:[#allocation2 + $0x18] sm:$0xff] %v6906_v41  ;;  %v1264_v47 = vpop.f32.mrf.mxu0  ;;  %v1295_v9 = vpop.f32.mrf.mxu1  ;;  %2149 = vmatpush.bf16.msrb.mxu1 %v5983_v7  ;;  %v5085_v7 = vld [vmem:[#allocation14 + $0x68] sm:$0xf0] }
 0x256   : > { %v1331_v27 = vmax.f32 %v1318_v21, 0.0  ;;  %1628 = vmatmul.bf16.gmra.mxu0 %v1383_v22  ;;  %1652 = vmatmul.bf16.vlgmr.msra.gmra.mxu1 %v1381_v23  ;;  %v1265_v46 = vadd.f32 %v6977_v17, %v1264_v47  ;;  %v5981_v23 = vld [vmem:[#allocation8 + $0x280] sm:$0xff] }
 0x258   : > { %v1341_v31 = vmul.f32 %v6980_v25, %v1331_v27  ;;  %v1294_v0 = vadd.f32 %v1293_v53, %v1265_v46  ;;  %v5968_v53 = vld [vmem:[#allocation14 + $0x54] sm:$0xf0] }
 0x259   : > { %v5076_v56 = vor.u32 %v5968_v53, %v5075_v51 }
 0x25a   : > { %v1351_v35 = vadd.f32 %v6983_v29, %v1341_v31 }
 0x25b   : > { %v1319_v36 = vpop.f32.mrf.mxu2  ;;  %v1366_v37 = vld [vmem:[#allocation2 + $0x27] sm:$0xff] }
 0x25c   : > { %v1373_v38 = vld [vmem:[#allocation2 + $0x21] sm:$0xff]  ;;  %v1374_v40 = vld [vmem:[#allocation2 + $0x29] sm:$0xff]  ;;  %v1320_v43 = vadd.f32 %v1319_v36, %v1291_v34  ;;  %v1382_v45 = vpack.c.bf16 %v1366_v37, %v1365_v20  ;;  %1359 = vst [vmem:[#allocation2 + $0x50] sm:$0xff] %v1351_v35 }
 0x25d   : > { %1891 = vst [vmem:[#allocation2 + $0x28] sm:$0xff] %v6917_v49  ;;  %v1266_v59 = vpop.f32.mrf.mxu0  ;;  %v1384_v2 = vpack.c.bf16 %v1374_v40, %v1373_v38  ;;  %v5091_v36 = vld [vmem:[#allocation14 + $0x70] sm:$0xf]  ;;  %v5972_v37 = vld [vmem:[#allocation14 + $0x74] sm:$0xf0] }
 0x25e   : > { %v1332_v48 = vmax.f32 %v1320_v43, 0.0  ;;  %1599 = vmatmul.bf16.gmra.mxu3 %v1382_v45  ;;  %1890 = vst [vmem:[#allocation2 + $0x20] sm:$0xff] %v6914_v44  ;;  %v1267_v3 = vadd.f32 %v6977_v17, %v1266_v59  ;;  %v5982_v17 = vld [vmem:[#allocation8 + $0x288] sm:$0xff]  ;;  %v5083_v38 = vld [vmem:[#allocation14 + $0x60] sm:$0xf]  ;;  %v5092_v40 = vor.u32 %v5972_v37, %v5091_v36 }
 0x25f   : > { %2150 = vmatpush.bf16.msrb.mxu1 %v5982_v17  ;;  %v5970_v43 = vld [vmem:[#allocation14 + $0x64] sm:$0xf0]  ;;  %v5035_v36 = vld [vmem:[#allocation14] sm:$0xf] }
 0x260   : > { %v1342_v54 = vmul.f32 %v6980_v25, %v1332_v48  ;;  %v1296_v10 = vadd.f32 %v1295_v9, %v1267_v3  ;;  %1809 = vmatpush.bf16.msra.mxu2 %v5092_v40  ;;  %v5084_v45 = vor.u32 %v5970_v43, %v5083_v38  ;;  %v5971_v3 = vld [vmem:[#allocation14 + $0x74] sm:$0xf]  ;;  %v5958_v37 = vld [vmem:[#allocation14 + $0x4] sm:$0xf0]  ;;  %v5957_v38 = vld [vmem:[#allocation14 + $0x4] sm:$0xf] }
 0x261   : > { %v5036_v40 = vor.u32 %v5958_v37, %v5035_v36  ;;  %v5037_v43 = vld [vmem:[#allocation14 + $0x8] sm:$0xf0] }
 0x262   : > { %v1352_v57 = vadd.f32 %v6983_v29, %v1342_v54  ;;  %v5067_v54 = vld [vmem:[#allocation14 + $0x40] sm:$0xf] }
 0x263   : > { %v1322_v60 = vpop.f32.mrf.mxu2  ;;  %v1367_v14 = vld [vmem:[#allocation2 + $0x4f] sm:$0xff]  ;;  %2151 = vmatpush.bf16.msrb.mxu1 %v5981_v23 }
 0x264   : > { %v1323_v61 = vadd.f32 %v1322_v60, %v1294_v0  ;;  %1360 = vst [vmem:[#allocation2 + $0x58] sm:$0xff] %v1352_v57  ;;  %v1386_v1 = vpack.c.bf16 %v1352_v57, %v1351_v35  ;;  %1810 = vmatpush.bf16.msra.mxu2 %v5084_v45  ;;  %v5068_v0 = vor.u32 %v5966_v58, %v5067_v54  ;;  %v5995_v54 = vld [vmem:[#allocation8 + $0x2f0] sm:$0xff] }
 0x265   : > { %v1898_v46 = vld [vmem:[#allocation2 + $0x1f] sm:$0xff]  ;;  %v1899_v48 = vld [vmem:[#allocation2 + $0x27] sm:$0xff]  ;;  %v5040_v45 = vor.u32 %v5957_v38, %v5037_v43  ;;  %v5991_v38 = vld [vmem:[#allocation8 + $0x2d0] sm:$0xff] }
 0x266   : > { %v1333_v4 = vmax.f32 %v1323_v61, 0.0  ;;  %1633 = vmatmul.bf16.gmra.mxu0 %v1386_v1  ;;  %1657 = vmatmul.bf16.gmra.mxu1 %v1384_v2  ;;  %v1914_v50 = vpack.c.bf16 %v1899_v48, %v1898_v46  ;;  %v5059_v61 = vld [vmem:[#allocation14 + $0x30] sm:$0xf]  ;;  %v5964_v1 = vld [vmem:[#allocation14 + $0x34] sm:$0xf0]  ;;  %v5996_v46 = vld [vmem:[#allocation8 + $0x2f8] sm:$0xff] }
 0x267   : > { %v5060_v2 = vor.u32 %v5964_v1, %v5059_v61  ;;  %v7019_v48 = vld [vmem:[#allocation9 + $0x2] ss:$0 sm:$0xff]  ;;  %v7022_v61 = vld [vmem:[#allocation11 + $0x2] ss:$0 sm:$0xff] }
 0x268   : > { %v1343_v6 = vmul.f32 %v6980_v25, %v1333_v4  ;;  %1811 = vmatpush.bf16.msra.mxu2 %v5076_v56  ;;  %v5093_v4 = vld [vmem:[#allocation14 + $0x78] sm:$0xf0] }
 0x269   : > { %v5096_v5 = vor.u32 %v5971_v3, %v5093_v4  ;;  %v5994_v4 = vld [vmem:[#allocation8 + $0x2e8] sm:$0xff] }
 0x26a   : > { %v1353_v11 = vadd.f32 %v6983_v29, %v1343_v6  ;;  %v5969_v6 = vld [vmem:[#allocation14 + $0x64] sm:$0xf] }
 0x26b   : > { %v1324_v12 = vpop.f32.mrf.mxu2  ;;  %v1368_v15 = vld [vmem:[#allocation2 + $0x57] sm:$0xff]  ;;  %1838 = vmatpush.bf16.msra.mxu3 %v5096_v5  ;;  %v5088_v9 = vor.u32 %v5969_v6, %v5085_v7  ;;  %v7026_v6 = vld [vmem:[#allocation12 + $0x2] ss:$0 sm:$0xff] }
 0x26c   : > { %v1375_v18 = vld [vmem:[#allocation2 + $0x51] sm:$0xff]  ;;  %v1325_v19 = vadd.f32 %v1324_v12, %v1296_v10  ;;  %v1385_v20 = vpack.c.bf16 %v1368_v15, %v1367_v14  ;;  %1361 = vst [vmem:[#allocation2 + $0x60] sm:$0xff] %v1353_v11  ;;  %1812 = vmatpush.bf16.msra.mxu2 %v5068_v0  ;;  %v5967_v15 = vld [vmem:[#allocation14 + $0x54] sm:$0xf] }
 0x26d   : > { %1892 = vst [vmem:[#allocation2 + $0x50] sm:$0xff] %v6925_v55  ;;  %v5051_v12 = vld [vmem:[#allocation14 + $0x20] sm:$0xf]  ;;  %v5962_v14 = vld [vmem:[#allocation14 + $0x24] sm:$0xf0] }
 0x26e   : > { %v1334_v21 = vmax.f32 %v1325_v19, 0.0  ;;  %1604 = vmatmul.bf16.gmra.mxu3 %v1385_v20  ;;  %v5077_v19 = vld [vmem:[#allocation14 + $0x58] sm:$0xf0] }
 0x26f   : > { %1839 = vmatpush.bf16.msra.mxu3 %v5088_v9  ;;  %v5080_v17 = vor.u32 %v5967_v15, %v5077_v19  ;;  %v5993_v15 = vld [vmem:[#allocation8 + $0x2e0] sm:$0xff] }
 0x270   : > { %v1344_v22 = vmul.f32 %v6980_v25, %v1334_v21  ;;  %v1897_v25 = vld [vmem:[#allocation2 + $0x17] sm:$0xff]  ;;  %1813 = vmatpush.bf16.msra.mxu2 %v5060_v2 }
 0x271   : > { %v5965_v21 = vld [vmem:[#allocation14 + $0x44] sm:$0xf] }
 0x272   : > { %v1354_v24 = vadd.f32 %v6983_v29, %v1344_v22  ;;  %v1896_v29 = vld [vmem:[#allocation2 + $0xf] sm:$0xff]  ;;  %v5069_v22 = vld [vmem:[#allocation14 + $0x48] sm:$0xf0] }
 0x273   : > { %v1376_v26 = vld [vmem:[#allocation2 + $0x59] sm:$0xff]  ;;  %v1912_v35 = vpack.c.bf16 %v1897_v25, %v1896_v29  ;;  %1840 = vmatpush.bf16.msra.mxu3 %v5080_v17  ;;  %v5072_v23 = vor.u32 %v5965_v21, %v5069_v22  ;;  %v5959_v25 = vld [vmem:[#allocation14 + $0x14] sm:$0xf]  ;;  %v5045_v29 = vld [vmem:[#allocation14 + $0x18] sm:$0xf0] }
 0x274   : > { %v1369_v27 = vld [vmem:[#allocation2 + $0x5f] sm:$0xff]  ;;  %1362 = vst [vmem:[#allocation2 + $0x68] sm:$0xff] %v1354_v24  ;;  %v1389_v28 = vpack.c.bf16 %v1354_v24, %v1353_v11  ;;  %v1387_v30 = vpack.c.bf16 %v1376_v26, %v1375_v18  ;;  %v1900_v59 = vld [vmem:[#allocation2 + $0x4f] sm:$0xff]  ;;  %v5052_v18 = vor.u32 %v5962_v14, %v5051_v12 }
 0x275   : > { %1893 = vst [vmem:[#allocation2 + $0x58] sm:$0xff] %v6928_v62  ;;  %v5963_v24 = vld [vmem:[#allocation14 + $0x34] sm:$0xf]  ;;  %v5061_v26 = vld [vmem:[#allocation14 + $0x38] sm:$0xf0] }
 0x276   : > { %1638 = vmatmul.bf16.gmra.mxu0 %v1389_v28  ;;  %1662 = vmatmul.bf16.gmra.mxu1 %v1387_v30  ;;  %v5043_v28 = vld [vmem:[#allocation14 + $0x10] sm:$0xf]  ;;  %v5960_v30 = vld [vmem:[#allocation14 + $0x14] sm:$0xf0] }
 0x277   : > { %1814 = vmatpush.bf16.msra.mxu2 %v5052_v18  ;;  %1841 = vmatpush.bf16.msra.mxu3 %v5072_v23 }
 0x27b   : > { %v1370_v31 = vld [vmem:[#allocation2 + $0x67] sm:$0xff] }
 0x27c   : > { %v1377_v32 = vld [vmem:[#allocation2 + $0x61] sm:$0xff]  ;;  %v1378_v47 = vld [vmem:[#allocation2 + $0x69] sm:$0xff]  ;;  %v1388_v33 = vpack.c.bf16 %v1370_v31, %v1369_v27  ;;  %v1901_v57 = vld [vmem:[#allocation2 + $0x57] sm:$0xff]  ;;  %v5064_v27 = vor.u32 %v5963_v24, %v5061_v26 }
 0x27d   : > { %1895 = vst [vmem:[#allocation2 + $0x68] sm:$0xff] %v6939_v13  ;;  %v1390_v34 = vpack.c.bf16 %v1378_v47, %v1377_v32  ;;  %v1916_v60 = vpack.c.bf16 %v1901_v57, %v1900_v59  ;;  %v5961_v31 = vld [vmem:[#allocation14 + $0x24] sm:$0xf]  ;;  %v5044_v32 = vor.u32 %v5960_v30, %v5043_v28  ;;  %v5053_v47 = vld [vmem:[#allocation14 + $0x28] sm:$0xf0] }
 0x27e   : > { %1894 = vst [vmem:[#allocation2 + $0x60] sm:$0xff] %v6936_v8  ;;  %1609 = vmatmul.bf16.gmra.mxu3 %v1388_v33  ;;  %v5056_v33 = vor.u32 %v5961_v31, %v5053_v47 }
 0x27f   : > { %1842 = vmatpush.bf16.msra.mxu3 %v5064_v27  ;;  %1815 = vmatpush.bf16.msra.mxu2 %v5044_v32  ;;  %v5992_v32 = vld [vmem:[#allocation8 + $0x2d8] sm:$0xff] }
 0x283   : > { %1843 = vmatpush.bf16.msra.mxu3 %v5056_v33  ;;  %1816 = vmatpush.bf16.msra.mxu2 %v5036_v40 }
 0x285   : > { %v1902_v10 = vld [vmem:[#allocation2 + $0x5f] sm:$0xff]  ;;  %v1903_v11 = vld [vmem:[#allocation2 + $0x67] sm:$0xff] }
 0x286   : > { %1667 = vmatmul.bf16.gmra.mxu1 %v1390_v34  ;;  %2123 = vmatmul.bf16.vlgmr.msrb.gmra.mxu0 %v1912_v35  ;;  %v1918_v20 = vpack.c.bf16 %v1903_v11, %v1902_v10  ;;  %v5048_v34 = vor.u32 %v5959_v25, %v5045_v29 }
 0x287   : > { %2173 = vmatpush.bf16.msrb.mxu2 %v5996_v46 }
 0x288   : > { %1844 = vmatpush.bf16.msra.mxu3 %v5048_v34 }
 0x28b   : > { %2174 = vmatpush.bf16.msrb.mxu2 %v5995_v54 }
 0x28c   : > { %1845 = vmatpush.bf16.msra.mxu3 %v5040_v45 }
 0x28f   : > { %2175 = vmatpush.bf16.msrb.mxu2 %v5994_v4 }
 0x293   : > { %2176 = vmatpush.bf16.msrb.mxu2 %v5993_v15 }
 0x296   : > { %2128 = vmatmul.bf16.gmra.mxu0 %v1914_v50  ;;  %2152 = vmatmul.bf16.vlgmr.msrb.gmra.mxu1 %v6911_v42 }
 0x297   : > { %2177 = vmatpush.bf16.msrb.mxu2 %v5992_v32 }
 0x29b   : > { %2178 = vmatpush.bf16.msrb.mxu2 %v5991_v38  ;;  %v1907_v38 = vld [vmem:[#allocation2 + $0x29] sm:$0xff] }
 0x2a6   : > { %2133 = vmatmul.bf16.gmra.mxu0 %v1916_v60  ;;  %2157 = vmatmul.bf16.gmra.mxu1 %v6922_v52 }
 0x2b6   : > { %2138 = vmatmul.bf16.gmra.mxu0 %v1918_v20  ;;  %2162 = vmatmul.bf16.gmra.mxu1 %v6933_v63 }
 0x2c3   : > { %v1624_v35 = vpop.f32.mrf.mxu0 }
 0x2c6   : > { %2167 = vmatmul.bf16.gmra.mxu1 %v6944_v16 }
 0x2cb   : > { %v1626_v50 = vpop.f32.mrf.mxu0 }
 0x2d1   : > { %v1595_v51 = vpop.f32.mrf.mxu3 }
 0x2d2   : > { %v1596_v53 = vadd.f32 %v7019_v48, %v1595_v51 }
 0x2d3   : > { %v1653_v56 = vpop.f32.mrf.mxu1  ;;  %v1629_v57 = vpop.f32.mrf.mxu0 }
 0x2d4   : > { %v1625_v58 = vadd.f32 %v1624_v35, %v1596_v53 }
 0x2d6   : > { %v1654_v0 = vadd.f32 %v1653_v56, %v1625_v58 }
 0x2d8   : > { %v1673_v60 = vmax.f32 %v1654_v0, 0.0 }
 0x2d9   : > { %v1597_v59 = vpop.f32.mrf.mxu3 }
 0x2da   : > { %v1598_v1 = vadd.f32 %v7019_v48, %v1597_v59  ;;  %v1683_v5 = vmul.f32 %v7022_v61, %v1673_v60 }
 0x2db   : > { %v1655_v2 = vpop.f32.mrf.mxu1  ;;  %v1631_v18 = vpop.f32.mrf.mxu0 }
 0x2dc   : > { %v1627_v3 = vadd.f32 %v1626_v50, %v1598_v1  ;;  %v1693_v11 = vadd.f32 %v7026_v6, %v1683_v5  ;;  %v5989_v1 = vld [vmem:[#allocation8 + $0x2c0] sm:$0xff] }
 0x2de   : > { %v1656_v7 = vadd.f32 %v1655_v2, %v1627_v3  ;;  %v1701_v21 = vadd.f32 %v1693_v11, %v6903_v39 }
 0x2e0   : > { %v1674_v9 = vmax.f32 %v1656_v7, 0.0 }
 0x2e1   : > { %v1600_v10 = vpop.f32.mrf.mxu3 }
 0x2e2   : > { %v1684_v12 = vmul.f32 %v7022_v61, %v1674_v9  ;;  %v1601_v14 = vadd.f32 %v7019_v48, %v1600_v10 }
 0x2e3   : > { %v1658_v19 = vpop.f32.mrf.mxu1  ;;  %v1634_v47 = vpop.f32.mrf.mxu0 }
 0x2e4   : > { %v1694_v20 = vadd.f32 %v7026_v6, %v1684_v12  ;;  %v1630_v17 = vadd.f32 %v1629_v57, %v1601_v14  ;;  %v5990_v57 = vld [vmem:[#allocation8 + $0x2c8] sm:$0xff] }
 0x2e5   : > { %2179 = vmatpush.bf16.msrb.mxu2 %v5990_v57  ;;  %v6002_v57 = vld [vmem:[#allocation8 + $0x328] sm:$0xff] }
 0x2e6   : > { %v1702_v22 = vadd.f32 %v1694_v20, %v6906_v41  ;;  %v1659_v23 = vadd.f32 %v1658_v19, %v1630_v17 }
 0x2e8   : > { %v1709_v24 = vpack.c.bf16 %v1702_v22, %v1701_v21  ;;  %v1675_v27 = vmax.f32 %v1659_v23, 0.0 }
 0x2e9   : > { %v1602_v26 = vpop.f32.mrf.mxu3  ;;  %2180 = vmatpush.bf16.msrb.mxu2 %v5989_v1 }
 0x2ea   : > { %v1603_v28 = vadd.f32 %v7019_v48, %v1602_v26  ;;  %1817 = vmatmul.bf16.vlgmr.msra.gmra.mxu2 %v1709_v24  ;;  %1846 = vmatmul.bf16.vlgmr.msra.gmra.mxu3 %v1709_v24  ;;  %v1685_v33 = vmul.f32 %v7022_v61, %v1675_v27 }
 0x2eb   : > { %v1660_v30 = vpop.f32.mrf.mxu1  ;;  %v1636_v53 = vpop.f32.mrf.mxu0 }
 0x2ec   : > { %v1632_v31 = vadd.f32 %v1631_v18, %v1603_v28  ;;  %v1695_v35 = vadd.f32 %v7026_v6, %v1685_v33 }
 0x2ee   : > { %v1661_v25 = vadd.f32 %v1660_v30, %v1632_v31  ;;  %v1703_v50 = vadd.f32 %v1695_v35, %v6914_v44  ;;  %v1904_v35 = vld [vmem:[#allocation2 + $0x11] sm:$0xff] }
 0x2f0   : > { %v1676_v29 = vmax.f32 %v1661_v25, 0.0 }
 0x2f1   : > { %v1605_v34 = vpop.f32.mrf.mxu3 }
 0x2f2   : > { %v1686_v36 = vmul.f32 %v7022_v61, %v1676_v29  ;;  %v1606_v37 = vadd.f32 %v7019_v48, %v1605_v34  ;;  %v1905_v34 = vld [vmem:[#allocation2 + $0x19] sm:$0xff] }
 0x2f3   : > { %v1663_v40 = vpop.f32.mrf.mxu1  ;;  %v1639_v5 = vpop.f32.mrf.mxu0 }
 0x2f4   : > { %v1635_v43 = vadd.f32 %v1634_v47, %v1606_v37  ;;  %v1696_v45 = vadd.f32 %v7026_v6, %v1686_v36  ;;  %v1913_v36 = vpack.c.bf16 %v1905_v34, %v1904_v35  ;;  %v1906_v37 = vld [vmem:[#allocation2 + $0x21] sm:$0xff] }
 0x2f6   : > { %v1664_v46 = vadd.f32 %v1663_v40, %v1635_v43  ;;  %v1704_v51 = vadd.f32 %v1696_v45, %v6917_v49  ;;  %v1915_v40 = vpack.c.bf16 %v1907_v38, %v1906_v37  ;;  %v1909_v43 = vld [vmem:[#allocation2 + $0x59] sm:$0xff]  ;;  %v1908_v45 = vld [vmem:[#allocation2 + $0x51] sm:$0xff] }
 0x2f8   : > { %v1710_v54 = vpack.c.bf16 %v1704_v51, %v1703_v50  ;;  %v1677_v58 = vmax.f32 %v1664_v46, 0.0  ;;  %v1911_v46 = vld [vmem:[#allocation2 + $0x69] sm:$0xff]  ;;  %v6004_v51 = vld [vmem:[#allocation8 + $0x338] sm:$0xff] }
 0x2f9   : > { %v1607_v56 = vpop.f32.mrf.mxu3  ;;  %2461 = vmatpush.bf16.msrb.mxu3 %v6004_v51 }
 0x2fa   : > { %v1608_v0 = vadd.f32 %v7019_v48, %v1607_v56  ;;  %1822 = vmatmul.bf16.gmra.mxu2 %v1710_v54  ;;  %1851 = vmatmul.bf16.gmra.mxu3 %v1710_v54  ;;  %v1687_v2 = vmul.f32 %v7022_v61, %v1677_v58  ;;  %v6003_v54 = vld [vmem:[#allocation8 + $0x330] sm:$0xff]  ;;  %v6012_v56 = vld [vmem:[#allocation8 + $0x378] sm:$0xff] }
 0x2fb   : > { %v1665_v59 = vpop.f32.mrf.mxu1  ;;  %v1641_v24 = vpop.f32.mrf.mxu0  ;;  %v6020_v58 = vld [vmem:[#allocation8 + $0x3b8] sm:$0xff]  ;;  %2490 = vmatpush.bf16.msra.mxu0 %v6012_v56 }
 0x2fc   : > { %v1637_v60 = vadd.f32 %v1636_v53, %v1608_v0  ;;  %v1697_v9 = vadd.f32 %v7026_v6, %v1687_v2  ;;  %2519 = vmatpush.bf16.msra.mxu1 %v6020_v58  ;;  %v6001_v2 = vld [vmem:[#allocation8 + $0x320] sm:$0xff] }
 0x2fd   : > { %2462 = vmatpush.bf16.msrb.mxu3 %v6003_v54 }
 0x2fe   : > { %v1666_v3 = vadd.f32 %v1665_v59, %v1637_v60  ;;  %v1705_v19 = vadd.f32 %v1697_v9, %v6925_v55  ;;  %v6011_v59 = vld [vmem:[#allocation8 + $0x370] sm:$0xff]  ;;  %v6009_v9 = vld [vmem:[#allocation8 + $0x360] sm:$0xff] }
 0x2ff   : > { %v6019_v60 = vld [vmem:[#allocation8 + $0x3b0] sm:$0xff]  ;;  %2491 = vmatpush.bf16.msra.mxu0 %v6011_v59 }
 0x300   : > { %v1678_v4 = vmax.f32 %v1666_v3, 0.0  ;;  %2520 = vmatpush.bf16.msra.mxu1 %v6019_v60  ;;  %v6010_v3 = vld [vmem:[#allocation8 + $0x368] sm:$0xff] }
 0x301   : > { %v1610_v7 = vpop.f32.mrf.mxu3  ;;  %2463 = vmatpush.bf16.msrb.mxu3 %v6002_v57 }
 0x302   : > { %v1688_v10 = vmul.f32 %v7022_v61, %v1678_v4  ;;  %v1611_v11 = vadd.f32 %v7019_v48, %v1610_v7  ;;  %v6018_v4 = vld [vmem:[#allocation8 + $0x3a8] sm:$0xff]  ;;  %v6000_v7 = vld [vmem:[#allocation8 + $0x318] sm:$0xff] }
 0x303   : > { %v1668_v12 = vpop.f32.mrf.mxu1  ;;  %2492 = vmatpush.bf16.msra.mxu0 %v6010_v3 }
 0x304   : > { %v1640_v14 = vadd.f32 %v1639_v5, %v1611_v11  ;;  %v1698_v15 = vadd.f32 %v7026_v6, %v1688_v10  ;;  %2521 = vmatpush.bf16.msra.mxu1 %v6018_v4  ;;  %v6017_v10 = vld [vmem:[#allocation8 + $0x3a0] sm:$0xff] }
 0x305   : > { %2464 = vmatpush.bf16.msrb.mxu3 %v6001_v2 }
 0x306   : > { %v1669_v18 = vadd.f32 %v1668_v12, %v1640_v14  ;;  %v1706_v20 = vadd.f32 %v1698_v15, %v6928_v62  ;;  %v6008_v12 = vld [vmem:[#allocation8 + $0x358] sm:$0xff]  ;;  %v5999_v15 = vld [vmem:[#allocation8 + $0x310] sm:$0xff] }
 0x307   : > { %2493 = vmatpush.bf16.msra.mxu0 %v6009_v9 }
 0x308   : > { %v1711_v17 = vpack.c.bf16 %v1706_v20, %v1705_v19  ;;  %v1679_v22 = vmax.f32 %v1669_v18, 0.0  ;;  %2522 = vmatpush.bf16.msra.mxu1 %v6017_v10  ;;  %v6016_v18 = vld [vmem:[#allocation8 + $0x398] sm:$0xff]  ;;  %v6007_v19 = vld [vmem:[#allocation8 + $0x350] sm:$0xff]  ;;  %v2124_v20 = vpop.f32.mrf.mxu0 }
 0x309   : > { %v1612_v21 = vpop.f32.mrf.mxu3  ;;  %2465 = vmatpush.bf16.msrb.mxu3 %v6000_v7 }
 0x30a   : > { %v1613_v23 = vadd.f32 %v7019_v48, %v1612_v21  ;;  %1827 = vmatmul.bf16.gmra.mxu2 %v1711_v17  ;;  %1856 = vmatmul.bf16.gmra.mxu3 %v1711_v17  ;;  %v1689_v28 = vmul.f32 %v7022_v61, %v1679_v22  ;;  %v6006_v21 = vld [vmem:[#allocation8 + $0x348] sm:$0xff] }
 0x30b   : > { %v1670_v27 = vpop.f32.mrf.mxu1  ;;  %2494 = vmatpush.bf16.msra.mxu0 %v6008_v12 }
 0x30c   : > { %v1642_v26 = vadd.f32 %v1641_v24, %v1613_v23  ;;  %v1699_v32 = vadd.f32 %v7026_v6, %v1689_v28  ;;  %2523 = vmatpush.bf16.msra.mxu1 %v6016_v18  ;;  %v5998_v23 = vld [vmem:[#allocation8 + $0x308] sm:$0xff]  ;;  %v6015_v24 = vld [vmem:[#allocation8 + $0x390] sm:$0xff] }
 0x30d   : > { %2466 = vmatpush.bf16.msrb.mxu3 %v5999_v15 }
 0x30e   : > { %v1671_v30 = vadd.f32 %v1670_v27, %v1642_v26  ;;  %v1707_v25 = vadd.f32 %v1699_v32, %v6936_v8  ;;  %v6005_v26 = vld [vmem:[#allocation8 + $0x340] sm:$0xff] }
 0x30f   : > { %2495 = vmatpush.bf16.msra.mxu0 %v6007_v19  ;;  %v5997_v32 = vld [vmem:[#allocation8 + $0x300] sm:$0xff] }
 0x310   : > { %v1680_v31 = vmax.f32 %v1671_v30, 0.0  ;;  %2524 = vmatpush.bf16.msra.mxu1 %v6015_v24  ;;  %v2126_v27 = vpop.f32.mrf.mxu0 }
 0x311   : > { %2467 = vmatpush.bf16.msrb.mxu3 %v5998_v23 }
 0x312   : > { %v1690_v47 = vmul.f32 %v7022_v61, %v1680_v31  ;;  %v1917_v61 = vpack.c.bf16 %v1909_v43, %v1908_v45  ;;  %v7073_v31 = vld [vmem:[#allocation9 + $0x3] ss:$0 sm:$0xff] }
 0x313   : > { %v2153_v17 = vpop.f32.mrf.mxu1  ;;  %2496 = vmatpush.bf16.msra.mxu0 %v6006_v21  ;;  %v2127_v43 = vadd.f32 %v7073_v31, %v2126_v27 }
 0x314   : > { %v1700_v33 = vadd.f32 %v7026_v6, %v1690_v47  ;;  %v1910_v6 = vld [vmem:[#allocation2 + $0x61] sm:$0xff] }
 0x315   : > { %v1919_v50 = vpack.c.bf16 %v1911_v46, %v1910_v6  ;;  %v6014_v47 = vld [vmem:[#allocation8 + $0x388] sm:$0xff]  ;;  %2468 = vmatpush.bf16.msrb.mxu3 %v5997_v32 }
 0x316   : > { %v1708_v29 = vadd.f32 %v1700_v33, %v6939_v13  ;;  %2525 = vmatpush.bf16.msra.mxu1 %v6014_v47  ;;  %v2125_v33 = vadd.f32 %v7073_v31, %v2124_v20 }
 0x317   : > { %2497 = vmatpush.bf16.msra.mxu0 %v6005_v26 }
 0x318   : > { %v1712_v48 = vpack.c.bf16 %v1708_v29, %v1707_v25  ;;  %v6013_v25 = vld [vmem:[#allocation8 + $0x380] sm:$0xff]  ;;  %v2154_v29 = vadd.f32 %v2153_v17, %v2125_v33 }
 0x31a   : > { %1832 = vmatmul.bf16.gmra.mxu2 %v1712_v48  ;;  %1861 = vmatmul.bf16.gmra.mxu3 %v1712_v48  ;;  %v2129_v48 = vpop.f32.mrf.mxu0 }
 0x31b   : > { %v2155_v28 = vpop.f32.mrf.mxu1  ;;  %2526 = vmatpush.bf16.msra.mxu1 %v6013_v25  ;;  %v2130_v58 = vadd.f32 %v7073_v31, %v2129_v48 }
 0x322   : > { %v2131_v51 = vpop.f32.mrf.mxu0 }
 0x323   : > { %v2158_v37 = vpop.f32.mrf.mxu1  ;;  %v2132_v10 = vadd.f32 %v7073_v31, %v2131_v51 }
 0x324   : > { %v2159_v59 = vadd.f32 %v2158_v37, %v2130_v58 }
 0x32a   : > { %2181 = vmatmul.bf16.vlgmr.msrb.gmra.mxu2 %v1913_v36  ;;  %v7076_v36 = vld [vmem:[#allocation11 + $0x3] ss:$0 sm:$0xff]  ;;  %v2134_v9 = vpop.f32.mrf.mxu0 }
 0x32b   : > { %v2160_v56 = vpop.f32.mrf.mxu1  ;;  %v2135_v27 = vadd.f32 %v7073_v31, %v2134_v9 }
 0x32c   : > { %v2161_v18 = vadd.f32 %v2160_v56, %v2132_v10 }
 0x332   : > { %v2136_v32 = vpop.f32.mrf.mxu0 }
 0x333   : > { %v2163_v15 = vpop.f32.mrf.mxu1 }
 0x334   : > { %v2164_v47 = vadd.f32 %v2163_v15, %v2135_v27 }
 0x33a   : > { %2186 = vmatmul.bf16.gmra.mxu2 %v1915_v40  ;;  %v7078_v40 = vld [vmem:[#allocation12 + $0x3] ss:$0 sm:$0xff] }
 0x33b   : > { %v2165_v25 = vpop.f32.mrf.mxu1 }
 0x34a   : > { %2191 = vmatmul.bf16.gmra.mxu2 %v1917_v61  ;;  %v2156_v61 = vadd.f32 %v2155_v28, %v2127_v43 }
 0x35a   : > { %2196 = vmatmul.bf16.gmra.mxu2 %v1919_v50 }
 0x36d   : > { %v7057_v53 = vpop.f32.mrf.mxu2 }
 0x375   : > { %v7059_v0 = vpop.f32.mrf.mxu2 }
 0x37d   : > { %v7061_v1 = vpop.f32.mrf.mxu2 }
 0x385   : > { %v7063_v5 = vpop.f32.mrf.mxu2 }
 0x38d   : > { %v7065_v11 = vpop.f32.mrf.mxu2 }
 0x395   : > { %v7067_v14 = vpop.f32.mrf.mxu2 }
 0x39d   : > { %v7069_v22 = vpop.f32.mrf.mxu2 }
 0x3a5   : > { %v7071_v30 = vpop.f32.mrf.mxu2 }
 0x3ad   : > { %v2182_v34 = vpop.f32.mrf.mxu2 }
 0x3ae   : > { %v2183_v35 = vadd.f32 %v2182_v34, %v2154_v29 }
 0x3b0   : > { %v2202_v38 = vmax.f32 %v2183_v35, 0.0 }
 0x3b2   : > { %v2212_v45 = vmul.f32 %v7076_v36, %v2202_v38 }
 0x3b4   : > { %v2222_v6 = vadd.f32 %v7078_v40, %v2212_v45  ;;  %v2137_v45 = vadd.f32 %v7073_v31, %v2136_v32  ;;  %v6027_v32 = vld [vmem:[#allocation8 + $0x3f0] sm:$0xff] }
 0x3b5   : > { %v2184_v46 = vpop.f32.mrf.mxu2 }
 0x3b6   : > { %2230 = vst [vmem:[#allocation2 + $0x10] sm:$0xff] %v2222_v6  ;;  %v2185_v50 = vadd.f32 %v2184_v46, %v2156_v61 }
 0x3b8   : > { %v2203_v54 = vmax.f32 %v2185_v50, 0.0  ;;  %v2139_v50 = vpop.f32.mrf.mxu0 }
 0x3ba   : > { %v2213_v57 = vmul.f32 %v7076_v36, %v2203_v54 }
 0x3bc   : > { %v2223_v60 = vadd.f32 %v7078_v40, %v2213_v57 }
 0x3bd   : > { %v2187_v2 = vpop.f32.mrf.mxu2  ;;  %v2238_v17 = vld [vmem:[#allocation2 + $0xe] sm:$0xff] }
 0x3be   : > { %v2255_v3 = vpack.c.bf16 %v2223_v60, %v2222_v6  ;;  %2231 = vst [vmem:[#allocation2 + $0x18] sm:$0xff] %v2223_v60  ;;  %v2188_v4 = vadd.f32 %v2187_v2, %v2159_v59  ;;  %v2166_v6 = vadd.f32 %v2165_v25, %v2137_v45  ;;  %v2168_v59 = vpop.f32.mrf.mxu1  ;;  %v2140_v2 = vadd.f32 %v7073_v31, %v2139_v50 }
 0x3c0   : > { %v2204_v7 = vmax.f32 %v2188_v4, 0.0  ;;  %2498 = vmatmul.bf16.vlgmr.msra.gmra.mxu0 %v2255_v3  ;;  %v2169_v9 = vadd.f32 %v2168_v59, %v2140_v2  ;;  %v7103_v2 = vpop.f32.mrf.mxu3 }
 0x3c2   : > { %v2214_v12 = vmul.f32 %v7076_v36, %v2204_v7 }
 0x3c4   : > { %v2224_v19 = vadd.f32 %v7078_v40, %v2214_v12 }
 0x3c5   : > { %v2189_v20 = vpop.f32.mrf.mxu2  ;;  %v2239_v21 = vld [vmem:[#allocation2 + $0x16] sm:$0xff] }
 0x3c6   : > { %2232 = vst [vmem:[#allocation2 + $0x20] sm:$0xff] %v2224_v19  ;;  %v2190_v23 = vadd.f32 %v2189_v20, %v2161_v18  ;;  %v2254_v24 = vpack.c.bf16 %v2239_v21, %v2238_v17  ;;  %v2246_v48 = vld [vmem:[#allocation2 + $0x12] sm:$0xff]  ;;  %v2141_v20 = vpop.f32.mrf.mxu0 }
 0x3c7   : > { %v6028_v21 = vld [vmem:[#allocation8 + $0x3f8] sm:$0xff]  ;;  %v2142_v27 = vadd.f32 %v7073_v31, %v2141_v20  ;;  %v6026_v31 = vld [vmem:[#allocation8 + $0x3e8] sm:$0xff] }
 0x3c8   : > { %v2205_v26 = vmax.f32 %v2190_v23, 0.0  ;;  %2469 = vmatmul.bf16.vlgmr.msrb.gmra.mxu3 %v2254_v24  ;;  %v6036_v23 = vld [vmem:[#allocation8 + $0x438] sm:$0xff]  ;;  %v2170_v24 = vpop.f32.mrf.mxu1  ;;  %2801 = vmatpush.bf16.msra.mxu2 %v6028_v21  ;;  %v6031_v21 = vld [vmem:[#allocation8 + $0x410] sm:$0xff] }
 0x3c9   : > { %2830 = vmatpush.bf16.msra.mxu3 %v6036_v23  ;;  %v2171_v25 = vadd.f32 %v2170_v24, %v2142_v27  ;;  %v6040_v23 = vld [vmem:[#allocation8 + $0x458] sm:$0xff] }
 0x3ca   : > { %v2215_v28 = vmul.f32 %v7076_v36, %v2205_v26  ;;  %v6044_v26 = vld [vmem:[#allocation8 + $0x478] sm:$0xff] }
 0x3cb   : > { %2859 = vmatpush.bf16.msrb.mxu0 %v6044_v26  ;;  %v6030_v26 = vld [vmem:[#allocation8 + $0x408] sm:$0xff] }
 0x3cc   : > { %v2225_v33 = vadd.f32 %v7078_v40, %v2215_v28  ;;  %2802 = vmatpush.bf16.msra.mxu2 %v6027_v32  ;;  %v6039_v32 = vld [vmem:[#allocation8 + $0x450] sm:$0xff] }
 0x3cd   : > { %v2192_v29 = vpop.f32.mrf.mxu2  ;;  %v2247_v34 = vld [vmem:[#allocation2 + $0x1a] sm:$0xff] }
 0x3ce   : > { %v2193_v35 = vadd.f32 %v2192_v29, %v2164_v47  ;;  %v2258_v37 = vpack.c.bf16 %v2225_v33, %v2224_v19  ;;  %2233 = vst [vmem:[#allocation2 + $0x28] sm:$0xff] %v2225_v33  ;;  %v2256_v38 = vpack.c.bf16 %v2247_v34, %v2246_v48  ;;  %v2240_v54 = vld [vmem:[#allocation2 + $0x1e] sm:$0xff]  ;;  %v6035_v47 = vld [vmem:[#allocation8 + $0x430] sm:$0xff] }
 0x3cf   : > { %v6043_v33 = vld [vmem:[#allocation8 + $0x470] sm:$0xff]  ;;  %2831 = vmatpush.bf16.msra.mxu3 %v6035_v47  ;;  %v6029_v47 = vld [vmem:[#allocation8 + $0x400] sm:$0xff] }
 0x3d0   : > { %v2206_v43 = vmax.f32 %v2193_v35, 0.0  ;;  %2503 = vmatmul.bf16.gmra.mxu0 %v2258_v37  ;;  %2527 = vmatmul.bf16.vlgmr.msra.gmra.mxu1 %v2256_v38 }
 0x3d1   : > { %2860 = vmatpush.bf16.msrb.mxu0 %v6043_v33  ;;  %2803 = vmatpush.bf16.msra.mxu2 %v6026_v31 }
 0x3d2   : > { %v2216_v61 = vmul.f32 %v7076_v36, %v2206_v43  ;;  %v6034_v43 = vld [vmem:[#allocation8 + $0x428] sm:$0xff] }
 0x3d3   : > { %2832 = vmatpush.bf16.msra.mxu3 %v6034_v43 }
 0x3d4   : > { %v2226_v46 = vadd.f32 %v7078_v40, %v2216_v61 }
 0x3d5   : > { %v2194_v51 = vpop.f32.mrf.mxu2  ;;  %v2241_v56 = vld [vmem:[#allocation2 + $0x26] sm:$0xff] }
 0x3d6   : > { %2234 = vst [vmem:[#allocation2 + $0x50] sm:$0xff] %v2226_v46  ;;  %v2195_v58 = vadd.f32 %v2194_v51, %v2166_v6  ;;  %v2257_v57 = vpack.c.bf16 %v2241_v56, %v2240_v54  ;;  %v2248_v4 = vld [vmem:[#allocation2 + $0x22] sm:$0xff]  ;;  %v2249_v7 = vld [vmem:[#allocation2 + $0x2a] sm:$0xff] }
 0x3d7   : > { %v2259_v19 = vpack.c.bf16 %v2249_v7, %v2248_v4  ;;  %v6025_v7 = vld [vmem:[#allocation8 + $0x3e0] sm:$0xff] }
 0x3d8   : > { %v2207_v60 = vmax.f32 %v2195_v58, 0.0  ;;  %2474 = vmatmul.bf16.gmra.mxu3 %v2257_v57  ;;  %2804 = vmatpush.bf16.msra.mxu2 %v6025_v7 }
 0x3da   : > { %v2217_v3 = vmul.f32 %v7076_v36, %v2207_v60 }
 0x3dc   : > { %v2227_v10 = vadd.f32 %v7078_v40, %v2217_v3  ;;  %v7105_v3 = vpop.f32.mrf.mxu3 }
 0x3dd   : > { %v2197_v12 = vpop.f32.mrf.mxu2  ;;  %v2242_v34 = vld [vmem:[#allocation2 + $0x4e] sm:$0xff] }
 0x3de   : > { %v2198_v15 = vadd.f32 %v2197_v12, %v2169_v9  ;;  %v2261_v18 = vpack.c.bf16 %v2227_v10, %v2226_v46  ;;  %2235 = vst [vmem:[#allocation2 + $0x58] sm:$0xff] %v2227_v10  ;;  %v6033_v9 = vld [vmem:[#allocation8 + $0x420] sm:$0xff]  ;;  %v6042_v10 = vld [vmem:[#allocation8 + $0x468] sm:$0xff] }
 0x3df   : > { %2833 = vmatpush.bf16.msra.mxu3 %v6033_v9  ;;  %2861 = vmatpush.bf16.msrb.mxu0 %v6042_v10 }
 0x3e0   : > { %v2208_v17 = vmax.f32 %v2198_v15, 0.0  ;;  %2508 = vmatmul.bf16.gmra.mxu0 %v2261_v18  ;;  %2532 = vmatmul.bf16.gmra.mxu1 %v2259_v19  ;;  %v6024_v15 = vld [vmem:[#allocation8 + $0x3d8] sm:$0xff]  ;;  %v6041_v19 = vld [vmem:[#allocation8 + $0x460] sm:$0xff] }
 0x3e1   : > { %2805 = vmatpush.bf16.msra.mxu2 %v6024_v15  ;;  %v6032_v18 = vld [vmem:[#allocation8 + $0x418] sm:$0xff] }
 0x3e2   : > { %v2218_v28 = vmul.f32 %v7076_v36, %v2208_v17  ;;  %v6023_v17 = vld [vmem:[#allocation8 + $0x3d0] sm:$0xff] }
 0x3e3   : > { %2834 = vmatpush.bf16.msra.mxu3 %v6032_v18  ;;  %2862 = vmatpush.bf16.msrb.mxu0 %v6041_v19 }
 0x3e4   : > { %v2228_v29 = vadd.f32 %v7078_v40, %v2218_v28  ;;  %v6022_v28 = vld [vmem:[#allocation8 + $0x3c8] sm:$0xff] }
 0x3e5   : > { %v2199_v48 = vpop.f32.mrf.mxu2  ;;  %v2243_v35 = vld [vmem:[#allocation2 + $0x56] sm:$0xff]  ;;  %2806 = vmatpush.bf16.msra.mxu2 %v6023_v17 }
 0x3e6   : > { %2236 = vst [vmem:[#allocation2 + $0x60] sm:$0xff] %v2228_v29  ;;  %v2200_v37 = vadd.f32 %v2199_v48, %v2171_v25  ;;  %v2260_v38 = vpack.c.bf16 %v2243_v35, %v2242_v34  ;;  %v2250_v46 = vld [vmem:[#allocation2 + $0x52] sm:$0xff]  ;;  %v7119_v25 = vld [vmem:[#allocation9 + $0x4] ss:$0 sm:$0xff]  ;;  %v6038_v48 = vld [vmem:[#allocation8 + $0x448] sm:$0xff] }
 0x3e7   : > { %2835 = vmatpush.bf16.msra.mxu3 %v6031_v21  ;;  %2863 = vmatpush.bf16.msrb.mxu0 %v6040_v23 }
 0x3e8   : > { %v2209_v45 = vmax.f32 %v2200_v37, 0.0  ;;  %2479 = vmatmul.bf16.gmra.mxu3 %v2260_v38  ;;  %v6037_v38 = vld [vmem:[#allocation8 + $0x440] sm:$0xff] }
 0x3e9   : > { %2807 = vmatpush.bf16.msra.mxu2 %v6022_v28 }
 0x3ea   : > { %v2219_v61 = vmul.f32 %v7076_v36, %v2209_v45 }
 0x3eb   : > { %2836 = vmatpush.bf16.msra.mxu3 %v6030_v26  ;;  %2864 = vmatpush.bf16.msrb.mxu0 %v6039_v32 }
 0x3ec   : > { %v2229_v6 = vadd.f32 %v7078_v40, %v2219_v61  ;;  %v7107_v40 = vpop.f32.mrf.mxu3  ;;  %v7122_v61 = vld [vmem:[#allocation11 + $0x4] ss:$0 sm:$0xff] }
 0x3ed   : > { %v2251_v50 = vld [vmem:[#allocation2 + $0x5a] sm:$0xff] }
 0x3ee   : > { %v2264_v51 = vpack.c.bf16 %v2229_v6, %v2228_v29  ;;  %2237 = vst [vmem:[#allocation2 + $0x68] sm:$0xff] %v2229_v6  ;;  %v2262_v54 = vpack.c.bf16 %v2251_v50, %v2250_v46  ;;  %v2244_v56 = vld [vmem:[#allocation2 + $0x5e] sm:$0xff] }
 0x3ef   : > { %2837 = vmatpush.bf16.msra.mxu3 %v6029_v47  ;;  %v6021_v29 = vld [vmem:[#allocation8 + $0x3c0] sm:$0xff]  ;;  %2865 = vmatpush.bf16.msrb.mxu0 %v6038_v48 }
 0x3f0   : > { %2513 = vmatmul.bf16.gmra.mxu0 %v2264_v51  ;;  %2537 = vmatmul.bf16.gmra.mxu1 %v2262_v54  ;;  %v7124_v46 = vld [vmem:[#allocation12 + $0x4] ss:$0 sm:$0xff] }
 0x3f1   : > { %2808 = vmatpush.bf16.msra.mxu2 %v6021_v29  ;;  %v6068_v29 = vld [vmem:[#allocation8 + $0x4b8] sm:$0xff] }
 0x3f3   : > { %2866 = vmatpush.bf16.msrb.mxu0 %v6037_v38  ;;  %3326 = vmatpush.bf16.msrb.mxu3 %v6068_v29 }
 0x3f4   : > { %v7109_v4 = vpop.f32.mrf.mxu3 }
 0x3f5   : > { %v2245_v58 = vld [vmem:[#allocation2 + $0x66] sm:$0xff] }
 0x3f6   : > { %v2263_v57 = vpack.c.bf16 %v2245_v58, %v2244_v56  ;;  %v2252_v59 = vld [vmem:[#allocation2 + $0x62] sm:$0xff]  ;;  %v2253_v60 = vld [vmem:[#allocation2 + $0x6a] sm:$0xff] }
 0x3f7   : > { %v2265_v36 = vpack.c.bf16 %v2253_v60, %v2252_v59 }
 0x3f8   : > { %2484 = vmatmul.bf16.gmra.mxu3 %v2263_v57 }
 0x3fc   : > { %v7111_v12 = vpop.f32.mrf.mxu3 }
 0x400   : > { %2542 = vmatmul.bf16.gmra.mxu1 %v2265_v36 }
 0x404   : > { %v7113_v20 = vpop.f32.mrf.mxu3 }
 0x40c   : > { %v7115_v24 = vpop.f32.mrf.mxu3 }
 0x414   : > { %v7117_v33 = vpop.f32.mrf.mxu3 }
 0x43d   : > { %v2499_v27 = vpop.f32.mrf.mxu0 }
 0x445   : > { %v2501_v34 = vpop.f32.mrf.mxu0 }
 0x44b   : > { %v2470_v35 = vpop.f32.mrf.mxu3 }
 0x44c   : > { %v2471_v37 = vadd.f32 %v7119_v25, %v2470_v35 }
 0x44d   : > { %v2528_v31 = vpop.f32.mrf.mxu1  ;;  %v2504_v50 = vpop.f32.mrf.mxu0 }
 0x44e   : > { %v2500_v43 = vadd.f32 %v2499_v27, %v2471_v37 }
 0x450   : > { %v2529_v45 = vadd.f32 %v2528_v31, %v2500_v43 }
 0x452   : > { %v2548_v6 = vmax.f32 %v2529_v45, 0.0  ;;  %v6067_v45 = vld [vmem:[#allocation8 + $0x4b0] sm:$0xff] }
 0x453   : > { %v2472_v51 = vpop.f32.mrf.mxu3  ;;  %3327 = vmatpush.bf16.msrb.mxu3 %v6067_v45 }
 0x454   : > { %v2558_v54 = vmul.f32 %v7122_v61, %v2548_v6  ;;  %v2473_v56 = vadd.f32 %v7119_v25, %v2472_v51 }
 0x455   : > { %v2530_v58 = vpop.f32.mrf.mxu1  ;;  %v2506_v15 = vpop.f32.mrf.mxu0 }
 0x456   : > { %v2568_v57 = vadd.f32 %v7124_v46, %v2558_v54  ;;  %v2502_v59 = vadd.f32 %v2501_v34, %v2473_v56  ;;  %v6066_v56 = vld [vmem:[#allocation8 + $0x4a8] sm:$0xff] }
 0x457   : > { %3328 = vmatpush.bf16.msrb.mxu3 %v6066_v56 }
 0x458   : > { %2576 = vst [vmem:[#allocation2 + $0x10] sm:$0xff] %v2568_v57  ;;  %v2531_v60 = vadd.f32 %v2530_v58, %v2502_v59 }
 0x45a   : > { %v2549_v36 = vmax.f32 %v2531_v60, 0.0 }
 0x45b   : > { %v2475_v7 = vpop.f32.mrf.mxu3 }
 0x45c   : > { %v2559_v9 = vmul.f32 %v7122_v61, %v2549_v36  ;;  %v2476_v10 = vadd.f32 %v7119_v25, %v2475_v7  ;;  %v6065_v36 = vld [vmem:[#allocation8 + $0x4a0] sm:$0xff] }
 0x45d   : > { %v2533_v18 = vpop.f32.mrf.mxu1  ;;  %v2509_v35 = vpop.f32.mrf.mxu0  ;;  %3329 = vmatpush.bf16.msrb.mxu3 %v6065_v36 }
 0x45e   : > { %v2569_v19 = vadd.f32 %v7124_v46, %v2559_v9  ;;  %v2505_v17 = vadd.f32 %v2504_v50, %v2476_v10 }
 0x45f   : > { %v2584_v37 = vld [vmem:[#allocation2 + $0xc] sm:$0xff] }
 0x460   : > { %v2595_v21 = vpack.c.bf16 %v2569_v19, %v2568_v57  ;;  %2577 = vst [vmem:[#allocation2 + $0x18] sm:$0xff] %v2569_v19  ;;  %v2534_v23 = vadd.f32 %v2533_v18, %v2505_v17  ;;  %v6076_v19 = vld [vmem:[#allocation8 + $0x4f8] sm:$0xff] }
 0x461   : > { %3355 = vmatpush.bf16.msra.mxu0 %v6076_v19 }
 0x462   : > { %v2550_v26 = vmax.f32 %v2534_v23, 0.0  ;;  %2838 = vmatmul.bf16.vlgmr.msra.gmra.mxu3 %v2595_v21  ;;  %v6064_v21 = vld [vmem:[#allocation8 + $0x498] sm:$0xff] }
 0x463   : > { %v2477_v27 = vpop.f32.mrf.mxu3  ;;  %3330 = vmatpush.bf16.msrb.mxu3 %v6064_v21 }
 0x464   : > { %v2560_v28 = vmul.f32 %v7122_v61, %v2550_v26  ;;  %v2478_v32 = vadd.f32 %v7119_v25, %v2477_v27  ;;  %v6075_v27 = vld [vmem:[#allocation8 + $0x4f0] sm:$0xff] }
 0x465   : > { %v2535_v47 = vpop.f32.mrf.mxu1  ;;  %3356 = vmatpush.bf16.msra.mxu0 %v6075_v27 }
 0x466   : > { %v2570_v48 = vadd.f32 %v7124_v46, %v2560_v28  ;;  %v2507_v34 = vadd.f32 %v2506_v15, %v2478_v32  ;;  %v2511_v15 = vpop.f32.mrf.mxu0 }
 0x467   : > { %v2585_v38 = vld [vmem:[#allocation2 + $0x14] sm:$0xff] }
 0x468   : > { %2578 = vst [vmem:[#allocation2 + $0x20] sm:$0xff] %v2570_v48  ;;  %v2536_v31 = vadd.f32 %v2535_v47, %v2507_v34  ;;  %v2594_v43 = vpack.c.bf16 %v2585_v38, %v2584_v37  ;;  %v6063_v34 = vld [vmem:[#allocation8 + $0x490] sm:$0xff] }
 0x469   : > { %3099 = vst [vmem:[#allocation2 + $0x10] sm:$0xff] %v6903_v39  ;;  %3331 = vmatpush.bf16.msrb.mxu3 %v6063_v34 }
 0x46a   : > { %v2551_v6 = vmax.f32 %v2536_v31, 0.0  ;;  %2809 = vmatmul.bf16.vlgmr.msra.gmra.mxu2 %v2594_v43  ;;  %v6074_v31 = vld [vmem:[#allocation8 + $0x4e8] sm:$0xff] }
 0x46b   : > { %v2480_v50 = vpop.f32.mrf.mxu3  ;;  %3357 = vmatpush.bf16.msra.mxu0 %v6074_v31 }
 0x46c   : > { %v2561_v51 = vmul.f32 %v7122_v61, %v2551_v6  ;;  %v2481_v54 = vadd.f32 %v7119_v25, %v2480_v50  ;;  %v6062_v6 = vld [vmem:[#allocation8 + $0x488] sm:$0xff] }
 0x46d   : > { %v2538_v58 = vpop.f32.mrf.mxu1  ;;  %3332 = vmatpush.bf16.msrb.mxu3 %v6062_v6 }
 0x46e   : > { %v2510_v57 = vadd.f32 %v2509_v35, %v2481_v54  ;;  %v2571_v59 = vadd.f32 %v7124_v46, %v2561_v51  ;;  %v2514_v43 = vpop.f32.mrf.mxu0  ;;  %v6073_v54 = vld [vmem:[#allocation8 + $0x4e0] sm:$0xff] }
 0x46f   : > { %v2586_v60 = vld [vmem:[#allocation2 + $0x1c] sm:$0xff]  ;;  %3358 = vmatpush.bf16.msra.mxu0 %v6073_v54 }
 0x470   : > { %v2539_v7 = vadd.f32 %v2538_v58, %v2510_v57  ;;  %v2598_v9 = vpack.c.bf16 %v2571_v59, %v2570_v48  ;;  %2579 = vst [vmem:[#allocation2 + $0x28] sm:$0xff] %v2571_v59  ;;  %v2596_v10 = vpack.c.bf16 %v2586_v60, %v2585_v38  ;;  %v6061_v59 = vld [vmem:[#allocation8 + $0x480] sm:$0xff] }
 0x471   : > { %3100 = vst [vmem:[#allocation2 + $0x18] sm:$0xff] %v6906_v41  ;;  %3333 = vmatpush.bf16.msrb.mxu3 %v6061_v59 }
 0x472   : > { %v2552_v18 = vmax.f32 %v2539_v7, 0.0  ;;  %2843 = vmatmul.bf16.gmra.mxu3 %v2598_v9  ;;  %2867 = vmatmul.bf16.vlgmr.msrb.gmra.mxu0 %v2596_v10  ;;  %v6072_v10 = vld [vmem:[#allocation8 + $0x4d8] sm:$0xff] }
 0x473   : > { %v2482_v17 = vpop.f32.mrf.mxu3  ;;  %3359 = vmatpush.bf16.msra.mxu0 %v6072_v10 }
 0x474   : > { %v2562_v23 = vmul.f32 %v7122_v61, %v2552_v18  ;;  %v2483_v26 = vadd.f32 %v7119_v25, %v2482_v17  ;;  %v6071_v17 = vld [vmem:[#allocation8 + $0x4d0] sm:$0xff] }
 0x475   : > { %v2540_v28 = vpop.f32.mrf.mxu1 }
 0x476   : > { %v2572_v32 = vadd.f32 %v7124_v46, %v2562_v23  ;;  %v2512_v47 = vadd.f32 %v2511_v15, %v2483_v26  ;;  %v2516_v21 = vpop.f32.mrf.mxu0 }
 0x477   : > { %v2587_v29 = vld [vmem:[#allocation2 + $0x24] sm:$0xff]  ;;  %v2592_v48 = vld [vmem:[#allocation2 + $0x2c] sm:$0xff]  ;;  %3360 = vmatpush.bf16.msra.mxu0 %v6071_v17 }
 0x478   : > { %2580 = vst [vmem:[#allocation2 + $0x50] sm:$0xff] %v2572_v32  ;;  %v2541_v35 = vadd.f32 %v2540_v28, %v2512_v47  ;;  %v2597_v37 = vpack.c.bf16 %v2587_v29, %v2586_v60  ;;  %v2599_v7 = vpack.c.bf16 %v2592_v48, %v2587_v29  ;;  %v6070_v48 = vld [vmem:[#allocation8 + $0x4c8] sm:$0xff] }
 0x479   : > { %3101 = vst [vmem:[#allocation2 + $0x20] sm:$0xff] %v6914_v44 }
 0x47a   : > { %v2553_v38 = vmax.f32 %v2541_v35, 0.0  ;;  %2814 = vmatmul.bf16.gmra.mxu2 %v2597_v37  ;;  %3102 = vst [vmem:[#allocation2 + $0x28] sm:$0xff] %v6917_v49  ;;  %v6069_v35 = vld [vmem:[#allocation8 + $0x4c0] sm:$0xff] }
 0x47b   : > { %v2485_v45 = vpop.f32.mrf.mxu3  ;;  %3361 = vmatpush.bf16.msra.mxu0 %v6070_v48 }
 0x47c   : > { %v2563_v50 = vmul.f32 %v7122_v61, %v2553_v38  ;;  %v2486_v51 = vadd.f32 %v7119_v25, %v2485_v45 }
 0x47d   : > { %v2543_v56 = vpop.f32.mrf.mxu1 }
 0x47e   : > { %v2515_v58 = vadd.f32 %v2514_v43, %v2486_v51  ;;  %v2573_v57 = vadd.f32 %v7124_v46, %v2563_v50  ;;  %v3107_v51 = vld [vmem:[#allocation2 + $0xf] sm:$0xff] }
 0x47f   : > { %v2588_v28 = vld [vmem:[#allocation2 + $0x4c] sm:$0xff]  ;;  %3362 = vmatpush.bf16.msra.mxu0 %v6069_v35 }
 0x480   : > { %v2544_v60 = vadd.f32 %v2543_v56, %v2515_v58  ;;  %v2601_v36 = vpack.c.bf16 %v2573_v57, %v2572_v32  ;;  %2581 = vst [vmem:[#allocation2 + $0x58] sm:$0xff] %v2573_v57  ;;  %v5443_v56 = vld [vmem:[#allocation14 + $0xf0] sm:$0xf]  ;;  %v6060_v58 = vld [vmem:[#allocation14 + $0xf4] sm:$0xf0] }
 0x481   : > { %v5435_v57 = vld [vmem:[#allocation14 + $0xe0] sm:$0xf]  ;;  %v5444_v59 = vor.u32 %v6060_v58, %v5443_v56  ;;  %v6051_v58 = vld [vmem:[#allocation14 + $0xb4] sm:$0xf] }
 0x482   : > { %v2554_v9 = vmax.f32 %v2544_v60, 0.0  ;;  %2848 = vmatmul.bf16.gmra.mxu3 %v2601_v36  ;;  %2872 = vmatmul.bf16.gmra.mxu0 %v2599_v7  ;;  %v6058_v60 = vld [vmem:[#allocation14 + $0xe4] sm:$0xf0]  ;;  %v3109_v7 = vld [vmem:[#allocation2 + $0x1f] sm:$0xff] }
 0x483   : > { %v2487_v15 = vpop.f32.mrf.mxu3  ;;  %3025 = vmatpush.bf16.msrb.mxu1 %v5444_v59  ;;  %v5436_v36 = vor.u32 %v6058_v60, %v5435_v57  ;;  %v5413_v57 = vld [vmem:[#allocation14 + $0xb8] sm:$0xf0]  ;;  %v5395_v60 = vld [vmem:[#allocation14 + $0x90] sm:$0xf] }
 0x484   : > { %v2564_v18 = vmul.f32 %v7122_v61, %v2554_v9  ;;  %v2488_v19 = vadd.f32 %v7119_v25, %v2487_v15  ;;  %v3110_v9 = vld [vmem:[#allocation2 + $0x27] sm:$0xff]  ;;  %v5427_v15 = vld [vmem:[#allocation14 + $0xd0] sm:$0xf]  ;;  %v5416_v59 = vor.u32 %v6051_v58, %v5413_v57 }
 0x485   : > { %v2545_v27 = vpop.f32.mrf.mxu1  ;;  %v3125_v10 = vpack.c.bf16 %v3110_v9, %v3109_v7  ;;  %v6049_v9 = vld [vmem:[#allocation14 + $0xa4] sm:$0xf] }
 0x486   : > { %v2574_v23 = vadd.f32 %v7124_v46, %v2564_v18  ;;  %v2517_v26 = vadd.f32 %v2516_v21, %v2488_v19  ;;  %v6056_v18 = vld [vmem:[#allocation14 + $0xd4] sm:$0xf0]  ;;  %v5419_v19 = vld [vmem:[#allocation14 + $0xc0] sm:$0xf]  ;;  %v6054_v21 = vld [vmem:[#allocation14 + $0xc4] sm:$0xf0] }
 0x487   : > { %v2589_v32 = vld [vmem:[#allocation2 + $0x54] sm:$0xff]  ;;  %3026 = vmatpush.bf16.msrb.mxu1 %v5436_v36  ;;  %v5428_v17 = vor.u32 %v6056_v18, %v5427_v15  ;;  %v6048_v36 = vld [vmem:[#allocation14 + $0x94] sm:$0xf0]  ;;  %v6047_v18 = vld [vmem:[#allocation14 + $0x94] sm:$0xf] }
 0x488   : > { %2582 = vst [vmem:[#allocation2 + $0x60] sm:$0xff] %v2574_v23  ;;  %v2546_v47 = vadd.f32 %v2545_v27, %v2517_v26  ;;  %v2600_v29 = vpack.c.bf16 %v2589_v32, %v2588_v28  ;;  %v5396_v7 = vor.u32 %v6048_v36, %v5395_v60 }
 0x489   : > { %3103 = vst [vmem:[#allocation2 + $0x50] sm:$0xff] %v6925_v55 }
 0x48a   : > { %v2555_v34 = vmax.f32 %v2546_v47, 0.0  ;;  %2819 = vmatmul.bf16.gmra.mxu2 %v2600_v29  ;;  %v6052_v47 = vld [vmem:[#allocation14 + $0xb4] sm:$0xf0]  ;;  %v6059_v29 = vld [vmem:[#allocation14 + $0xf4] sm:$0xf] }
 0x48b   : > { %3027 = vmatpush.bf16.msrb.mxu1 %v5428_v17  ;;  %v5387_v17 = vld [vmem:[#allocation14 + $0x80] sm:$0xf] }
 0x48c   : > { %v2565_v25 = vmul.f32 %v7122_v61, %v2555_v34  ;;  %v3108_v61 = vld [vmem:[#allocation2 + $0x17] sm:$0xff]  ;;  %v5445_v34 = vld [vmem:[#allocation14 + $0xf8] sm:$0xf0] }
 0x48d   : > { %v3123_v54 = vpack.c.bf16 %v3108_v61, %v3107_v51  ;;  %v5448_v35 = vor.u32 %v6059_v29, %v5445_v34  ;;  %v6055_v61 = vld [vmem:[#allocation14 + $0xd4] sm:$0xf] }
 0x48e   : > { %v2575_v37 = vadd.f32 %v7124_v46, %v2565_v25  ;;  %v5437_v25 = vld [vmem:[#allocation14 + $0xe8] sm:$0xf0]  ;;  %v7161_v29 = vld [vmem:[#allocation9 + $0x5] ss:$0 sm:$0xff] }
 0x48f   : > { %v2590_v38 = vld [vmem:[#allocation2 + $0x5c] sm:$0xff]  ;;  %3054 = vmatpush.bf16.msrb.mxu2 %v5448_v35  ;;  %v6083_v35 = vld [vmem:[#allocation8 + $0x530] sm:$0xff] }
 0x490   : > { %v2604_v31 = vpack.c.bf16 %v2575_v37, %v2574_v23  ;;  %2583 = vst [vmem:[#allocation2 + $0x68] sm:$0xff] %v2575_v37  ;;  %v2602_v43 = vpack.c.bf16 %v2590_v38, %v2589_v32  ;;  %v5420_v23 = vor.u32 %v6054_v21, %v5419_v19  ;;  %v3111_v27 = vld [vmem:[#allocation2 + $0x4f] sm:$0xff]  ;;  %v5411_v32 = vld [vmem:[#allocation14 + $0xb0] sm:$0xf]  ;;  %v6046_v21 = vld [vmem:[#allocation14 + $0x84] sm:$0xf0] }
 0x491   : > { %3104 = vst [vmem:[#allocation2 + $0x58] sm:$0xff] %v6928_v62  ;;  %v5412_v48 = vor.u32 %v6052_v47, %v5411_v32  ;;  %v5397_v19 = vld [vmem:[#allocation14 + $0x98] sm:$0xf0]  ;;  %v6084_v47 = vld [vmem:[#allocation8 + $0x538] sm:$0xff] }
 0x492   : > { %2853 = vmatmul.bf16.gmra.mxu3 %v2604_v31  ;;  %2877 = vmatmul.bf16.gmra.mxu0 %v2602_v43  ;;  %v5403_v43 = vld [vmem:[#allocation14 + $0xa0] sm:$0xf] }
 0x493   : > { %3028 = vmatpush.bf16.msrb.mxu1 %v5420_v23  ;;  %v6045_v23 = vld [vmem:[#allocation14 + $0x84] sm:$0xf] }
 0x497   : > { %v2591_v45 = vld [vmem:[#allocation2 + $0x64] sm:$0xff]  ;;  %v2593_v6 = vld [vmem:[#allocation2 + $0x6c] sm:$0xff]  ;;  %3029 = vmatpush.bf16.msrb.mxu1 %v5412_v48 }
 0x498   : > { %v2603_v50 = vpack.c.bf16 %v2591_v45, %v2590_v38  ;;  %3105 = vst [vmem:[#allocation2 + $0x60] sm:$0xff] %v6936_v8  ;;  %v2605_v46 = vpack.c.bf16 %v2593_v6, %v2591_v45  ;;  %v3112_v26 = vld [vmem:[#allocation2 + $0x57] sm:$0xff] }
 0x499   : > { %3106 = vst [vmem:[#allocation2 + $0x68] sm:$0xff] %v6939_v13  ;;  %v3127_v28 = vpack.c.bf16 %v3112_v26, %v3111_v27  ;;  %v6050_v45 = vld [vmem:[#allocation14 + $0xa4] sm:$0xf0]  ;;  %v5388_v27 = vor.u32 %v6046_v21, %v5387_v17 }
 0x49a   : > { %2824 = vmatmul.bf16.gmra.mxu2 %v2603_v50  ;;  %v5404_v6 = vor.u32 %v6050_v45, %v5403_v43  ;;  %v7164_v45 = vld [vmem:[#allocation11 + $0x5] ss:$0 sm:$0xff] }
 0x49c   : > { %3030 = vmatpush.bf16.msrb.mxu1 %v5404_v6 }
 0x49f   : > { %v3113_v38 = vld [vmem:[#allocation2 + $0x5f] sm:$0xff] }
 0x4a0   : > { %v3114_v31 = vld [vmem:[#allocation2 + $0x67] sm:$0xff]  ;;  %3031 = vmatpush.bf16.msrb.mxu1 %v5396_v7 }
 0x4a1   : > { %v3129_v50 = vpack.c.bf16 %v3114_v31, %v3113_v38 }
 0x4a2   : > { %2882 = vmatmul.bf16.gmra.mxu0 %v2605_v46  ;;  %3334 = vmatmul.bf16.vlgmr.msrb.gmra.mxu3 %v3123_v54  ;;  %v6053_v46 = vld [vmem:[#allocation14 + $0xc4] sm:$0xf]  ;;  %v5421_v54 = vld [vmem:[#allocation14 + $0xc8] sm:$0xf0] }
 0x4a3   : > { %v5424_v56 = vor.u32 %v6053_v46, %v5421_v54  ;;  %v7168_v46 = vld [vmem:[#allocation12 + $0x5] ss:$0 sm:$0xff] }
 0x4a4   : > { %3032 = vmatpush.bf16.msrb.mxu1 %v5388_v27 }
 0x4a8   : > { %3384 = vmatpush.bf16.msra.mxu1 %v6084_v47 }
 0x4ac   : > { %3385 = vmatpush.bf16.msra.mxu1 %v6083_v35 }
 0x4b2   : > { %3339 = vmatmul.bf16.gmra.mxu3 %v3125_v10  ;;  %3363 = vmatmul.bf16.vlgmr.msra.gmra.mxu0 %v6911_v42  ;;  %v6057_v42 = vld [vmem:[#allocation14 + $0xe4] sm:$0xf]  ;;  %v5405_v10 = vld [vmem:[#allocation14 + $0xa8] sm:$0xf0] }
 0x4b3   : > { %v5440_v37 = vor.u32 %v6057_v42, %v5437_v25  ;;  %v5408_v15 = vor.u32 %v6049_v9, %v5405_v10 }
 0x4b5   : > { %3055 = vmatpush.bf16.msrb.mxu2 %v5440_v37 }
 0x4c2   : > { %3344 = vmatmul.bf16.gmra.mxu3 %v3127_v28  ;;  %3368 = vmatmul.bf16.gmra.mxu0 %v6922_v52  ;;  %v5429_v52 = vld [vmem:[#allocation14 + $0xd8] sm:$0xf0]  ;;  %v5389_v28 = vld [vmem:[#allocation14 + $0x88] sm:$0xf0] }
 0x4c3   : > { %v5432_v51 = vor.u32 %v6055_v61, %v5429_v52  ;;  %v5392_v32 = vor.u32 %v6045_v23, %v5389_v28  ;;  %v6082_v52 = vld [vmem:[#allocation8 + $0x528] sm:$0xff] }
 0x4c4   : > { %3386 = vmatpush.bf16.msra.mxu1 %v6082_v52 }
 0x4c5   : > { %3056 = vmatpush.bf16.msrb.mxu2 %v5432_v51 }
 0x4c9   : > { %3057 = vmatpush.bf16.msrb.mxu2 %v5424_v56 }
 0x4cd   : > { %3058 = vmatpush.bf16.msrb.mxu2 %v5416_v59 }
 0x4d1   : > { %3059 = vmatpush.bf16.msrb.mxu2 %v5408_v15  ;;  %v6081_v15 = vld [vmem:[#allocation8 + $0x520] sm:$0xff] }
 0x4d2   : > { %3349 = vmatmul.bf16.gmra.mxu3 %v3129_v50  ;;  %3373 = vmatmul.bf16.gmra.mxu0 %v6933_v63  ;;  %v5400_v63 = vor.u32 %v6047_v18, %v5397_v19 }
 0x4d3   : > { %3387 = vmatpush.bf16.msra.mxu1 %v6081_v15 }
 0x4d5   : > { %3060 = vmatpush.bf16.msrb.mxu2 %v5400_v63 }
 0x4d9   : > { %3061 = vmatpush.bf16.msrb.mxu2 %v5392_v32  ;;  %v6080_v32 = vld [vmem:[#allocation8 + $0x518] sm:$0xff] }
 0x4da   : > { %3388 = vmatpush.bf16.msra.mxu1 %v6080_v32 }
 0x4e2   : > { %3378 = vmatmul.bf16.gmra.mxu0 %v6944_v16 }
 0x4e5   : > { %v2839_v26 = vpop.f32.mrf.mxu3 }
 0x4ed   : > { %v2810_v48 = vpop.f32.mrf.mxu2  ;;  %v2841_v34 = vpop.f32.mrf.mxu3 }
 0x4ee   : > { %v2811_v42 = vadd.f32 %v7161_v29, %v2810_v48 }
 0x4ef   : > { %v2868_v25 = vpop.f32.mrf.mxu0 }
 0x4f0   : > { %v2840_v16 = vadd.f32 %v2839_v26, %v2811_v42 }
 0x4f2   : > { %v2869_v37 = vadd.f32 %v2868_v25, %v2840_v16 }
 0x4f4   : > { %v2888_v43 = vmax.f32 %v2869_v37, 0.0 }
 0x4f5   : > { %v2812_v38 = vpop.f32.mrf.mxu2  ;;  %v2844_v31 = vpop.f32.mrf.mxu3 }
 0x4f6   : > { %v2813_v6 = vadd.f32 %v7161_v29, %v2812_v38  ;;  %v2898_v51 = vmul.f32 %v7164_v45, %v2888_v43 }
 0x4f7   : > { %v2870_v50 = vpop.f32.mrf.mxu0 }
 0x4f8   : > { %v2842_v61 = vadd.f32 %v2841_v34, %v2813_v6  ;;  %v2908_v57 = vadd.f32 %v7168_v46, %v2898_v51  ;;  %v6079_v6 = vld [vmem:[#allocation8 + $0x510] sm:$0xff] }
 0x4f9   : > { %3389 = vmatpush.bf16.msra.mxu1 %v6079_v6 }
 0x4fa   : > { %v2871_v54 = vadd.f32 %v2870_v50, %v2842_v61  ;;  %v2916_v18 = vadd.f32 %v2908_v57, %v6903_v39 }
 0x4fc   : > { %v2889_v56 = vmax.f32 %v2871_v54, 0.0 }
 0x4fd   : > { %v2815_v58 = vpop.f32.mrf.mxu2  ;;  %v2846_v36 = vpop.f32.mrf.mxu3 }
 0x4fe   : > { %v2899_v59 = vmul.f32 %v7164_v45, %v2889_v56  ;;  %v2816_v60 = vadd.f32 %v7161_v29, %v2815_v58 }
 0x4ff   : > { %v2873_v7 = vpop.f32.mrf.mxu0 }
 0x500   : > { %v2909_v9 = vadd.f32 %v7168_v46, %v2899_v59  ;;  %v2845_v10 = vadd.f32 %v2844_v31, %v2816_v60  ;;  %v6078_v59 = vld [vmem:[#allocation8 + $0x508] sm:$0xff] }
 0x501   : > { %3390 = vmatpush.bf16.msra.mxu1 %v6078_v59  ;;  %v3118_v59 = vld [vmem:[#allocation2 + $0x29] sm:$0xff] }
 0x502   : > { %v2917_v19 = vadd.f32 %v2909_v9, %v6906_v41  ;;  %v2874_v63 = vadd.f32 %v2873_v7, %v2845_v10 }
 0x504   : > { %v2924_v17 = vpack.c.bf16 %v2917_v19, %v2916_v18  ;;  %v2890_v23 = vmax.f32 %v2874_v63, 0.0 }
 0x505   : > { %v2817_v21 = vpop.f32.mrf.mxu2  ;;  %v2849_v47 = vpop.f32.mrf.mxu3 }
 0x506   : > { %v2818_v26 = vadd.f32 %v7161_v29, %v2817_v21  ;;  %3033 = vmatmul.bf16.vlgmr.msrb.gmra.mxu1 %v2924_v17  ;;  %3062 = vmatmul.bf16.vlgmr.msrb.gmra.mxu2 %v2924_v17  ;;  %v2900_v48 = vmul.f32 %v7164_v45, %v2890_v23  ;;  %v6077_v21 = vld [vmem:[#allocation8 + $0x500] sm:$0xff] }
 0x507   : > { %v2875_v27 = vpop.f32.mrf.mxu0  ;;  %3391 = vmatpush.bf16.msra.mxu1 %v6077_v21 }
 0x508   : > { %v2847_v28 = vadd.f32 %v2846_v36, %v2818_v26  ;;  %v2910_v16 = vadd.f32 %v7168_v46, %v2900_v48 }
 0x50a   : > { %v2876_v34 = vadd.f32 %v2875_v27, %v2847_v28  ;;  %v2918_v61 = vadd.f32 %v2910_v16, %v6914_v44 }
 0x50c   : > { %v2891_v42 = vmax.f32 %v2876_v34, 0.0 }
 0x50d   : > { %v2820_v25 = vpop.f32.mrf.mxu2  ;;  %v2851_v51 = vpop.f32.mrf.mxu3 }
 0x50e   : > { %v2901_v35 = vmul.f32 %v7164_v45, %v2891_v42  ;;  %v2821_v37 = vadd.f32 %v7161_v29, %v2820_v25 }
 0x50f   : > { %v2878_v38 = vpop.f32.mrf.mxu0 }
 0x510   : > { %v2911_v31 = vadd.f32 %v7168_v46, %v2901_v35  ;;  %v2850_v43 = vadd.f32 %v2849_v47, %v2821_v37 }
 0x512   : > { %v2879_v50 = vadd.f32 %v2878_v38, %v2850_v43  ;;  %v2919_v52 = vadd.f32 %v2911_v31, %v6917_v49 }
 0x514   : > { %v2925_v54 = vpack.c.bf16 %v2919_v52, %v2918_v61  ;;  %v2892_v58 = vmax.f32 %v2879_v50, 0.0 }
 0x515   : > { %v2822_v56 = vpop.f32.mrf.mxu2  ;;  %v2854_v15 = vpop.f32.mrf.mxu3 }
 0x516   : > { %v2823_v57 = vadd.f32 %v7161_v29, %v2822_v56  ;;  %3038 = vmatmul.bf16.gmra.mxu1 %v2925_v54  ;;  %3067 = vmatmul.bf16.gmra.mxu2 %v2925_v54  ;;  %v2902_v7 = vmul.f32 %v7164_v45, %v2892_v58  ;;  %v3116_v54 = vld [vmem:[#allocation2 + $0x19] sm:$0xff]  ;;  %v3115_v56 = vld [vmem:[#allocation2 + $0x11] sm:$0xff] }
 0x517   : > { %v2880_v60 = vpop.f32.mrf.mxu0  ;;  %v3124_v58 = vpack.c.bf16 %v3116_v54, %v3115_v56  ;;  %v6096_v54 = vld [vmem:[#allocation8 + $0x598] sm:$0xff] }
 0x518   : > { %v2852_v36 = vadd.f32 %v2851_v51, %v2823_v57  ;;  %v2912_v19 = vadd.f32 %v7168_v46, %v2902_v7  ;;  %v3117_v57 = vld [vmem:[#allocation2 + $0x21] sm:$0xff]  ;;  %v3119_v7 = vld [vmem:[#allocation2 + $0x51] sm:$0xff] }
 0x51a   : > { %v2881_v9 = vadd.f32 %v2880_v60, %v2852_v36  ;;  %v2920_v32 = vadd.f32 %v2912_v19, %v6925_v55  ;;  %v3126_v60 = vpack.c.bf16 %v3118_v59, %v3117_v57  ;;  %v3120_v36 = vld [vmem:[#allocation2 + $0x59] sm:$0xff] }
 0x51b   : > { %v6100_v19 = vld [vmem:[#allocation8 + $0x5b8] sm:$0xff] }
 0x51c   : > { %v2893_v10 = vmax.f32 %v2881_v9, 0.0  ;;  %v3122_v9 = vld [vmem:[#allocation2 + $0x69] sm:$0xff]  ;;  %3695 = vmatpush.bf16.msra.mxu3 %v6100_v19 }
 0x51d   : > { %v2825_v18 = vpop.f32.mrf.mxu2  ;;  %v2856_v16 = vpop.f32.mrf.mxu3 }
 0x51e   : > { %v2903_v63 = vmul.f32 %v7164_v45, %v2893_v10  ;;  %v2826_v17 = vadd.f32 %v7161_v29, %v2825_v18  ;;  %v6092_v18 = vld [vmem:[#allocation8 + $0x578] sm:$0xff] }
 0x51f   : > { %v2883_v23 = vpop.f32.mrf.mxu0  ;;  %3666 = vmatpush.bf16.msra.mxu2 %v6092_v18  ;;  %v6094_v18 = vld [vmem:[#allocation8 + $0x588] sm:$0xff] }
 0x520   : > { %v2913_v26 = vadd.f32 %v7168_v46, %v2903_v63  ;;  %v2855_v27 = vadd.f32 %v2854_v15, %v2826_v17  ;;  %v663_v15 = vld [vmem:[%s7446_s8] sm:$0x3] }
 0x521   : > { %v7202_v63 = vperm.slane %v663_v15, 0 }
 0x522   : > { %v2884_v28 = vadd.f32 %v2883_v23, %v2855_v27  ;;  %v2921_v47 = vadd.f32 %v2913_v26, %v6928_v62  ;;  %v7206_v23 = vperm.slane %v663_v15, 1  ;;  %v6091_v27 = vld [vmem:[#allocation8 + $0x570] sm:$0xff] }
 0x523   : > { %v1872_v17 = vadd.f32 %v7202_v63, %v7057_v53  ;;  %3667 = vmatpush.bf16.msra.mxu2 %v6091_v27  ;;  %v6090_v53 = vld [vmem:[#allocation8 + $0x568] sm:$0xff]  ;;  %v1884_v19 = vadd.f32 %v7202_v63, %v7069_v22  ;;  %v6103_v27 = vld [vmem:[#allocation8 + $0x5d0] sm:$0xff]  ;;  %v7252_v22 = vld [vmem:[#allocation9 + $0x6] ss:$0 sm:$0xff] }
 0x524   : > { %v2926_v48 = vpack.c.bf16 %v2921_v47, %v2920_v32  ;;  %v2894_v42 = vmax.f32 %v2884_v28, 0.0  ;;  %v6099_v28 = vld [vmem:[#allocation8 + $0x5b0] sm:$0xff]  ;;  %v6108_v32 = vld [vmem:[#allocation8 + $0x5f8] sm:$0xff]  ;;  %v1873_v47 = vadd.f32 %v7206_v23, %v7103_v2  ;;  %v6089_v2 = vld [vmem:[#allocation8 + $0x560] sm:$0xff] }
 0x525   : > { %v2827_v34 = vpop.f32.mrf.mxu2  ;;  %3696 = vmatpush.bf16.msra.mxu3 %v6099_v28  ;;  %3724 = vmatpush.bf16.msrb.mxu0 %v6108_v32  ;;  %v6093_v28 = vld [vmem:[#allocation8 + $0x580] sm:$0xff]  ;;  %v1885_v32 = vadd.f32 %v7206_v23, %v7115_v24  ;;  %v7255_v24 = vld [vmem:[#allocation11 + $0x6] ss:$0 sm:$0xff] }
 0x526   : > { %v2828_v25 = vadd.f32 %v7161_v29, %v2827_v34  ;;  %3043 = vmatmul.bf16.gmra.mxu1 %v2926_v48  ;;  %3072 = vmatmul.bf16.gmra.mxu2 %v2926_v48  ;;  %v2904_v38 = vmul.f32 %v7164_v45, %v2894_v42 }
 0x527   : > { %v2885_v37 = vpop.f32.mrf.mxu0  ;;  %3668 = vmatpush.bf16.msra.mxu2 %v6090_v53 }
 0x528   : > { %v2857_v35 = vadd.f32 %v2856_v16, %v2828_v25  ;;  %v2914_v6 = vadd.f32 %v7168_v46, %v2904_v38  ;;  %v6098_v25 = vld [vmem:[#allocation8 + $0x5a8] sm:$0xff]  ;;  %v6107_v16 = vld [vmem:[#allocation8 + $0x5f0] sm:$0xff] }
 0x529   : > { %3697 = vmatpush.bf16.msra.mxu3 %v6098_v25  ;;  %3725 = vmatpush.bf16.msrb.mxu0 %v6107_v16 }
 0x52a   : > { %v2886_v31 = vadd.f32 %v2885_v37, %v2857_v35  ;;  %v2922_v52 = vadd.f32 %v2914_v6, %v6936_v8  ;;  %v1876_v37 = vadd.f32 %v7202_v63, %v7061_v1  ;;  %v6106_v6 = vld [vmem:[#allocation8 + $0x5e8] sm:$0xff]  ;;  %v6105_v1 = vld [vmem:[#allocation8 + $0x5e0] sm:$0xff] }
 0x52b   : > { %3669 = vmatpush.bf16.msra.mxu2 %v6089_v2 }
 0x52c   : > { %v2895_v43 = vmax.f32 %v2886_v31, 0.0 }
 0x52d   : > { %3726 = vmatpush.bf16.msrb.mxu0 %v6106_v6 }
 0x52e   : > { %v2905_v50 = vmul.f32 %v7164_v45, %v2895_v43  ;;  %v3128_v45 = vpack.c.bf16 %v3120_v36, %v3119_v7  ;;  %v6097_v43 = vld [vmem:[#allocation8 + $0x5a0] sm:$0xff] }
 0x52f   : > { %3698 = vmatpush.bf16.msra.mxu3 %v6097_v43  ;;  %v3364_v15 = vpop.f32.mrf.mxu0 }
 0x530   : > { %v2915_v61 = vadd.f32 %v7168_v46, %v2905_v50  ;;  %v3121_v46 = vld [vmem:[#allocation2 + $0x61] sm:$0xff]  ;;  %v1877_v50 = vadd.f32 %v7206_v23, %v7107_v40  ;;  %v1881_v40 = vadd.f32 %v7206_v23, %v7111_v12 }
 0x531   : > { %v3130_v10 = vpack.c.bf16 %v3122_v9, %v3121_v46  ;;  %3727 = vmatpush.bf16.msrb.mxu0 %v6105_v1  ;;  %v6095_v46 = vld [vmem:[#allocation8 + $0x590] sm:$0xff]  ;;  %v6104_v9 = vld [vmem:[#allocation8 + $0x5d8] sm:$0xff] }
 0x532   : > { %v2923_v51 = vadd.f32 %v2915_v61, %v6939_v13 }
 0x533   : > { %3699 = vmatpush.bf16.msra.mxu3 %v6096_v54 }
 0x534   : > { %v2927_v29 = vpack.c.bf16 %v2923_v51, %v2922_v52 }
 0x535   : > { %3728 = vmatpush.bf16.msrb.mxu0 %v6104_v9 }
 0x536   : > { %3048 = vmatmul.bf16.gmra.mxu1 %v2927_v29  ;;  %3077 = vmatmul.bf16.gmra.mxu2 %v2927_v29  ;;  %v6088_v29 = vld [vmem:[#allocation8 + $0x558] sm:$0xff] }
 0x537   : > { %3670 = vmatpush.bf16.msra.mxu2 %v6088_v29  ;;  %3700 = vmatpush.bf16.msra.mxu3 %v6095_v46  ;;  %v3366_v25 = vpop.f32.mrf.mxu0  ;;  %v6101_v29 = vld [vmem:[#allocation8 + $0x5c0] sm:$0xff] }
 0x539   : > { %3729 = vmatpush.bf16.msrb.mxu0 %v6103_v27 }
 0x53b   : > { %3701 = vmatpush.bf16.msra.mxu3 %v6094_v18 }
 0x53f   : > { %3702 = vmatpush.bf16.msra.mxu3 %v6093_v28  ;;  %v3369_v54 = vpop.f32.mrf.mxu0 }
 0x546   : > { %3392 = vmatmul.bf16.vlgmr.msra.gmra.mxu1 %v3124_v58  ;;  %v1880_v58 = vadd.f32 %v7202_v63, %v7065_v11 }
 0x547   : > { %v3371_v18 = vpop.f32.mrf.mxu0 }
 0x556   : > { %3397 = vmatmul.bf16.gmra.mxu1 %v3126_v60 }
 0x566   : > { %3402 = vmatmul.bf16.gmra.mxu1 %v3128_v45  ;;  %v6087_v45 = vld [vmem:[#allocation8 + $0x550] sm:$0xff] }
 0x567   : > { %3671 = vmatpush.bf16.msra.mxu2 %v6087_v45 }
 0x576   : > { %3407 = vmatmul.bf16.gmra.mxu1 %v3130_v10  ;;  %v3335_v10 = vpop.f32.mrf.mxu3 }
 0x577   : > { %v3336_v2 = vadd.f32 %v7252_v22, %v3335_v10 }
 0x579   : > { %v3365_v43 = vadd.f32 %v3364_v15, %v3336_v2  ;;  %v3374_v2 = vpop.f32.mrf.mxu0 }
 0x583   : > { %v3034_v21 = vpop.f32.mrf.mxu1 }
 0x584   : > { %v7208_v26 = vadd.f32 %v3034_v21, %v1872_v17  ;;  %v6086_v21 = vld [vmem:[#allocation8 + $0x548] sm:$0xff] }
 0x585   : > { %3672 = vmatpush.bf16.msra.mxu2 %v6086_v21 }
 0x589   : > { %v3063_v48 = vpop.f32.mrf.mxu2 }
 0x58a   : > { %v7212_v34 = vadd.f32 %v3063_v48, %v1873_v47  ;;  %v3337_v47 = vpop.f32.mrf.mxu3 }
 0x58b   : > { %v7214_v42 = vpop.f32.mrf.mxu1 }
 0x591   : > { %v7216_v35 = vpop.f32.mrf.mxu2 }
 0x592   : > { %v3340_v6 = vpop.f32.mrf.mxu3 }
 0x593   : > { %v3039_v38 = vpop.f32.mrf.mxu1 }
 0x594   : > { %v7220_v31 = vadd.f32 %v3039_v38, %v1876_v37  ;;  %v6085_v37 = vld [vmem:[#allocation8 + $0x540] sm:$0xff]  ;;  %v6102_v38 = vld [vmem:[#allocation8 + $0x5c8] sm:$0xff] }
 0x595   : > { %3673 = vmatpush.bf16.msra.mxu2 %v6085_v37  ;;  %3730 = vmatpush.bf16.msrb.mxu0 %v6102_v38 }
 0x599   : > { %v3068_v61 = vpop.f32.mrf.mxu2  ;;  %3731 = vmatpush.bf16.msrb.mxu0 %v6101_v29 }
 0x59a   : > { %v7224_v52 = vadd.f32 %v3068_v61, %v1877_v50  ;;  %v3342_v10 = vpop.f32.mrf.mxu3 }
 0x59b   : > { %v7226_v51 = vpop.f32.mrf.mxu1  ;;  %v3343_v37 = vadd.f32 %v7252_v22, %v3342_v10  ;;  %v3376_v10 = vpop.f32.mrf.mxu0 }
 0x5a1   : > { %v7228_v56 = vpop.f32.mrf.mxu2 }
 0x5a3   : > { %v3044_v57 = vpop.f32.mrf.mxu1 }
 0x5a4   : > { %v7232_v59 = vadd.f32 %v3044_v57, %v1880_v58  ;;  %v7257_v58 = vld [vmem:[#allocation12 + $0x6] ss:$0 sm:$0xff]  ;;  %v3338_v57 = vadd.f32 %v7252_v22, %v3337_v47 }
 0x5a9   : > { %v3073_v60 = vpop.f32.mrf.mxu2 }
 0x5aa   : > { %v7236_v36 = vadd.f32 %v3073_v60, %v1881_v40  ;;  %v3367_v60 = vadd.f32 %v3366_v25, %v3338_v57  ;;  %v3345_v25 = vpop.f32.mrf.mxu3 }
 0x5ab   : > { %v7238_v7 = vpop.f32.mrf.mxu1 }
 0x5b1   : > { %v7240_v11 = vpop.f32.mrf.mxu2 }
 0x5b3   : > { %v3049_v12 = vpop.f32.mrf.mxu1 }
 0x5b4   : > { %v7244_v17 = vadd.f32 %v3049_v12, %v1884_v19  ;;  %v3341_v19 = vadd.f32 %v7252_v22, %v3340_v6 }
 0x5b6   : > { %v3370_v21 = vadd.f32 %v3369_v54, %v3341_v19 }
 0x5b9   : > { %v3078_v48 = vpop.f32.mrf.mxu2 }
 0x5ba   : > { %v7248_v53 = vadd.f32 %v3078_v48, %v1885_v32 }
 0x5bb   : > { %v7250_v16 = vpop.f32.mrf.mxu1 }
 0x5c3   : > { %v3393_v50 = vpop.f32.mrf.mxu1 }
 0x5c4   : > { %v3394_v61 = vadd.f32 %v3393_v50, %v3365_v43  ;;  %v3372_v43 = vadd.f32 %v3371_v18, %v3343_v37 }
 0x5c6   : > { %v3413_v1 = vmax.f32 %v3394_v61, 0.0 }
 0x5c8   : > { %v3423_v40 = vmul.f32 %v7255_v24, %v3413_v1 }
 0x5ca   : > { %v3433_v45 = vadd.f32 %v7257_v58, %v3423_v40  ;;  %v3346_v40 = vadd.f32 %v7252_v22, %v3345_v25 }
 0x5cb   : > { %v3395_v46 = vpop.f32.mrf.mxu1 }
 0x5cc   : > { %3441 = vst [vmem:[#allocation2 + $0x10] sm:$0xff] %v3433_v45  ;;  %v3396_v9 = vadd.f32 %v3395_v46, %v3367_v60  ;;  %v3375_v46 = vadd.f32 %v3374_v2, %v3346_v40 }
 0x5ce   : > { %v3414_v15 = vmax.f32 %v3396_v9, 0.0 }
 0x5d0   : > { %v3424_v12 = vmul.f32 %v7255_v24, %v3414_v15 }
 0x5d2   : > { %v3434_v27 = vadd.f32 %v7257_v58, %v3424_v12 }
 0x5d3   : > { %v3398_v28 = vpop.f32.mrf.mxu1  ;;  %v3449_v61 = vld [vmem:[#allocation2 + $0xc] sm:$0xff] }
 0x5d4   : > { %v3460_v32 = vpack.c.bf16 %v3434_v27, %v3433_v45  ;;  %3442 = vst [vmem:[#allocation2 + $0x18] sm:$0xff] %v3434_v27  ;;  %v3399_v47 = vadd.f32 %v3398_v28, %v3370_v21  ;;  %v3347_v45 = vpop.f32.mrf.mxu3 }
 0x5d5   : > { %v3348_v28 = vadd.f32 %v7252_v22, %v3347_v45 }
 0x5d6   : > { %v3415_v48 = vmax.f32 %v3399_v47, 0.0  ;;  %3703 = vmatmul.bf16.vlgmr.msra.gmra.mxu3 %v3460_v32 }
 0x5d7   : > { %v3377_v47 = vadd.f32 %v3376_v10, %v3348_v28  ;;  %v6123_v28 = vld [vmem:[#allocation8 + $0x670] sm:$0xff] }
 0x5d8   : > { %v3425_v38 = vmul.f32 %v7255_v24, %v3415_v48 }
 0x5da   : > { %v3435_v6 = vadd.f32 %v7257_v58, %v3425_v38 }
 0x5db   : > { %v3400_v50 = vpop.f32.mrf.mxu1  ;;  %v3450_v29 = vld [vmem:[#allocation2 + $0x14] sm:$0xff] }
 0x5dc   : > { %3443 = vst [vmem:[#allocation2 + $0x20] sm:$0xff] %v3435_v6  ;;  %v3401_v54 = vadd.f32 %v3400_v50, %v3372_v43  ;;  %v3459_v1 = vpack.c.bf16 %v3450_v29, %v3449_v61  ;;  %v3350_v25 = vpop.f32.mrf.mxu3  ;;  %v3379_v50 = vpop.f32.mrf.mxu0 }
 0x5de   : > { %v3416_v57 = vmax.f32 %v3401_v54, 0.0  ;;  %3674 = vmatmul.bf16.vlgmr.msra.gmra.mxu2 %v3459_v1 }
 0x5e0   : > { %v3426_v60 = vmul.f32 %v7255_v24, %v3416_v57 }
 0x5e2   : > { %v3436_v9 = vadd.f32 %v7257_v58, %v3426_v60 }
 0x5e3   : > { %v3403_v15 = vpop.f32.mrf.mxu1  ;;  %v3451_v18 = vld [vmem:[#allocation2 + $0x1c] sm:$0xff] }
 0x5e4   : > { %3444 = vst [vmem:[#allocation2 + $0x28] sm:$0xff] %v3436_v9  ;;  %v3404_v19 = vadd.f32 %v3403_v15, %v3375_v46  ;;  %v3463_v12 = vpack.c.bf16 %v3436_v9, %v3435_v6  ;;  %v3461_v21 = vpack.c.bf16 %v3451_v18, %v3450_v29  ;;  %v3351_v6 = vadd.f32 %v7252_v22, %v3350_v25  ;;  %v3352_v9 = vpop.f32.mrf.mxu3  ;;  %v6124_v15 = vld [vmem:[#allocation8 + $0x678] sm:$0xff] }
 0x5e5   : > { %4041 = vmatpush.bf16.msrb.mxu2 %v6124_v15  ;;  %v6111_v15 = vld [vmem:[#allocation8 + $0x610] sm:$0xff] }
 0x5e6   : > { %v3417_v27 = vmax.f32 %v3404_v19, 0.0  ;;  %3708 = vmatmul.bf16.gmra.mxu3 %v3463_v12  ;;  %3732 = vmatmul.bf16.vlgmr.msrb.gmra.mxu0 %v3461_v21  ;;  %v3380_v1 = vadd.f32 %v3379_v50, %v3351_v6  ;;  %v6116_v19 = vld [vmem:[#allocation8 + $0x638] sm:$0xff]  ;;  %v3381_v12 = vpop.f32.mrf.mxu0  ;;  %v3353_v21 = vadd.f32 %v7252_v22, %v3352_v9  ;;  %v6113_v9 = vld [vmem:[#allocation8 + $0x620] sm:$0xff] }
 0x5e7   : > { %4012 = vmatpush.bf16.msrb.mxu1 %v6116_v19  ;;  %v6121_v19 = vld [vmem:[#allocation8 + $0x660] sm:$0xff] }
 0x5e8   : > { %v3427_v32 = vmul.f32 %v7255_v24, %v3417_v27 }
 0x5e9   : > { %4042 = vmatpush.bf16.msrb.mxu2 %v6123_v28  ;;  %v6120_v28 = vld [vmem:[#allocation8 + $0x658] sm:$0xff] }
 0x5ea   : > { %v3437_v48 = vadd.f32 %v7257_v58, %v3427_v32  ;;  %v6131_v32 = vld [vmem:[#allocation8 + $0x6b0] sm:$0xff] }
 0x5eb   : > { %v3405_v37 = vpop.f32.mrf.mxu1  ;;  %v3452_v38 = vld [vmem:[#allocation2 + $0x24] sm:$0xff]  ;;  %v3457_v54 = vld [vmem:[#allocation2 + $0x2c] sm:$0xff] }
 0x5ec   : > { %3445 = vst [vmem:[#allocation2 + $0x50] sm:$0xff] %v3437_v48  ;;  %v3406_v2 = vadd.f32 %v3405_v37, %v3377_v47  ;;  %v3462_v43 = vpack.c.bf16 %v3452_v38, %v3451_v18  ;;  %v3464_v46 = vpack.c.bf16 %v3457_v54, %v3452_v38  ;;  %v6132_v18 = vld [vmem:[#allocation8 + $0x6b8] sm:$0xff]  ;;  %v6115_v47 = vld [vmem:[#allocation8 + $0x630] sm:$0xff] }
 0x5ed   : > { %4070 = vmatpush.bf16.msrb.mxu3 %v6132_v18  ;;  %4013 = vmatpush.bf16.msrb.mxu1 %v6115_v47  ;;  %v6110_v18 = vld [vmem:[#allocation8 + $0x608] sm:$0xff]  ;;  %v6119_v47 = vld [vmem:[#allocation8 + $0x650] sm:$0xff] }
 0x5ee   : > { %v3418_v61 = vmax.f32 %v3406_v2, 0.0  ;;  %3679 = vmatmul.bf16.gmra.mxu2 %v3462_v43 }
 0x5f0   : > { %v3428_v29 = vmul.f32 %v7255_v24, %v3418_v61 }
 0x5f1   : > { %4071 = vmatpush.bf16.msrb.mxu3 %v6131_v32  ;;  %v6129_v32 = vld [vmem:[#allocation8 + $0x6a0] sm:$0xff] }
 0x5f2   : > { %v3438_v57 = vadd.f32 %v7257_v58, %v3428_v29 }
 0x5f3   : > { %v3408_v40 = vpop.f32.mrf.mxu1  ;;  %v3453_v38 = vld [vmem:[#allocation2 + $0x4c] sm:$0xff] }
 0x5f4   : > { %3446 = vst [vmem:[#allocation2 + $0x58] sm:$0xff] %v3438_v57  ;;  %v3409_v60 = vadd.f32 %v3408_v40, %v3380_v1  ;;  %v3466_v45 = vpack.c.bf16 %v3438_v57, %v3437_v48  ;;  %v3382_v48 = vadd.f32 %v3381_v12, %v3353_v21  ;;  %v6109_v12 = vld [vmem:[#allocation8 + $0x600] sm:$0xff]  ;;  %v6320_v21 = vld [vmem:[#allocation2 + $0x8] sm:$0xff] }
 0x5f6   : > { %v3419_v10 = vmax.f32 %v3409_v60, 0.0  ;;  %3713 = vmatmul.bf16.gmra.mxu3 %v3466_v45  ;;  %3737 = vmatmul.bf16.gmra.mxu0 %v3464_v46  ;;  %v6114_v46 = vld [vmem:[#allocation8 + $0x628] sm:$0xff] }
 0x5f7   : > { %4014 = vmatpush.bf16.msrb.mxu1 %v6114_v46  ;;  %v7292_v46 = vld [vmem:[#allocation12 + $0x7] ss:$0 sm:$0xff] }
 0x5f8   : > { %v3429_v27 = vmul.f32 %v7255_v24, %v3419_v10  ;;  %v6122_v10 = vld [vmem:[#allocation8 + $0x668] sm:$0xff] }
 0x5f9   : > { %4043 = vmatpush.bf16.msrb.mxu2 %v6122_v10 }
 0x5fa   : > { %v3439_v25 = vadd.f32 %v7257_v58, %v3429_v27  ;;  %v7282_v27 = vpack.c.bf16 %v6320_v21, %v6320_v21 }
 0x5fb   : > { %v3410_v37 = vpop.f32.mrf.mxu1  ;;  %v3454_v2 = vld [vmem:[#allocation2 + $0x54] sm:$0xff]  ;;  %4015 = vmatpush.bf16.msrb.mxu1 %v6113_v9 }
 0x5fc   : > { %3447 = vst [vmem:[#allocation2 + $0x60] sm:$0xff] %v3439_v25  ;;  %v3411_v43 = vadd.f32 %v3410_v37, %v3382_v48  ;;  %v3465_v50 = vpack.c.bf16 %v3454_v2, %v3453_v38  ;;  %v6118_v48 = vld [vmem:[#allocation8 + $0x648] sm:$0xff]  ;;  %v6117_v37 = vld [vmem:[#allocation8 + $0x640] sm:$0xff]  ;;  %v7285_v38 = vpop.f32.mrf.mxu2 }
 0x5fd   : > { %4044 = vmatpush.bf16.msrb.mxu2 %v6121_v19 }
 0x5fe   : > { %v3420_v22 = vmax.f32 %v3411_v43, 0.0  ;;  %3684 = vmatmul.bf16.gmra.mxu2 %v3465_v50  ;;  %v7287_v43 = vld [vmem:[#allocation9 + $0x7] ss:$0 sm:$0xff]  ;;  %v6127_v50 = vld [vmem:[#allocation8 + $0x690] sm:$0xff] }
 0x600   : > { %v3430_v61 = vmul.f32 %v7255_v24, %v3420_v22  ;;  %v6130_v24 = vld [vmem:[#allocation8 + $0x6a8] sm:$0xff] }
 0x601   : > { %4072 = vmatpush.bf16.msrb.mxu3 %v6130_v24  ;;  %4045 = vmatpush.bf16.msrb.mxu2 %v6120_v28 }
 0x602   : > { %v3440_v6 = vadd.f32 %v7257_v58, %v3430_v61  ;;  %v6112_v58 = vld [vmem:[#allocation8 + $0x618] sm:$0xff] }
 0x603   : > { %v3455_v29 = vld [vmem:[#allocation2 + $0x5c] sm:$0xff]  ;;  %4016 = vmatpush.bf16.msrb.mxu1 %v6112_v58 }
 0x604   : > { %3448 = vst [vmem:[#allocation2 + $0x68] sm:$0xff] %v3440_v6  ;;  %v3469_v54 = vpack.c.bf16 %v3440_v6, %v3439_v25  ;;  %v3467_v1 = vpack.c.bf16 %v3455_v29, %v3454_v2  ;;  %v6128_v25 = vld [vmem:[#allocation8 + $0x698] sm:$0xff] }
 0x605   : > { %4073 = vmatpush.bf16.msrb.mxu3 %v6129_v32  ;;  %4046 = vmatpush.bf16.msrb.mxu2 %v6119_v47 }
 0x606   : > { %3718 = vmatmul.bf16.gmra.mxu3 %v3469_v54  ;;  %3742 = vmatmul.bf16.gmra.mxu0 %v3467_v1  ;;  %v6126_v54 = vld [vmem:[#allocation8 + $0x688] sm:$0xff] }
 0x607   : > { %4017 = vmatpush.bf16.msrb.mxu1 %v6111_v15 }
 0x609   : > { %4047 = vmatpush.bf16.msrb.mxu2 %v6118_v48  ;;  %4074 = vmatpush.bf16.msrb.mxu3 %v6128_v25 }
 0x60b   : > { %v3456_v57 = vld [vmem:[#allocation2 + $0x64] sm:$0xff]  ;;  %v3458_v60 = vld [vmem:[#allocation2 + $0x6c] sm:$0xff]  ;;  %4018 = vmatpush.bf16.msrb.mxu1 %v6110_v18 }
 0x60c   : > { %v3468_v40 = vpack.c.bf16 %v3456_v57, %v3455_v29  ;;  %v3470_v45 = vpack.c.bf16 %v3458_v60, %v3456_v57  ;;  %v6125_v60 = vld [vmem:[#allocation8 + $0x680] sm:$0xff] }
 0x60d   : > { %4048 = vmatpush.bf16.msrb.mxu2 %v6117_v37  ;;  %4075 = vmatpush.bf16.msrb.mxu3 %v6127_v50 }
 0x60e   : > { %3689 = vmatmul.bf16.gmra.mxu2 %v3468_v40  ;;  %v7290_v40 = vld [vmem:[#allocation11 + $0x7] ss:$0 sm:$0xff] }
 0x60f   : > { %4019 = vmatpush.bf16.msrb.mxu1 %v6109_v12 }
 0x611   : > { %4076 = vmatpush.bf16.msrb.mxu3 %v6126_v54 }
 0x612   : > { %4020 = vmatmul.bf16.vlgmr.msrb.gmra.mxu1 %v7282_v27 }
 0x615   : > { %4077 = vmatpush.bf16.msrb.mxu3 %v6125_v60 }
 0x616   : > { %3747 = vmatmul.bf16.gmra.mxu0 %v3470_v45 }
 0x659   : > { %v3704_v2 = vpop.f32.mrf.mxu3 }
 0x661   : > { %v3675_v22 = vpop.f32.mrf.mxu2  ;;  %v3706_v61 = vpop.f32.mrf.mxu3 }
 0x662   : > { %v3676_v6 = vadd.f32 %v7287_v43, %v3675_v22 }
 0x663   : > { %v3733_v29 = vpop.f32.mrf.mxu0 }
 0x664   : > { %v3705_v1 = vadd.f32 %v3704_v2, %v3676_v6 }
 0x666   : > { %v3734_v57 = vadd.f32 %v3733_v29, %v3705_v1 }
 0x668   : > { %v3753_v45 = vmax.f32 %v3734_v57, 0.0 }
 0x669   : > { %v3677_v9 = vpop.f32.mrf.mxu2  ;;  %v3709_v10 = vpop.f32.mrf.mxu3 }
 0x66a   : > { %v3763_v24 = vmul.f32 %v7290_v40, %v3753_v45  ;;  %v3678_v58 = vadd.f32 %v7287_v43, %v3677_v9 }
 0x66b   : > { %v3735_v15 = vpop.f32.mrf.mxu0 }
 0x66c   : > { %v3773_v18 = vadd.f32 %v7292_v46, %v3763_v24  ;;  %v3707_v19 = vadd.f32 %v3706_v61, %v3678_v58 }
 0x66e   : > { %3781 = vst [vmem:[#allocation2 + $0x10] sm:$0xff] %v3773_v18  ;;  %v3736_v12 = vadd.f32 %v3735_v15, %v3707_v19 }
 0x670   : > { %v3754_v21 = vmax.f32 %v3736_v12, 0.0 }
 0x671   : > { %v3680_v28 = vpop.f32.mrf.mxu2  ;;  %v3711_v48 = vpop.f32.mrf.mxu3 }
 0x672   : > { %v3764_v32 = vmul.f32 %v7290_v40, %v3754_v21  ;;  %v3681_v47 = vadd.f32 %v7287_v43, %v3680_v28 }
 0x673   : > { %v3738_v25 = vpop.f32.mrf.mxu0 }
 0x674   : > { %v3774_v37 = vadd.f32 %v7292_v46, %v3764_v32  ;;  %v3710_v2 = vadd.f32 %v3709_v10, %v3681_v47 }
 0x676   : > { %v3806_v50 = vpack.c.bf16 %v3774_v37, %v3773_v18  ;;  %3782 = vst [vmem:[#allocation2 + $0x18] sm:$0xff] %v3774_v37  ;;  %v3739_v22 = vadd.f32 %v3738_v25, %v3710_v2 }
 0x678   : > { %v3755_v6 = vmax.f32 %v3739_v22, 0.0  ;;  %4049 = vmatmul.bf16.vlgmr.msrb.gmra.mxu2 %v3806_v50  ;;  %4025 = vmatmul.bf16.gmra.mxu1 %v3806_v50 }
 0x679   : > { %v3682_v61 = vpop.f32.mrf.mxu2  ;;  %v3714_v45 = vpop.f32.mrf.mxu3 }
 0x67a   : > { %v3765_v29 = vmul.f32 %v7290_v40, %v3755_v6  ;;  %v3683_v54 = vadd.f32 %v7287_v43, %v3682_v61 }
 0x67b   : > { %v3740_v1 = vpop.f32.mrf.mxu0 }
 0x67c   : > { %v3775_v57 = vadd.f32 %v7292_v46, %v3765_v29  ;;  %v3712_v60 = vadd.f32 %v3711_v48, %v3683_v54 }
 0x67e   : > { %3783 = vst [vmem:[#allocation2 + $0x20] sm:$0xff] %v3775_v57  ;;  %v3741_v9 = vadd.f32 %v3740_v1, %v3712_v60 }
 0x680   : > { %v3756_v24 = vmax.f32 %v3741_v9, 0.0 }
 0x681   : > { %v3685_v10 = vpop.f32.mrf.mxu2  ;;  %v3716_v32 = vpop.f32.mrf.mxu3 }
 0x682   : > { %v3766_v58 = vmul.f32 %v7290_v40, %v3756_v24  ;;  %v3686_v15 = vadd.f32 %v7287_v43, %v3685_v10 }
 0x683   : > { %v3743_v18 = vpop.f32.mrf.mxu0 }
 0x684   : > { %v3776_v19 = vadd.f32 %v7292_v46, %v3766_v58  ;;  %v3715_v12 = vadd.f32 %v3714_v45, %v3686_v15 }
 0x686   : > { %3784 = vst [vmem:[#allocation2 + $0x28] sm:$0xff] %v3776_v19  ;;  %v3744_v21 = vadd.f32 %v3743_v18, %v3715_v12  ;;  %v3809_v28 = vpack.c.bf16 %v3776_v19, %v3775_v57  ;;  %v5795_v18 = vld [vmem:[#allocation14 + $0x170] sm:$0xf]  ;;  %v6148_v19 = vld [vmem:[#allocation14 + $0x174] sm:$0xf0] }
 0x687   : > { %v6147_v12 = vld [vmem:[#allocation14 + $0x174] sm:$0xf] }
 0x688   : > { %v3757_v47 = vmax.f32 %v3744_v21, 0.0  ;;  %4054 = vmatmul.bf16.gmra.mxu2 %v3809_v28  ;;  %4030 = vmatmul.bf16.gmra.mxu1 %v7282_v27 }
 0x689   : > { %v3687_v48 = vpop.f32.mrf.mxu2  ;;  %4078 = vmatmul.bf16.vlgmr.msrb.gmra.mxu3 %v3809_v28  ;;  %v3719_v29 = vpop.f32.mrf.mxu3 }
 0x68a   : > { %v3767_v25 = vmul.f32 %v7290_v40, %v3757_v47  ;;  %v3688_v37 = vadd.f32 %v7287_v43, %v3687_v48  ;;  %v5797_v47 = vld [vmem:[#allocation14 + $0x178] sm:$0xf0] }
 0x68b   : > { %v3745_v2 = vpop.f32.mrf.mxu0 }
 0x68c   : > { %v3777_v50 = vadd.f32 %v7292_v46, %v3767_v25  ;;  %v3717_v22 = vadd.f32 %v3716_v32, %v3688_v37  ;;  %v5796_v32 = vor.u32 %v6148_v19, %v5795_v18  ;;  %v5800_v25 = vor.u32 %v6147_v12, %v5797_v47  ;;  %v5781_v18 = vld [vmem:[#allocation14 + $0x158] sm:$0xf0]  ;;  %v6142_v19 = vld [vmem:[#allocation14 + $0x144] sm:$0xf0]  ;;  %v6141_v12 = vld [vmem:[#allocation14 + $0x144] sm:$0xf] }
 0x68d   : > { %v5763_v47 = vld [vmem:[#allocation14 + $0x130] sm:$0xf] }
 0x68e   : > { %3785 = vst [vmem:[#allocation2 + $0x50] sm:$0xff] %v3777_v50  ;;  %v3746_v6 = vadd.f32 %v3745_v2, %v3717_v22  ;;  %4236 = vmatpush.bf16.msra.mxu0 %v5796_v32  ;;  %4265 = vmatpush.bf16.msra.mxu1 %v5800_v25  ;;  %v6139_v25 = vld [vmem:[#allocation14 + $0x134] sm:$0xf] }
 0x690   : > { %v3758_v61 = vmax.f32 %v3746_v6, 0.0 }
 0x691   : > { %v3690_v54 = vpop.f32.mrf.mxu2  ;;  %v3721_v48 = vpop.f32.mrf.mxu3 }
 0x692   : > { %v3768_v1 = vmul.f32 %v7290_v40, %v3758_v61  ;;  %v3691_v57 = vadd.f32 %v7287_v43, %v3690_v54 }
 0x693   : > { %v3748_v60 = vpop.f32.mrf.mxu0 }
 0x694   : > { %v3778_v45 = vadd.f32 %v7292_v46, %v3768_v1  ;;  %v3720_v9 = vadd.f32 %v3719_v29, %v3691_v57  ;;  %v6146_v1 = vld [vmem:[#allocation14 + $0x164] sm:$0xf0]  ;;  %v6145_v57 = vld [vmem:[#allocation14 + $0x164] sm:$0xf] }
 0x696   : > { %3786 = vst [vmem:[#allocation2 + $0x58] sm:$0xff] %v3778_v45  ;;  %v3749_v24 = vadd.f32 %v3748_v60, %v3720_v9  ;;  %v3812_v10 = vpack.c.bf16 %v3778_v45, %v3777_v50  ;;  %v5789_v45 = vld [vmem:[#allocation14 + $0x168] sm:$0xf0] }
 0x697   : > { %v5792_v9 = vor.u32 %v6145_v57, %v5789_v45  ;;  %v6135_v57 = vld [vmem:[#allocation14 + $0x114] sm:$0xf]  ;;  %v5749_v45 = vld [vmem:[#allocation14 + $0x118] sm:$0xf0] }
 0x698   : > { %v3759_v58 = vmax.f32 %v3749_v24, 0.0  ;;  %4059 = vmatmul.bf16.gmra.mxu2 %v3812_v10  ;;  %4035 = vmatmul.bf16.gmra.mxu1 %v3812_v10  ;;  %v5779_v24 = vld [vmem:[#allocation14 + $0x150] sm:$0xf]  ;;  %v6144_v10 = vld [vmem:[#allocation14 + $0x154] sm:$0xf0] }
 0x699   : > { %v3692_v15 = vpop.f32.mrf.mxu2  ;;  %4083 = vmatmul.bf16.gmra.mxu3 %v7282_v27  ;;  %4266 = vmatpush.bf16.msra.mxu1 %v5792_v9  ;;  %v5752_v9 = vor.u32 %v6135_v57, %v5749_v45 }
 0x69a   : > { %v3769_v21 = vmul.f32 %v7290_v40, %v3759_v58  ;;  %v3693_v28 = vadd.f32 %v7287_v43, %v3692_v15  ;;  %v5787_v43 = vld [vmem:[#allocation14 + $0x160] sm:$0xf]  ;;  %v6143_v58 = vld [vmem:[#allocation14 + $0x154] sm:$0xf]  ;;  %v5780_v15 = vor.u32 %v6144_v10, %v5779_v24  ;;  %v4021_v24 = vpop.f32.mrf.mxu1 }
 0x69b   : > { %v3750_v50 = vpop.f32.mrf.mxu0  ;;  %v5788_v60 = vor.u32 %v6146_v1, %v5787_v43  ;;  %v5747_v43 = vld [vmem:[#allocation14 + $0x110] sm:$0xf]  ;;  %v6136_v1 = vld [vmem:[#allocation14 + $0x114] sm:$0xf0] }
 0x69c   : > { %v3779_v37 = vadd.f32 %v7292_v46, %v3769_v21  ;;  %v3722_v2 = vadd.f32 %v3721_v48, %v3693_v28  ;;  %v5773_v28 = vld [vmem:[#allocation14 + $0x148] sm:$0xf0]  ;;  %v6140_v48 = vld [vmem:[#allocation14 + $0x134] sm:$0xf0] }
 0x69d   : > { %4237 = vmatpush.bf16.msra.mxu0 %v5788_v60  ;;  %v5776_v32 = vor.u32 %v6141_v12, %v5773_v28  ;;  %v5748_v60 = vor.u32 %v6136_v1, %v5747_v43  ;;  %v7320_v28 = vld [vmem:[#allocation9 + $0x8] ss:$0 sm:$0xff] }
 0x69e   : > { %3787 = vst [vmem:[#allocation2 + $0x60] sm:$0xff] %v3779_v37  ;;  %v3751_v22 = vadd.f32 %v3750_v50, %v3722_v2  ;;  %v5765_v2 = vld [vmem:[#allocation14 + $0x138] sm:$0xf0] }
 0x69f   : > { %v5768_v50 = vor.u32 %v6139_v25, %v5765_v2 }
 0x6a0   : > { %v3760_v6 = vmax.f32 %v3751_v22, 0.0  ;;  %v5755_v22 = vld [vmem:[#allocation14 + $0x120] sm:$0xf] }
 0x6a1   : > { %4238 = vmatpush.bf16.msra.mxu0 %v5780_v15  ;;  %v6134_v15 = vld [vmem:[#allocation14 + $0x104] sm:$0xf0] }
 0x6a2   : > { %v3770_v61 = vmul.f32 %v7290_v40, %v3760_v6  ;;  %v5784_v40 = vor.u32 %v6143_v58, %v5781_v18  ;;  %v6138_v6 = vld [vmem:[#allocation14 + $0x124] sm:$0xf0]  ;;  %v5739_v58 = vld [vmem:[#allocation14 + $0x100] sm:$0xf]  ;;  %v6133_v18 = vld [vmem:[#allocation14 + $0x104] sm:$0xf]  ;;  %v4023_v12 = vpop.f32.mrf.mxu1 }
 0x6a4   : > { %v3780_v29 = vadd.f32 %v7292_v46, %v3770_v61  ;;  %4267 = vmatpush.bf16.msra.mxu1 %v5784_v40  ;;  %v5771_v46 = vld [vmem:[#allocation14 + $0x140] sm:$0xf]  ;;  %v6137_v61 = vld [vmem:[#allocation14 + $0x124] sm:$0xf]  ;;  %v5740_v40 = vor.u32 %v6134_v15, %v5739_v58 }
 0x6a5   : > { %v5772_v21 = vor.u32 %v6142_v19, %v5771_v46  ;;  %v5741_v46 = vld [vmem:[#allocation14 + $0x108] sm:$0xf0] }
 0x6a6   : > { %3788 = vst [vmem:[#allocation2 + $0x68] sm:$0xff] %v3780_v29  ;;  %v3815_v54 = vpack.c.bf16 %v3780_v29, %v3779_v37  ;;  %v5764_v37 = vor.u32 %v6140_v48, %v5763_v47  ;;  %v5757_v29 = vld [vmem:[#allocation14 + $0x128] sm:$0xf0]  ;;  %v5744_v19 = vor.u32 %v6133_v18, %v5741_v46 }
 0x6a7   : > { %4239 = vmatpush.bf16.msra.mxu0 %v5772_v21 }
 0x6a8   : > { %4064 = vmatmul.bf16.gmra.mxu2 %v3815_v54  ;;  %4268 = vmatpush.bf16.msra.mxu1 %v5776_v32  ;;  %v4022_v32 = vadd.f32 %v7320_v28, %v4021_v24 }
 0x6a9   : > { %4088 = vmatmul.bf16.gmra.mxu3 %v3815_v54  ;;  %v5760_v54 = vor.u32 %v6137_v61, %v5757_v29 }
 0x6ab   : > { %4240 = vmatpush.bf16.msra.mxu0 %v5764_v37 }
 0x6ac   : > { %4269 = vmatpush.bf16.msra.mxu1 %v5768_v50  ;;  %v4024_v50 = vadd.f32 %v7320_v28, %v4023_v12 }
 0x6b0   : > { %4270 = vmatpush.bf16.msra.mxu1 %v5760_v54  ;;  %v7327_v54 = vld [vmem:[#allocation12 + $0x8] ss:$0 sm:$0xff] }
 0x6b4   : > { %4271 = vmatpush.bf16.msra.mxu1 %v5752_v9 }
 0x6b8   : > { %4272 = vmatpush.bf16.msra.mxu1 %v5744_v19 }
 0x6b9   : > { %4093 = vmatmul.bf16.gmra.mxu3 %v7282_v27  ;;  %v5756_v27 = vor.u32 %v6138_v6, %v5755_v22  ;;  %v7324_v6 = vld [vmem:[#allocation11 + $0x8] ss:$0 sm:$0xff] }
 0x6bb   : > { %4241 = vmatpush.bf16.msra.mxu0 %v5756_v27 }
 0x6bf   : > { %4242 = vmatpush.bf16.msra.mxu0 %v5748_v60 }
 0x6c3   : > { %4243 = vmatpush.bf16.msra.mxu0 %v5740_v40 }
 0x6f5   : > { %v4026_v48 = vpop.f32.mrf.mxu1 }
 0x6f6   : > { %v4027_v45 = vadd.f32 %v7320_v28, %v4026_v48 }
 0x6fb   : > { %v4050_v10 = vpop.f32.mrf.mxu2 }
 0x6fc   : > { %v4051_v47 = vadd.f32 %v4050_v10, %v4022_v32 }
 0x6fd   : > { %v4028_v1 = vpop.f32.mrf.mxu1 }
 0x703   : > { %v4052_v21 = vpop.f32.mrf.mxu2 }
 0x704   : > { %v4053_v61 = vadd.f32 %v4052_v21, %v4024_v50  ;;  %v4029_v21 = vadd.f32 %v7320_v28, %v4028_v1 }
 0x705   : > { %v4031_v12 = vpop.f32.mrf.mxu1 }
 0x706   : > { %v4032_v50 = vadd.f32 %v7320_v28, %v4031_v12 }
 0x70b   : > { %v4055_v2 = vpop.f32.mrf.mxu2 }
 0x70c   : > { %v4079_v25 = vpop.f32.mrf.mxu3  ;;  %v4056_v10 = vadd.f32 %v4055_v2, %v4027_v45 }
 0x70d   : > { %v4080_v37 = vadd.f32 %v4079_v25, %v4051_v47 }
 0x70f   : > { %v4099_v22 = vmax.f32 %v4080_v37, 0.0 }
 0x711   : > { %v4109_v29 = vmul.f32 %v7324_v6, %v4099_v22 }
 0x713   : > { %v4057_v60 = vpop.f32.mrf.mxu2  ;;  %v4119_v9 = vadd.f32 %v7327_v54, %v4109_v29 }
 0x714   : > { %v4081_v27 = vpop.f32.mrf.mxu3  ;;  %v4058_v48 = vadd.f32 %v4057_v60, %v4029_v21 }
 0x715   : > { %v4082_v43 = vadd.f32 %v4081_v27, %v4053_v61  ;;  %v4127_v18 = vadd.f32 %v4119_v9, %v6903_v39  ;;  %v4033_v61 = vpop.f32.mrf.mxu1 }
 0x716   : > { %v4034_v9 = vadd.f32 %v7320_v28, %v4033_v61 }
 0x717   : > { %v4100_v57 = vmax.f32 %v4082_v43, 0.0 }
 0x719   : > { %v4110_v24 = vmul.f32 %v7324_v6, %v4100_v57 }
 0x71b   : > { %v4120_v58 = vadd.f32 %v7327_v54, %v4110_v24  ;;  %v4060_v47 = vpop.f32.mrf.mxu2 }
 0x71c   : > { %v4084_v15 = vpop.f32.mrf.mxu3  ;;  %v4061_v27 = vadd.f32 %v4060_v47, %v4032_v50  ;;  %v6154_v47 = vld [vmem:[#allocation15 + $0x28] sm:$0xff] }
 0x71d   : > { %v4128_v40 = vadd.f32 %v4120_v58, %v6906_v41  ;;  %v4085_v46 = vadd.f32 %v4084_v15, %v4056_v10  ;;  %v6156_v58 = vld [vmem:[#allocation15 + $0x38] sm:$0xff] }
 0x71e   : > { %v6164_v15 = vld [vmem:[#allocation15 + $0x78] sm:$0xff]  ;;  %4450 = vmatpush.bf16.msra.mxu2 %v6156_v58 }
 0x71f   : > { %v4135_v19 = vpack.c.bf16 %v4128_v40, %v4127_v18  ;;  %v4101_v32 = vmax.f32 %v4085_v46, 0.0  ;;  %4479 = vmatpush.bf16.msra.mxu3 %v6164_v15  ;;  %v6155_v40 = vld [vmem:[#allocation15 + $0x30] sm:$0xff] }
 0x720   : > { %v6163_v46 = vld [vmem:[#allocation15 + $0x70] sm:$0xff] }
 0x721   : > { %4244 = vmatmul.bf16.vlgmr.msra.gmra.mxu0 %v4135_v19  ;;  %4273 = vmatmul.bf16.vlgmr.msra.gmra.mxu1 %v4135_v19  ;;  %v4111_v37 = vmul.f32 %v7324_v6, %v4101_v32  ;;  %v4036_v19 = vpop.f32.mrf.mxu1  ;;  %v6151_v15 = vld [vmem:[#allocation15 + $0x10] sm:$0xff] }
 0x722   : > { %4451 = vmatpush.bf16.msra.mxu2 %v6155_v40 }
 0x723   : > { %v4121_v39 = vadd.f32 %v7327_v54, %v4111_v37  ;;  %v4062_v43 = vpop.f32.mrf.mxu2  ;;  %4480 = vmatpush.bf16.msra.mxu3 %v6163_v46 }
 0x724   : > { %v4086_v25 = vpop.f32.mrf.mxu3  ;;  %v4063_v18 = vadd.f32 %v4062_v43, %v4034_v9 }
 0x725   : > { %v4087_v2 = vadd.f32 %v4086_v25, %v4058_v48  ;;  %v4129_v60 = vadd.f32 %v4121_v39, %v6914_v44  ;;  %v6162_v48 = vld [vmem:[#allocation15 + $0x68] sm:$0xff]  ;;  %v4037_v25 = vadd.f32 %v7320_v28, %v4036_v19  ;;  %v6153_v39 = vld [vmem:[#allocation15 + $0x20] sm:$0xff] }
 0x726   : > { %4452 = vmatpush.bf16.msra.mxu2 %v6154_v47  ;;  %v6150_v19 = vld [vmem:[#allocation15 + $0x8] sm:$0xff] }
 0x727   : > { %v4102_v22 = vmax.f32 %v4087_v2, 0.0  ;;  %4481 = vmatpush.bf16.msra.mxu3 %v6162_v48  ;;  %v6149_v48 = vld [vmem:[#allocation15] sm:$0xff] }
 0x729   : > { %v4112_v41 = vmul.f32 %v7324_v6, %v4102_v22 }
 0x72a   : > { %4453 = vmatpush.bf16.msra.mxu2 %v6153_v39 }
 0x72b   : > { %v4122_v29 = vadd.f32 %v7327_v54, %v4112_v41  ;;  %v4065_v32 = vpop.f32.mrf.mxu2  ;;  %v6161_v41 = vld [vmem:[#allocation15 + $0x60] sm:$0xff] }
 0x72c   : > { %v4089_v1 = vpop.f32.mrf.mxu3  ;;  %v4066_v50 = vadd.f32 %v4065_v32, %v4037_v25  ;;  %4482 = vmatpush.bf16.msra.mxu3 %v6161_v41  ;;  %v6157_v25 = vld [vmem:[#allocation15 + $0x40] sm:$0xff] }
 0x72d   : > { %v4090_v57 = vadd.f32 %v4089_v1, %v4061_v27  ;;  %v4130_v45 = vadd.f32 %v4122_v29, %v6917_v49  ;;  %v4038_v1 = vpop.f32.mrf.mxu1 }
 0x72f   : > { %v4136_v24 = vpack.c.bf16 %v4130_v45, %v4129_v60  ;;  %v4103_v10 = vmax.f32 %v4090_v57, 0.0  ;;  %v6152_v60 = vld [vmem:[#allocation15 + $0x18] sm:$0xff] }
 0x730   : > { %v6160_v45 = vld [vmem:[#allocation15 + $0x58] sm:$0xff]  ;;  %4454 = vmatpush.bf16.msra.mxu2 %v6152_v60 }
 0x731   : > { %4249 = vmatmul.bf16.gmra.mxu0 %v4136_v24  ;;  %4278 = vmatmul.bf16.gmra.mxu1 %v4136_v24  ;;  %v4113_v21 = vmul.f32 %v7324_v6, %v4103_v10  ;;  %v4039_v24 = vadd.f32 %v7320_v28, %v4038_v1 }
 0x732   : > { %4483 = vmatpush.bf16.msra.mxu3 %v6160_v45 }
 0x733   : > { %v4123_v37 = vadd.f32 %v7327_v54, %v4113_v21  ;;  %v4067_v9 = vpop.f32.mrf.mxu2 }
 0x734   : > { %v4091_v12 = vpop.f32.mrf.mxu3  ;;  %v4068_v58 = vadd.f32 %v4067_v9, %v4039_v24  ;;  %4455 = vmatpush.bf16.msra.mxu2 %v6151_v15 }
 0x735   : > { %v4092_v44 = vadd.f32 %v4091_v12, %v4063_v18  ;;  %v4131_v29 = vadd.f32 %v4123_v37, %v6925_v55  ;;  %v6159_v18 = vld [vmem:[#allocation15 + $0x50] sm:$0xff]  ;;  %v6158_v12 = vld [vmem:[#allocation15 + $0x48] sm:$0xff] }
 0x736   : > { %4484 = vmatpush.bf16.msra.mxu3 %v6159_v18 }
 0x737   : > { %v4104_v49 = vmax.f32 %v4092_v44, 0.0 }
 0x738   : > { %4456 = vmatpush.bf16.msra.mxu2 %v6150_v19 }
 0x739   : > { %v4114_v2 = vmul.f32 %v7324_v6, %v4104_v49 }
 0x73a   : > { %4485 = vmatpush.bf16.msra.mxu3 %v6158_v12 }
 0x73b   : > { %v4124_v22 = vadd.f32 %v7327_v54, %v4114_v2 }
 0x73c   : > { %v4094_v61 = vpop.f32.mrf.mxu3  ;;  %4457 = vmatpush.bf16.msra.mxu2 %v6149_v48 }
 0x73d   : > { %v4095_v27 = vadd.f32 %v4094_v61, %v4066_v50  ;;  %v4132_v43 = vadd.f32 %v4124_v22, %v6928_v62 }
 0x73e   : > { %4486 = vmatpush.bf16.msra.mxu3 %v6157_v25 }
 0x73f   : > { %v4137_v57 = vpack.c.bf16 %v4132_v43, %v4131_v29  ;;  %v4105_v10 = vmax.f32 %v4095_v27, 0.0 }
 0x741   : > { %4254 = vmatmul.bf16.gmra.mxu0 %v4137_v57  ;;  %4283 = vmatmul.bf16.gmra.mxu1 %v4137_v57  ;;  %v4115_v62 = vmul.f32 %v7324_v6, %v4105_v10 }
 0x743   : > { %v4125_v21 = vadd.f32 %v7327_v54, %v4115_v62 }
 0x744   : > { %v4096_v55 = vpop.f32.mrf.mxu3 }
 0x745   : > { %v4097_v40 = vadd.f32 %v4096_v55, %v4068_v58  ;;  %v4133_v32 = vadd.f32 %v4125_v21, %v6936_v8 }
 0x747   : > { %v4106_v46 = vmax.f32 %v4097_v40, 0.0 }
 0x749   : > { %v4116_v28 = vmul.f32 %v7324_v6, %v4106_v46  ;;  %v1874_v6 = vadd.f32 %v7202_v63, %v7059_v0 }
 0x74b   : > { %v4126_v44 = vadd.f32 %v7327_v54, %v4116_v28  ;;  %v1875_v54 = vadd.f32 %v7206_v23, %v7105_v3  ;;  %v3085_v50 = vadd.f32 %v7214_v42, %v1874_v6  ;;  %v1878_v3 = vadd.f32 %v7202_v63, %v7063_v5 }
 0x74c   : > { %v1879_v42 = vadd.f32 %v7206_v23, %v7109_v4  ;;  %v1882_v4 = vadd.f32 %v7202_v63, %v7067_v14 }
 0x74d   : > { %v4134_v49 = vadd.f32 %v4126_v44, %v6939_v13  ;;  %v3086_v8 = vadd.f32 %v7216_v35, %v1875_v54  ;;  %v3089_v35 = vadd.f32 %v7226_v51, %v1878_v3  ;;  %v1883_v51 = vadd.f32 %v7206_v23, %v7113_v20 }
 0x74e   : > { %v1886_v20 = vadd.f32 %v7202_v63, %v7071_v30  ;;  %v6319_v30 = vld [vmem:[%s7448_s10] ss:$0 sm:$0xff] }
 0x74f   : > { %v4138_v47 = vpack.c.bf16 %v4134_v49, %v4133_v32 }
 0x751   : > { %4259 = vmatmul.bf16.gmra.mxu0 %v4138_v47  ;;  %4288 = vmatmul.bf16.gmra.mxu1 %v4138_v47 }
 0x79e   : > { %v4245_v37 = vpop.f32.mrf.mxu0  ;;  %v4274_v2 = vpop.f32.mrf.mxu1 }
 0x79f   : > { %v4294_v39 = vadd.f32 %v4245_v37, %v7208_v26  ;;  %v4295_v41 = vadd.f32 %v4274_v2, %v7212_v34  ;;  %v3090_v26 = vadd.f32 %v7228_v56, %v1879_v42  ;;  %v3093_v56 = vadd.f32 %v7238_v7, %v1882_v4 }
 0x7a0   : > { %v1887_v7 = vadd.f32 %v7206_v23, %v7117_v33 }
 0x7a6   : > { %v4247_v13 = vpop.f32.mrf.mxu0  ;;  %v4276_v22 = vpop.f32.mrf.mxu1 }
 0x7a7   : > { %v4296_v61 = vadd.f32 %v4247_v13, %v3085_v50  ;;  %v4297_v27 = vadd.f32 %v4276_v22, %v3086_v8 }
 0x7a9   : > { %v4310_v29 = vpack.c.bf16 %v4296_v61, %v4294_v39  ;;  %v4311_v43 = vpack.c.bf16 %v4297_v27, %v4295_v41 }
 0x7ab   : > { %4458 = vmatmul.bf16.vlgmr.msra.gmra.mxu2 %v4310_v29  ;;  %4487 = vmatmul.bf16.vlgmr.msra.gmra.mxu3 %v4311_v43 }
 0x7ae   : > { %v4250_v0 = vpop.f32.mrf.mxu0  ;;  %v4279_v1 = vpop.f32.mrf.mxu1 }
 0x7af   : > { %v4298_v60 = vadd.f32 %v4250_v0, %v7220_v31  ;;  %v4299_v45 = vadd.f32 %v4279_v1, %v7224_v52  ;;  %v3094_v31 = vadd.f32 %v7240_v11, %v1883_v51  ;;  %v3097_v11 = vadd.f32 %v7250_v16, %v1886_v20 }
 0x7b6   : > { %v4252_v57 = vpop.f32.mrf.mxu0  ;;  %v4281_v34 = vpop.f32.mrf.mxu1 }
 0x7b7   : > { %v4300_v9 = vadd.f32 %v4252_v57, %v3089_v35  ;;  %v4301_v24 = vadd.f32 %v4281_v34, %v3090_v26 }
 0x7b9   : > { %v4312_v10 = vpack.c.bf16 %v4300_v9, %v4298_v60  ;;  %v4313_v58 = vpack.c.bf16 %v4301_v24, %v4299_v45 }
 0x7bb   : > { %4463 = vmatmul.bf16.gmra.mxu2 %v4312_v10  ;;  %4492 = vmatmul.bf16.gmra.mxu3 %v4313_v58 }
 0x7be   : > { %v4255_v5 = vpop.f32.mrf.mxu0  ;;  %v4284_v15 = vpop.f32.mrf.mxu1 }
 0x7bf   : > { %v4302_v55 = vadd.f32 %v4255_v5, %v7232_v59  ;;  %v4303_v62 = vadd.f32 %v4284_v15, %v7236_v36  ;;  %v3098_v59 = vadd.f32 %v7285_v38, %v1887_v7 }
 0x7c6   : > { %v4257_v18 = vpop.f32.mrf.mxu0  ;;  %v4286_v52 = vpop.f32.mrf.mxu1 }
 0x7c7   : > { %v4304_v40 = vadd.f32 %v4257_v18, %v3093_v56  ;;  %v4305_v46 = vadd.f32 %v4286_v52, %v3094_v31 }
 0x7c9   : > { %v4314_v19 = vpack.c.bf16 %v4304_v40, %v4302_v55  ;;  %v4315_v12 = vpack.c.bf16 %v4305_v46, %v4303_v62 }
 0x7cb   : > { %4468 = vmatmul.bf16.gmra.mxu2 %v4314_v19  ;;  %4497 = vmatmul.bf16.gmra.mxu3 %v4315_v12 }
 0x7ce   : > { %v4260_v14 = vpop.f32.mrf.mxu0  ;;  %v4289_v21 = vpop.f32.mrf.mxu1 }
 0x7cf   : > { %v4306_v44 = vadd.f32 %v4260_v14, %v7244_v17  ;;  %v4307_v32 = vadd.f32 %v4289_v21, %v7248_v53 }
 0x7d6   : > { %v4262_v36 = vpop.f32.mrf.mxu0  ;;  %v4291_v28 = vpop.f32.mrf.mxu1 }
 0x7d7   : > { %v4308_v49 = vadd.f32 %v4262_v36, %v3097_v11  ;;  %v4309_v47 = vadd.f32 %v4291_v28, %v3098_v59 }
 0x7d9   : > { %v4316_v48 = vpack.c.bf16 %v4308_v49, %v4306_v44  ;;  %v4317_v25 = vpack.c.bf16 %v4309_v47, %v4307_v32 }
 0x7db   : > { %4473 = vmatmul.bf16.gmra.mxu2 %v4316_v48  ;;  %4502 = vmatmul.bf16.gmra.mxu3 %v4317_v25 }
 0x82e   : > { %v4459_v33 = vpop.f32.mrf.mxu2  ;;  %v4488_v63 = vpop.f32.mrf.mxu3 }
 0x82f   : > { %v4460_v23 = vadd.f32 %v6319_v30, %v4459_v33 }
 0x831   : > { %v4489_v16 = vadd.f32 %v4488_v63, %v4460_v23 }
 0x833   : > { %4508 = vst [vmem:[%s7394_s28] sm:$0xff] %v4489_v16 }
 0x836   : > { %v4461_v17 = vpop.f32.mrf.mxu2  ;;  %v4490_v53 = vpop.f32.mrf.mxu3 }
 0x837   : > { %v4462_v38 = vadd.f32 %v6319_v30, %v4461_v17 }
 0x839   : > { %v4491_v37 = vadd.f32 %v4490_v53, %v4462_v38 }
 0x83b   : > { %4509 = vst [vmem:[%s7394_s28 + $0x8] sm:$0xff] %v4491_v37 }
 0x83e   : > { %v4464_v2 = vpop.f32.mrf.mxu2  ;;  %v4493_v6 = vpop.f32.mrf.mxu3 }
 0x83f   : > { %v4465_v54 = vadd.f32 %v6319_v30, %v4464_v2 }
 0x841   : > { %v4494_v50 = vadd.f32 %v4493_v6, %v4465_v54 }
 0x843   : > { %4510 = vst [vmem:[%s7394_s28 + $0x10] sm:$0xff] %v4494_v50 }
 0x846   : > { %v4466_v8 = vpop.f32.mrf.mxu2  ;;  %v4495_v13 = vpop.f32.mrf.mxu3 }
 0x847   : > { %v4467_v22 = vadd.f32 %v6319_v30, %v4466_v8 }
 0x849   : > { %v4496_v39 = vadd.f32 %v4495_v13, %v4467_v22 }
 0x84b   : > { %4511 = vst [vmem:[%s7394_s28 + $0x18] sm:$0xff] %v4496_v39 }
 0x84e   : > { %v4469_v41 = vpop.f32.mrf.mxu2  ;;  %v4498_v61 = vpop.f32.mrf.mxu3 }
 0x84f   : > { %v4470_v27 = vadd.f32 %v6319_v30, %v4469_v41 }
 0x851   : > { %v4499_v29 = vadd.f32 %v4498_v61, %v4470_v27 }
 0x853   : > { %4512 = vst [vmem:[%s7394_s28 + $0x20] sm:$0xff] %v4499_v29 }
 0x856   : > { %v4471_v43 = vpop.f32.mrf.mxu2  ;;  %v4500_v0 = vpop.f32.mrf.mxu3 }
 0x857   : > { %v4472_v1 = vadd.f32 %v6319_v30, %v4471_v43 }
 0x859   : > { %v4501_v3 = vadd.f32 %v4500_v0, %v4472_v1 }
 0x85b   : > { %4513 = vst [vmem:[%s7394_s28 + $0x28] sm:$0xff] %v4501_v3 }
 0x85e   : > { %v4474_v42 = vpop.f32.mrf.mxu2  ;;  %v4503_v35 = vpop.f32.mrf.mxu3 }
 0x85f   : > { %v4475_v26 = vadd.f32 %v6319_v30, %v4474_v42 }
 0x861   : > { %v4504_v57 = vadd.f32 %v4503_v35, %v4475_v26 }
 0x863   : > { %4514 = vst [vmem:[%s7394_s28 + $0x30] sm:$0xff] %v4504_v57 }
 0x866   : > { %v4476_v34 = vpop.f32.mrf.mxu2  ;;  %v4505_v45 = vpop.f32.mrf.mxu3 }
 0x867   : > { %v4477_v60 = vadd.f32 %v6319_v30, %v4476_v34 }
 0x869   : > { %v4506_v9 = vadd.f32 %v4505_v45, %v4477_v60 }
 0x86b   : > { %4515 = vst [vmem:[%s7394_s28 + $0x38] sm:$0xff] %v4506_v9 }
 0x86c   : > { %6588 = shalt.err (!%p6585_p9)
}
 0x86d   : > { %s6657_s15 = smov 128   ;;  %s6658_s29 = smov 8  }
 0x86e   : > { %6197 = dma.vmem_to_hbm [thread:$0]  (%p6836_p13), %s4531_s6, 1024, %s4533_s7, %s4517_s4, %s6657_s15, %s6657_s15, %s6658_s29  }
 0x86f PF: > { %s4547_s28 = sand.u32 1, %s6631_s17   ;;  %p7473_p10 = scmp.ge.s32.totalorder %s6643_s20, 2 }
 0x870   : > { %s4548_s16 = scalar_lea.sflag [#allocation5], %s4547_s28 }
 0x871   : > { %p6226_p11 = pnand %p7473_p10, %p6841_p4 }
 0x873   : > { %p6227_p0 = pneg %p6226_p11 }
 0x875   : > { %6626 = dma.done.wait (%p6227_p0), %s4548_s16, 1024  }
 0x876   : > { %6628 = vsyncadd (%p6227_p0), %s4548_s16, 4294966272  ;;  %p28_p2 = scmp.ge.s32.totalorder %s6816_s30, 4   ;;  %s7474_s17 = smov %s6635_s18 }
 0x877   : > { %s7475_s18 = smov %s6639_s19  ;;  %s7476_s19 = smov %s6828_s21 }
 0x878   : > { %s7477_s20 = smov %s6816_s30  ;;  %30 = sbr.rel (!%p28_p2) target bundleno = 16 (0x10), region = 147 }
 0x87d   :  { %4554 = vsyncpa [#allocation4], 1 }
 0x87e   :  { %4556 = vsyncpa [#allocation4 + $0x1], 1 }
 0x87f   :  { %4557 = vsyncpa [#allocation7], 1 }
 0x880   :  { %4558 = vsyncpa [#allocation10], 1 }
 0x881   :  { %4559 = vsyncpa [#allocation13], 1 }
 0x882   :  { %4560 = vsyncpa [#allocation16], 1 }
 0x883   :  { %4561 = vsyncpa [#allocation5], 1 }
 0x884   :  { %4563 = vsyncpa [#allocation5 + $0x1], 1 }

</bundles_post_ra>
